<compile_context>
chip_gen: v5e
topology: v5e:2x2
jax: 0.10.0
libtpu: 0.0.40
codegen_flags: <defaults>
</compile_context>

<pallas_src>
import functools

import jax
import jax.numpy as jnp
from jax.experimental import pallas as pl
from jax.experimental.pallas import tpu as pltpu

_ACT_DTYPE = jnp.bfloat16
_VMEM_LIMIT = 32 * 1024 * 1024    # scoped VMEM limit — safe on v5e/v6e/v7x
_VMEM_BUDGET = 24 * 1024 * 1024   # target working set (headroom under the limit)
_TH_MAX = 8                       # max output rows per grid step


# ----------------------------------------------------------------------------
# Pallas kernels
# ----------------------------------------------------------------------------
def _conv3x3_kernel(*refs, n_parts, N, W, th, cins):
    """One block of `th` output rows of a (multi-input) 3x3 conv + bias + LeakyReLU.

    refs = [win_0 .. win_{P-1}, w, b, o, lhs_scratch]
      win_p : (1, (th+2)*WpN + 2N, Cin_p)  padded input window for this block, bf16
      w     : (9*sum(Cin), Cout)           rows ordered (part, kh*3+kw, cin), bf16
      b     : (1, Cout)                    f32
      o     : (th, W*N, Cout)              bf16
      lhs   : (th*WpN, 9*sum(Cin))         VMEM scratch (im2col built in VMEM)
    """
    win_refs = refs[:n_parts]
    w_ref = refs[n_parts]
    b_ref = refs[n_parts + 1]
    o_ref = refs[n_parts + 2]
    lhs_ref = refs[n_parts + 3]

    WN = W * N
    WpN = (W + 2) * N
    Mw = th * WpN                  # "wide" M: output computed at all W+2 columns

    # Build the (Mw, 9*sum(Cin)) LHS in VMEM from 9 contiguous shifted views per
    # input part (static offsets only — no HBM im2col).
    col = 0
    for p in range(n_parts):
        ci = cins[p]
        for kh in range(3):
            for kw in range(3):
                s = kh * WpN + kw * N
                lhs_ref[:, col:col + ci] = win_refs[p][0, s:s + Mw, :]
                col += ci

    # Single K = 9*sum(Cin) matmul (streams M once instead of 9 tiny-K dots).
    acc = jnp.dot(lhs_ref[...], w_ref[...], preferred_element_type=jnp.float32)
    acc = acc + b_ref[...]
    act = jnp.maximum(acc, 0.2 * acc).astype(o_ref.dtype)     # LeakyReLU(0.2)

    # Keep only the W valid columns of each output row; the two pad columns of
    # the wide result are garbage and dropped here.
    for g in range(th):
        o_ref[g] = act[g * WpN:g * WpN + WN, :]


def _maxpool_kernel(x_ref, o_ref, *, NC):
    """2x2/2 max pool on a (tho, 2, Wo, 2*N*C) slab -> (tho, Wo, N*C)."""
    v = x_ref[...]                                            # (tho, 2, Wo, 2NC)
    m = jnp.maximum(v[:, 0], v[:, 1])                         # pool over h pairs
    o_ref[...] = jnp.maximum(m[..., :NC], m[..., NC:])        # pool over w pairs


# ----------------------------------------------------------------------------
# Helpers and wrappers around pallas_call (activations in HWNC layout)
# ----------------------------------------------------------------------------
def _conv_vmem_bytes(th, W, N, cins, cout):
    """Rough double-buffered VMEM working-set estimate for one conv call."""
    WpN = (W + 2) * N
    lw = (th + 2) * WpN + 2 * N
    mw = th * WpN
    ktot = 9 * sum(cins)
    lanes = lambda c: max(c, 128)                             # lane padding
    win = 2 * sum(lw * lanes(c) for c in cins) * 2            # bf16, 2 buffers
    lhs = mw * lanes(ktot) * 2
    acc = mw * lanes(cout) * 4
    out = 2 * th * W * N * lanes(cout) * 2
    wts = 2 * ktot * lanes(cout) * 2
    return win + lhs + acc + out + wts


def _pick_th(H, W, N, cins, cout):
    """Largest divisor of H that keeps >=2 grid steps (v7x megacore) and fits VMEM."""
    cap = min(_TH_MAX, max(1, H // 2))
    cands = [t for t in range(cap, 0, -1) if H % t == 0]
    for th in cands:
        if _conv_vmem_bytes(th, W, N, cins, cout) <= _VMEM_BUDGET:
            return th
    return cands[-1]


def _build_windows(x_hwnc, th):
    """Per-block padded input windows: (H//th, (th+2)*WpN + 2N, C).

    Block h holds padded rows [h*th, h*th+th+2) flattened over (W+2, N) plus a
    2N-row zero tail so every shifted tap view stays in bounds.  This is the
    only duplicated input data (~2/th of one activation).
    """
    H, W, N, C = x_hwnc.shape
    WpN = (W + 2) * N
    nb = H // th
    Lw = (th + 2) * WpN + 2 * N
    xp = jnp.pad(x_hwnc, ((1, 1), (1, 1), (0, 0), (0, 0)))    # zero 'same' pad
    xflat = xp.reshape((H + 2) * WpN, C)
    xflat = jnp.concatenate([xflat, jnp.zeros((2 * N, C), xflat.dtype)], axis=0)
    return jnp.stack(
        [xflat[h * th * WpN: h * th * WpN + Lw] for h in range(nb)], axis=0)


def conv3x3_lrelu(parts, w, b):
    """Fused 3x3 same-conv + bias + LeakyReLU(0.2) over a (virtual) channel concat.

    parts : list of (H, W, N, Cin_i) bf16 arrays (channel-concat is implied).
    w     : (3, 3, sum(Cin_i), Cout) f32, HWIO.
    b     : (Cout,) f32.
    """
    if not isinstance(parts, (list, tuple)):
        parts = [parts]
    parts = [p.astype(_ACT_DTYPE) for p in parts]
    H, W, N, _ = parts[0].shape
    cins = [int(p.shape[-1]) for p in parts]
    cin_tot = sum(cins)
    Cout = int(w.shape[-1])
    assert w.shape == (3, 3, cin_tot, Cout)

    WN, WpN = W * N, (W + 2) * N
    th = _pick_th(H, W, N, cins, Cout)
    nb = H // th
    Lw = (th + 2) * WpN + 2 * N
    Mw = th * WpN
    Ktot = 9 * cin_tot

    wins = [_build_windows(p, th) for p in parts]

    # Split weights per part, flatten each to (9*Cin_i, Cout), stack part-major.
    w_parts, off = [], 0
    for ci in cins:
        w_parts.append(w[:, :, off:off + ci, :].reshape(9 * ci, Cout))
        off += ci
    w_all = jnp.concatenate(w_parts, axis=0).astype(_ACT_DTYPE)   # (Ktot, Cout)
    b2 = b.reshape(1, Cout).astype(jnp.float32)

    in_specs = [pl.BlockSpec((1, Lw, ci), lambda h: (h, 0, 0)) for ci in cins]
    in_specs += [pl.BlockSpec((Ktot, Cout), lambda h: (0, 0)),
                 pl.BlockSpec((1, Cout), lambda h: (0, 0))]

    flops = 2 * nb * Mw * Ktot * Cout
    bytes_acc = int(sum(win.size for win in wins) * 2
                    + Ktot * Cout * 2 + Cout * 4 + H * WN * Cout * 2)

    out = pl.pallas_call(
        functools.partial(_conv3x3_kernel, n_parts=len(parts), N=N, W=W, th=th,
                          cins=tuple(cins)),
        out_shape=jax.ShapeDtypeStruct((H, WN, Cout), _ACT_DTYPE),
        grid=(nb,),
        in_specs=in_specs,
        out_specs=pl.BlockSpec((th, WN, Cout), lambda h: (h, 0, 0)),
        scratch_shapes=[pltpu.VMEM((Mw, Ktot), _ACT_DTYPE)],
        compiler_params=pltpu.CompilerParams(
            dimension_semantics=("parallel",),
            vmem_limit_bytes=_VMEM_LIMIT),
        cost_estimate=pl.CostEstimate(flops=int(flops), transcendentals=0,
                                      bytes_accessed=bytes_acc),
    )(*wins, w_all, b2)
    return out.reshape(H, W, N, Cout)


def maxpool2x2(x):
    """MaxPool2d(kernel=2, stride=2) on (H, W, N, C) input (H, W even)."""
    H, W, N, C = x.shape
    assert H % 2 == 0 and W % 2 == 0, "maxpool2x2 requires even H and W"
    Ho, Wo, NC = H // 2, W // 2, N * C

    xr = x.reshape(Ho, 2, Wo, 2 * NC)                         # free reshape
    tho = Ho if Ho <= 64 else 64

    out = pl.pallas_call(
        functools.partial(_maxpool_kernel, NC=NC),
        out_shape=jax.ShapeDtypeStruct((Ho, Wo, NC), x.dtype),
        grid=(pl.cdiv(Ho, tho),),
        in_specs=[pl.BlockSpec((tho, 2, Wo, 2 * NC), lambda i: (i, 0, 0, 0))],
        out_specs=pl.BlockSpec((tho, Wo, NC), lambda i: (i, 0, 0)),
        compiler_params=pltpu.CompilerParams(
            dimension_semantics=("parallel",),
            vmem_limit_bytes=_VMEM_LIMIT),
    )(xr)
    return out.reshape(Ho, Wo, N, C)


def upsample2_nearest(x):
    """nn.Upsample(scale_factor=2, mode='nearest') on (H, W, N, C)."""
    # TODO(synk): fuse the x2 repeat into the consuming decoder conv.
    return jnp.repeat(jnp.repeat(x, 2, axis=0), 2, axis=1)


# ----------------------------------------------------------------------------
# Parameter construction (mirrors Unet.__init__ with default features)
# ----------------------------------------------------------------------------
def _init_conv(key, cin, cout):
    kw, kb = jax.random.split(key)
    fan_in = 9 * cin
    w = jax.random.normal(kw, (3, 3, cin, cout), jnp.float32) / jnp.sqrt(fan_in)
    bias = 0.01 * jax.random.normal(kb, (cout,), jnp.float32)
    return w, bias


def build_unet_params(key, infeats,
                      enc_nf=(16, 32, 32, 32),
                      dec_nf=(32, 32, 32, 32, 32, 16, 16),
                      nb_conv_per_level=1, half_res=False):
    enc_nf, dec_nf = list(enc_nf), list(dec_nf)
    nb_dec_convs = len(enc_nf)
    final_convs = dec_nf[nb_dec_convs:]
    dec_nf_ = dec_nf[:nb_dec_convs]
    nb_levels = nb_dec_convs // nb_conv_per_level + 1

    prev_nf = infeats
    encoder_nfs = [prev_nf]
    enc_params = []
    for level in range(nb_levels - 1):
        convs = []
        for c in range(nb_conv_per_level):
            nf = enc_nf[level * nb_conv_per_level + c]
            key, sub = jax.random.split(key)
            convs.append(_init_conv(sub, prev_nf, nf))
            prev_nf = nf
        enc_params.append(convs)
        encoder_nfs.append(prev_nf)

    encoder_nfs = encoder_nfs[::-1]
    dec_params = []
    for level in range(nb_levels - 1):
        convs = []
        for c in range(nb_conv_per_level):
            nf = dec_nf_[level * nb_conv_per_level + c]
            key, sub = jax.random.split(key)
            convs.append(_init_conv(sub, prev_nf, nf))
            prev_nf = nf
        dec_params.append(convs)
        if not half_res or level < nb_levels - 2:
            prev_nf += encoder_nfs[level]

    rem_params = []
    for nf in final_convs:
        key, sub = jax.random.split(key)
        rem_params.append(_init_conv(sub, prev_nf, nf))
        prev_nf = nf

    return dict(encoder=enc_params, decoder=dec_params, remaining=rem_params,
                nb_levels=nb_levels, half_res=half_res, final_nf=prev_nf)


# ----------------------------------------------------------------------------
# Unet forward (same control flow as the PyTorch module)
# ----------------------------------------------------------------------------
def unet_forward(x_nchw, params):
    # NCHW -> HWNC, bf16 activations
    x = jnp.transpose(x_nchw, (2, 3, 0, 1)).astype(_ACT_DTYPE)
    half_res = params["half_res"]
    nb_levels = params["nb_levels"]

    x_history = [x]
    parts = [x]
    for convs in params["encoder"]:
        for (w, b) in convs:
            x = conv3x3_lrelu(parts, w, b)
            parts = [x]
        x_history.append(x)
        x = maxpool2x2(x)
        parts = [x]

    for level, convs in enumerate(params["decoder"]):
        for (w, b) in convs:
            x = conv3x3_lrelu(parts, w, b)
            parts = [x]
        if not half_res or level < nb_levels - 2:
            x = upsample2_nearest(x)
            # channel concat with the skip is fused into the next conv call
            parts = [x, x_history.pop()]

    for (w, b) in params["remaining"]:
        x = conv3x3_lrelu(parts, w, b)
        parts = [x]

    x = parts[0] if len(parts) == 1 else jnp.concatenate(parts, axis=-1)
    # HWNC -> NCHW, back to f32
    return jnp.transpose(x, (2, 3, 0, 1)).astype(jnp.float32)


# ----------------------------------------------------------------------------
# Pure-JAX references for self-checks
# ----------------------------------------------------------------------------
def _conv_reference(parts, w, b):
    x_hwnc = parts[0] if len(parts) == 1 else jnp.concatenate(parts, axis=-1)
    wq = w.astype(_ACT_DTYPE).astype(jnp.float32)             # match bf16 weights
    xn = jnp.transpose(x_hwnc, (2, 0, 1, 3)).astype(jnp.float32)   # NHWC
    out = jax.lax.conv_general_dilated(
        xn, wq, window_strides=(1, 1), padding="SAME",
        dimension_numbers=("NHWC", "HWIO", "NHWC"))
    out = out + b
    out = jnp.maximum(out, 0.2 * out)
    return jnp.transpose(out, (1, 2, 0, 3))                   # back to HWNC


def _pool_reference(x_hwnc):
    return jnp.maximum(
        jnp.maximum(x_hwnc[0::2, 0::2], x_hwnc[0::2, 1::2]),
        jnp.maximum(x_hwnc[1::2, 0::2], x_hwnc[1::2, 1::2]))


# ----------------------------------------------------------------------------
# Demo
# ----------------------------------------------------------------------------
if __name__ == "__main__":
    key = jax.random.PRNGKey(0)
    k_x, k_p = jax.random.split(key)

    # Unet(inshape=(16, 16), infeats=4) with the default feature config.
    batch, infeats, H, W = 2, 4, 16, 16
    x = jax.random.normal(k_x, (batch, infeats, H, W), jnp.float32)
    params = build_unet_params(k_p, infeats)

    # --- small self-checks of the Pallas kernels ------------------------------
    x_hwnc = jnp.transpose(x, (2, 3, 0, 1)).astype(_ACT_DTYPE)
    w0, b0 = params["encoder"][0][0]

    conv_k = conv3x3_lrelu([x_hwnc], w0, b0).astype(jnp.float32)
    conv_r = _conv_reference([x_hwnc], w0, b0)
    assert jnp.allclose(conv_k, conv_r, rtol=5e-2, atol=5e-2), "conv mismatch"

    # fused (multi-part) conv == conv of the channel concat
    parts2 = [x_hwnc[..., :2], x_hwnc[..., 2:]]
    conv_k2 = conv3x3_lrelu(parts2, w0, b0).astype(jnp.float32)
    assert jnp.allclose(conv_k2, conv_r, rtol=5e-2, atol=5e-2), "fused conv mismatch"

    pool_k = maxpool2x2(x_hwnc)
    pool_r = _pool_reference(x_hwnc)
    assert bool(jnp.all(pool_k == pool_r)), "maxpool mismatch"

    # --- full forward ----------------------------------------------------------
    fwd = jax.jit(functools.partial(unet_forward, params=params))
    out = fwd(x)
    out = jax.block_until_ready(out)

    expected = (batch, params["final_nf"], H, W)              # (2, 16, 16, 16)
    assert out.shape == expected, (out.shape, expected)
    assert bool(jnp.isfinite(out).all())
    print("KERNEL_OK")
</pallas_src>

<mosaic_0001>
module attributes {stable_mosaic.version = 11 : i64} {
  func.func @_conv3x3_kernel(%arg0: i32, %arg1: memref<1x364x4xbf16, #tpu.memory_space<vmem>>, %arg2: memref<36x16xbf16, #tpu.memory_space<vmem>>, %arg3: memref<1x16xf32, #tpu.memory_space<vmem>>, %arg4: memref<8x32x16xbf16, #tpu.memory_space<vmem>>, %arg5: memref<288x36xbf16, #tpu.memory_space<vmem>>) attributes {dimension_semantics = [#tpu.dimension_semantics<parallel>], iteration_bounds = array<i64: 2>, scalar_prefetch = 0 : i64, scratch_operands = 1 : i64, tpu.core_type = #tpu.core_type<tc>, window_params = [{transform_indices = @transform_0, window_bounds = array<i64: 1, 364, 4>}, {pipeline_mode = #tpu.pipeline_mode<synchronous>, transform_indices = @transform_1, window_bounds = array<i64: 36, 16>}, {pipeline_mode = #tpu.pipeline_mode<synchronous>, transform_indices = @transform_2, window_bounds = array<i64: 1, 16>}, {transform_indices = @transform_3, window_bounds = array<i64: 8, 32, 16>}]} {
    %c0 = arith.constant 0 : index
    %c0_0 = arith.constant 0 : index
    %c0_1 = arith.constant 0 : index
    %0 = vector.load %arg1[%c0, %c0_0, %c0_1] : memref<1x364x4xbf16, #tpu.memory_space<vmem>>, vector<1x288x4xbf16>
    %1 = vector.shape_cast %0 : vector<1x288x4xbf16> to vector<288x4xbf16>
    %c0_2 = arith.constant 0 : index
    %c0_3 = arith.constant 0 : index
    %2 = vector.load %arg5[%c0_2, %c0_3] : memref<288x36xbf16, #tpu.memory_space<vmem>>, vector<288x4xbf16>
    tpu.vector_store %arg5[%c0_2, %c0_3], %1 {strides = array<i32>} : memref<288x36xbf16, #tpu.memory_space<vmem>>, vector<288x4xbf16>,
    %c0_4 = arith.constant 0 : index
    %c2 = arith.constant 2 : index
    %c0_5 = arith.constant 0 : index
    %3 = vector.load %arg1[%c0_4, %c2, %c0_5] : memref<1x364x4xbf16, #tpu.memory_space<vmem>>, vector<1x288x4xbf16>
    %4 = vector.shape_cast %3 : vector<1x288x4xbf16> to vector<288x4xbf16>
    %c0_6 = arith.constant 0 : index
    %c4 = arith.constant 4 : index
    %5 = vector.load %arg5[%c0_6, %c4] : memref<288x36xbf16, #tpu.memory_space<vmem>>, vector<288x4xbf16>
    tpu.vector_store %arg5[%c0_6, %c4], %4 {strides = array<i32>} : memref<288x36xbf16, #tpu.memory_space<vmem>>, vector<288x4xbf16>,
    %c0_7 = arith.constant 0 : index
    %c4_8 = arith.constant 4 : index
    %c0_9 = arith.constant 0 : index
    %6 = vector.load %arg1[%c0_7, %c4_8, %c0_9] : memref<1x364x4xbf16, #tpu.memory_space<vmem>>, vector<1x288x4xbf16>
    %7 = vector.shape_cast %6 : vector<1x288x4xbf16> to vector<288x4xbf16>
    %c0_10 = arith.constant 0 : index
    %c8 = arith.constant 8 : index
    %8 = vector.load %arg5[%c0_10, %c8] : memref<288x36xbf16, #tpu.memory_space<vmem>>, vector<288x4xbf16>
    tpu.vector_store %arg5[%c0_10, %c8], %7 {strides = array<i32>} : memref<288x36xbf16, #tpu.memory_space<vmem>>, vector<288x4xbf16>,
    %c0_11 = arith.constant 0 : index
    %c36 = arith.constant 36 : index
    %c0_12 = arith.constant 0 : index
    %9 = vector.load %arg1[%c0_11, %c36, %c0_12] : memref<1x364x4xbf16, #tpu.memory_space<vmem>>, vector<1x288x4xbf16>
    %10 = vector.shape_cast %9 : vector<1x288x4xbf16> to vector<288x4xbf16>
    %c0_13 = arith.constant 0 : index
    %c12 = arith.constant 12 : index
    %11 = vector.load %arg5[%c0_13, %c12] : memref<288x36xbf16, #tpu.memory_space<vmem>>, vector<288x4xbf16>
    tpu.vector_store %arg5[%c0_13, %c12], %10 {strides = array<i32>} : memref<288x36xbf16, #tpu.memory_space<vmem>>, vector<288x4xbf16>,
    %c0_14 = arith.constant 0 : index
    %c38 = arith.constant 38 : index
    %c0_15 = arith.constant 0 : index
    %12 = vector.load %arg1[%c0_14, %c38, %c0_15] : memref<1x364x4xbf16, #tpu.memory_space<vmem>>, vector<1x288x4xbf16>
    %13 = vector.shape_cast %12 : vector<1x288x4xbf16> to vector<288x4xbf16>
    %c0_16 = arith.constant 0 : index
    %c16 = arith.constant 16 : index
    %14 = vector.load %arg5[%c0_16, %c16] : memref<288x36xbf16, #tpu.memory_space<vmem>>, vector<288x4xbf16>
    tpu.vector_store %arg5[%c0_16, %c16], %13 {strides = array<i32>} : memref<288x36xbf16, #tpu.memory_space<vmem>>, vector<288x4xbf16>,
    %c0_17 = arith.constant 0 : index
    %c40 = arith.constant 40 : index
    %c0_18 = arith.constant 0 : index
    %15 = vector.load %arg1[%c0_17, %c40, %c0_18] : memref<1x364x4xbf16, #tpu.memory_space<vmem>>, vector<1x288x4xbf16>
    %16 = vector.shape_cast %15 : vector<1x288x4xbf16> to vector<288x4xbf16>
    %c0_19 = arith.constant 0 : index
    %c20 = arith.constant 20 : index
    %17 = vector.load %arg5[%c0_19, %c20] : memref<288x36xbf16, #tpu.memory_space<vmem>>, vector<288x4xbf16>
    tpu.vector_store %arg5[%c0_19, %c20], %16 {strides = array<i32>} : memref<288x36xbf16, #tpu.memory_space<vmem>>, vector<288x4xbf16>,
    %c0_20 = arith.constant 0 : index
    %c72 = arith.constant 72 : index
    %c0_21 = arith.constant 0 : index
    %18 = vector.load %arg1[%c0_20, %c72, %c0_21] : memref<1x364x4xbf16, #tpu.memory_space<vmem>>, vector<1x288x4xbf16>
    %19 = vector.shape_cast %18 : vector<1x288x4xbf16> to vector<288x4xbf16>
    %c0_22 = arith.constant 0 : index
    %c24 = arith.constant 24 : index
    %20 = vector.load %arg5[%c0_22, %c24] : memref<288x36xbf16, #tpu.memory_space<vmem>>, vector<288x4xbf16>
    tpu.vector_store %arg5[%c0_22, %c24], %19 {strides = array<i32>} : memref<288x36xbf16, #tpu.memory_space<vmem>>, vector<288x4xbf16>,
    %c0_23 = arith.constant 0 : index
    %c74 = arith.constant 74 : index
    %c0_24 = arith.constant 0 : index
    %21 = vector.load %arg1[%c0_23, %c74, %c0_24] : memref<1x364x4xbf16, #tpu.memory_space<vmem>>, vector<1x288x4xbf16>
    %22 = vector.shape_cast %21 : vector<1x288x4xbf16> to vector<288x4xbf16>
    %c0_25 = arith.constant 0 : index
    %c28 = arith.constant 28 : index
    %23 = vector.load %arg5[%c0_25, %c28] : memref<288x36xbf16, #tpu.memory_space<vmem>>, vector<288x4xbf16>
    tpu.vector_store %arg5[%c0_25, %c28], %22 {strides = array<i32>} : memref<288x36xbf16, #tpu.memory_space<vmem>>, vector<288x4xbf16>,
    %c0_26 = arith.constant 0 : index
    %c76 = arith.constant 76 : index
    %c0_27 = arith.constant 0 : index
    %24 = vector.load %arg1[%c0_26, %c76, %c0_27] : memref<1x364x4xbf16, #tpu.memory_space<vmem>>, vector<1x288x4xbf16>
    %25 = vector.shape_cast %24 : vector<1x288x4xbf16> to vector<288x4xbf16>
    %c0_28 = arith.constant 0 : index
    %c32 = arith.constant 32 : index
    %26 = vector.load %arg5[%c0_28, %c32] : memref<288x36xbf16, #tpu.memory_space<vmem>>, vector<288x4xbf16>
    tpu.vector_store %arg5[%c0_28, %c32], %25 {strides = array<i32>} : memref<288x36xbf16, #tpu.memory_space<vmem>>, vector<288x4xbf16>,
    %c0_29 = arith.constant 0 : index
    %c0_30 = arith.constant 0 : index
    %27 = vector.load %arg5[%c0_29, %c0_30] : memref<288x36xbf16, #tpu.memory_space<vmem>>, vector<288x36xbf16>
    %c0_31 = arith.constant 0 : index
    %c0_32 = arith.constant 0 : index
    %28 = vector.load %arg2[%c0_31, %c0_32] : memref<36x16xbf16, #tpu.memory_space<vmem>>, vector<36x16xbf16>
    %cst = arith.constant dense<0.000000e+00> : vector<288x16xf32>
    %29 = tpu.matmul %27, %28, %cst {dimension_numbers = #tpu.dot_dimension_numbers<[1], [0], [0], [1], [0, 0, 1, 1], [], []>} : vector<288x36xbf16>, vector<36x16xbf16>, vector<288x16xf32> -> vector<288x16xf32>
    %c0_33 = arith.constant 0 : index
    %c0_34 = arith.constant 0 : index
    %30 = vector.load %arg3[%c0_33, %c0_34] : memref<1x16xf32, #tpu.memory_space<vmem>>, vector<1x16xf32>
    %31 = vector.broadcast %30 : vector<1x16xf32> to vector<288x16xf32>
    %32 = arith.addf %29, %31 : vector<288x16xf32>
    %cst_35 = arith.constant 2.000000e-01 : f32
    %33 = vector.broadcast %cst_35 : f32 to vector<288x16xf32>
    %34 = arith.mulf %33, %32 : vector<288x16xf32>
    %35 = arith.maximumf %32, %34 : vector<288x16xf32>
    %36 = arith.truncf %35 : vector<288x16xf32> to vector<288x16xbf16>
    %37 = vector.extract_strided_slice %36 {offsets = [0, 0], sizes = [32, 16], strides = [1, 1]} : vector<288x16xbf16> to vector<32x16xbf16>
    %c0_36 = arith.constant 0 : index
    %c0_37 = arith.constant 0 : index
    %c0_38 = arith.constant 0 : index
    %38 = vector.load %arg4[%c0_36, %c0_37, %c0_38] : memref<8x32x16xbf16, #tpu.memory_space<vmem>>, vector<1x32x16xbf16>
    %39 = vector.shape_cast %38 : vector<1x32x16xbf16> to vector<32x16xbf16>
    %40 = vector.shape_cast %37 : vector<32x16xbf16> to vector<1x32x16xbf16>
    tpu.vector_store %arg4[%c0_36, %c0_37, %c0_38], %40 {strides = array<i32>} : memref<8x32x16xbf16, #tpu.memory_space<vmem>>, vector<1x32x16xbf16>,
    %41 = vector.extract_strided_slice %36 {offsets = [36, 0], sizes = [32, 16], strides = [1, 1]} : vector<288x16xbf16> to vector<32x16xbf16>
    %c1 = arith.constant 1 : index
    %c0_39 = arith.constant 0 : index
    %c0_40 = arith.constant 0 : index
    %42 = vector.load %arg4[%c1, %c0_39, %c0_40] : memref<8x32x16xbf16, #tpu.memory_space<vmem>>, vector<1x32x16xbf16>
    %43 = vector.shape_cast %42 : vector<1x32x16xbf16> to vector<32x16xbf16>
    %44 = vector.shape_cast %41 : vector<32x16xbf16> to vector<1x32x16xbf16>
    tpu.vector_store %arg4[%c1, %c0_39, %c0_40], %44 {strides = array<i32>} : memref<8x32x16xbf16, #tpu.memory_space<vmem>>, vector<1x32x16xbf16>,
    %45 = vector.extract_strided_slice %36 {offsets = [72, 0], sizes = [32, 16], strides = [1, 1]} : vector<288x16xbf16> to vector<32x16xbf16>
    %c2_41 = arith.constant 2 : index
    %c0_42 = arith.constant 0 : index
    %c0_43 = arith.constant 0 : index
    %46 = vector.load %arg4[%c2_41, %c0_42, %c0_43] : memref<8x32x16xbf16, #tpu.memory_space<vmem>>, vector<1x32x16xbf16>
    %47 = vector.shape_cast %46 : vector<1x32x16xbf16> to vector<32x16xbf16>
    %48 = vector.shape_cast %45 : vector<32x16xbf16> to vector<1x32x16xbf16>
    tpu.vector_store %arg4[%c2_41, %c0_42, %c0_43], %48 {strides = array<i32>} : memref<8x32x16xbf16, #tpu.memory_space<vmem>>, vector<1x32x16xbf16>,
    %49 = vector.extract_strided_slice %36 {offsets = [108, 0], sizes = [32, 16], strides = [1, 1]} : vector<288x16xbf16> to vector<32x16xbf16>
    %c3 = arith.constant 3 : index
    %c0_44 = arith.constant 0 : index
    %c0_45 = arith.constant 0 : index
    %50 = vector.load %arg4[%c3, %c0_44, %c0_45] : memref<8x32x16xbf16, #tpu.memory_space<vmem>>, vector<1x32x16xbf16>
    %51 = vector.shape_cast %50 : vector<1x32x16xbf16> to vector<32x16xbf16>
    %52 = vector.shape_cast %49 : vector<32x16xbf16> to vector<1x32x16xbf16>
    tpu.vector_store %arg4[%c3, %c0_44, %c0_45], %52 {strides = array<i32>} : memref<8x32x16xbf16, #tpu.memory_space<vmem>>, vector<1x32x16xbf16>,
    %53 = vector.extract_strided_slice %36 {offsets = [144, 0], sizes = [32, 16], strides = [1, 1]} : vector<288x16xbf16> to vector<32x16xbf16>
    %c4_46 = arith.constant 4 : index
    %c0_47 = arith.constant 0 : index
    %c0_48 = arith.constant 0 : index
    %54 = vector.load %arg4[%c4_46, %c0_47, %c0_48] : memref<8x32x16xbf16, #tpu.memory_space<vmem>>, vector<1x32x16xbf16>
    %55 = vector.shape_cast %54 : vector<1x32x16xbf16> to vector<32x16xbf16>
    %56 = vector.shape_cast %53 : vector<32x16xbf16> to vector<1x32x16xbf16>
    tpu.vector_store %arg4[%c4_46, %c0_47, %c0_48], %56 {strides = array<i32>} : memref<8x32x16xbf16, #tpu.memory_space<vmem>>, vector<1x32x16xbf16>,
    %57 = vector.extract_strided_slice %36 {offsets = [180, 0], sizes = [32, 16], strides = [1, 1]} : vector<288x16xbf16> to vector<32x16xbf16>
    %c5 = arith.constant 5 : index
    %c0_49 = arith.constant 0 : index
    %c0_50 = arith.constant 0 : index
    %58 = vector.load %arg4[%c5, %c0_49, %c0_50] : memref<8x32x16xbf16, #tpu.memory_space<vmem>>, vector<1x32x16xbf16>
    %59 = vector.shape_cast %58 : vector<1x32x16xbf16> to vector<32x16xbf16>
    %60 = vector.shape_cast %57 : vector<32x16xbf16> to vector<1x32x16xbf16>
    tpu.vector_store %arg4[%c5, %c0_49, %c0_50], %60 {strides = array<i32>} : memref<8x32x16xbf16, #tpu.memory_space<vmem>>, vector<1x32x16xbf16>,
    %61 = vector.extract_strided_slice %36 {offsets = [216, 0], sizes = [32, 16], strides = [1, 1]} : vector<288x16xbf16> to vector<32x16xbf16>
    %c6 = arith.constant 6 : index
    %c0_51 = arith.constant 0 : index
    %c0_52 = arith.constant 0 : index
    %62 = vector.load %arg4[%c6, %c0_51, %c0_52] : memref<8x32x16xbf16, #tpu.memory_space<vmem>>, vector<1x32x16xbf16>
    %63 = vector.shape_cast %62 : vector<1x32x16xbf16> to vector<32x16xbf16>
    %64 = vector.shape_cast %61 : vector<32x16xbf16> to vector<1x32x16xbf16>
    tpu.vector_store %arg4[%c6, %c0_51, %c0_52], %64 {strides = array<i32>} : memref<8x32x16xbf16, #tpu.memory_space<vmem>>, vector<1x32x16xbf16>,
    %65 = vector.extract_strided_slice %36 {offsets = [252, 0], sizes = [32, 16], strides = [1, 1]} : vector<288x16xbf16> to vector<32x16xbf16>
    %c7 = arith.constant 7 : index
    %c0_53 = arith.constant 0 : index
    %c0_54 = arith.constant 0 : index
    %66 = vector.load %arg4[%c7, %c0_53, %c0_54] : memref<8x32x16xbf16, #tpu.memory_space<vmem>>, vector<1x32x16xbf16>
    %67 = vector.shape_cast %66 : vector<1x32x16xbf16> to vector<32x16xbf16>
    %68 = vector.shape_cast %65 : vector<32x16xbf16> to vector<1x32x16xbf16>
    tpu.vector_store %arg4[%c7, %c0_53, %c0_54], %68 {strides = array<i32>} : memref<8x32x16xbf16, #tpu.memory_space<vmem>>, vector<1x32x16xbf16>,
    return
  }
  func.func @transform_0(%arg0: i32) -> (i32, i32, i32) {
    %c0_i32 = arith.constant 0 : i32
    %c0_i32_0 = arith.constant 0 : i32
    %c0_i32_1 = arith.constant 0 : i32
    return %arg0, %c0_i32, %c0_i32_0 : i32, i32, i32
  }
  func.func @transform_1(%arg0: i32) -> (i32, i32) {
    %c0_i32 = arith.constant 0 : i32
    %c0_i32_0 = arith.constant 0 : i32
    %c0_i32_1 = arith.constant 0 : i32
    return %c0_i32, %c0_i32_0 : i32, i32
  }
  func.func @transform_2(%arg0: i32) -> (i32, i32) {
    %c0_i32 = arith.constant 0 : i32
    %c0_i32_0 = arith.constant 0 : i32
    %c0_i32_1 = arith.constant 0 : i32
    return %c0_i32, %c0_i32_0 : i32, i32
  }
  func.func @transform_3(%arg0: i32) -> (i32, i32, i32) {
    %c0_i32 = arith.constant 0 : i32
    %c0_i32_0 = arith.constant 0 : i32
    %c0_i32_1 = arith.constant 0 : i32
    return %arg0, %c0_i32, %c0_i32_0 : i32, i32, i32
  }
}

</mosaic_0001>

<bundles_post_ra>
// kernel: tpu_custom_call.1
= control target key start
LH: loop header
LB: loop body
LE: loop exit
PB: predicated region body
PF: predicated region fallthrough
CT: control target
= control target key end

     0   :  { %s3492_s12 = smov 0   ;;  %s5324_s0 = inlined_call_operand.vmem [shape: bf16[2,364,4], index: 0, kind: input, shape index: {}]   ;;  %s5325_s1 = inlined_call_operand.vmem [shape: bf16[36,16], index: 1, kind: input, shape index: {}]   ;;  %s5326_s2 = inlined_call_operand.vmem [shape: f32[1,16], index: 2, kind: input, shape index: {}]   ;;  %s5327_s3 = inlined_call_operand.vmem [shape: bf16[16,32,16], index: 3, kind: output, shape index: {}]  }
   0x1 LB: > { %s3498_s13 = sadd.s32 4294967295, %s3462_s12   ;;  %p3265_p0 = scmp.ge.s32.totalorder %s3462_s12, 1  ;;  %s3462_s12 = sphi %s3492_s12, %s13_s12  }
   0x2   : > { %p137_p1 = scmp.lt.s32.totalorder %s3462_s12, 3 }
   0x4   : > { %p138_p2 = pnand %p3265_p0, %p137_p1 }
   0x5   : > { %p162_p3 = scmp.lt.s32.totalorder (!%p138_p2), %s3498_s13, 1  ;;  %s3464_s19 = smov (!%p138_p2), 4  }
   0x6   : > { %141 = sbr.rel (%p138_p2) target bundleno = 1048 (0x418), region = 32  ;;  %s3465_s20 = smov (!%p138_p2), 8  }
   0x7   : > { %s3466_s21 = smov (!%p138_p2), 12   ;;  %s3467_s22 = smov (!%p138_p2), 16  }
   0x8   : > { %s3468_s23 = smov (!%p138_p2), 20   ;;  %s3469_s24 = smov (!%p138_p2), 24  }
   0x9   : > { %s3470_s25 = smov (!%p138_p2), 28   ;;  %s3471_s26 = smov (!%p138_p2), 32  }
   0xa   : > { %s3267_s6 = sshll.u32 (!%p138_p2), %s3498_s13, 3 }
   0xb   : > { %s163_s14 = scalar_select %p162_p3, %s3498_s13, 1  ;;  %vm322_vm0 = vcmask 1042432   ;;  %vm323_vm1 = vcmask 1046532   ;;  %vm211_vm3 = vcmask 27648   ;;  %vm653_vm4 = vcmask 1041408  }
   0xc   : > { %vm3509_vm2 = vmor %vm322_vm0, %vm323_vm1  ;;  %vm654_vm5 = vcmask 1045508   ;;  %vm542_vm7 = vcmask 60448   ;;  %vm873_vm8 = vcmask 93248   ;;  %vm1312_vm9 = vcmask 1040384   ;;  %p168_p4 = scmp.lt.s32.totalorder %s3267_s6, 15 }
   0xd   : > { %s3438_s15 = smul.u32 184, %s163_s14  ;;  %vm3664_vm6 = vmor %vm653_vm4, %vm654_vm5  ;;  %vm1313_vm10 = vcmask 1044484   ;;  %vm1201_vm12 = vcmask 126048   ;;  %vm1532_vm13 = vcmask 158848   ;;  %vm1749_vm14 = vcmask 191648  }
   0xe   : > { %vm4091_vm11 = vmor %vm1312_vm9, %vm1313_vm10  ;;  %vm1966_vm15 = vcmask 224448   ;;  %vm2294_vm0 = vcmask 257248   ;;  %vm2622_vm1 = vcmask 290048   ;;  %s5335_s6 = smov (!%p168_p4, %s3267_s6), 15 }
   0xf   : > { %s3507_s18 = scalar_lea.vmem %s5324_s0, %s3438_s15  ;;  %s3408_s9 = sshll.u32 %s5335_s6, 4 }
  0x10   : > { %v248_v1 = vld [vmem:[%s3507_s18] sm:$0xe]  ;;  %v249_v2 = vld [vmem:[%s3507_s18 + $0x4] sm:$0xf]  ;;  %v250_v3 = vld [vmem:[%s3507_s18 + $0x8] sm:$0xf]  ;;  %s5139_s13 = scalar_lea.vmem %s5327_s3, %s3408_s9 }
  0x11   : > { %v3270_v4 = vrot.slane %v248_v1, 9  ;;  %v327_v5 = vrot.slane %v249_v2, 5  ;;  %v251_v6 = vld [vmem:[%s3507_s18 + $0xc] sm:$0xf]  ;;  %v330_v7 = vrot.slane %v250_v3, 5 }
  0x12   : > { %v333_v8 = vrot.slane %v251_v6, 5  ;;  %v252_v9 = vld [vmem:[%s3507_s18 + $0x10] sm:$0xf]  ;;  %v254_v16 = vld [vmem:[%s3507_s18 + $0x18] sm:$0xf] }
  0x13   : > { %v328_v10 = vsel %vm3509_vm2, %v3270_v4, %v327_v5  ;;  %v332_v11 = vrot.slane %v330_v7, 4  ;;  %v336_v12 = vrot.slane %v252_v9, 5  ;;  %v329_v14 = vrot.slane %v327_v5, 4  ;;  %v253_v17 = vld [vmem:[%s3507_s18 + $0x14] sm:$0xf] }
  0x14   : > { %434 = vrot.lane.b32.xlu0 %v328_v10, %s3464_s19  ;;  %v335_v18 = vrot.slane %v333_v8, 4  ;;  %v339_v19 = vrot.slane %v253_v17, 5  ;;  %v255_v20 = vld [vmem:[%s3507_s18 + $0x1c] sm:$0xf]  ;;  %v342_v22 = vrot.slane %v254_v16, 5 }
  0x15   : > { %v334_v13 = vsel %vm3509_vm2, %v332_v11, %v333_v8  ;;  %v338_v15 = vrot.slane %v336_v12, 4  ;;  %v331_v21 = vsel %vm3509_vm2, %v329_v14, %v330_v7  ;;  %v345_v25 = vrot.slane %v255_v20, 5  ;;  %v256_v27 = vld [vmem:[%s3507_s18 + $0x20] sm:$0xf]  ;;  %v257_v29 = vld [vmem:[%s3507_s18 + $0x24] sm:$0xf] }
  0x16   : > { %438 = vrot.lane.b32.xlu1 %v334_v13, %s3464_s19  ;;  %v337_v24 = vsel %vm3509_vm2, %v335_v18, %v336_v12  ;;  %v341_v26 = vrot.slane %v339_v19, 4  ;;  %v344_v28 = vrot.slane %v342_v22, 4  ;;  %v348_v31 = vrot.slane %v256_v27, 5  ;;  %v258_v33 = vld [vmem:[%s3507_s18 + $0x28] sm:$0xf] }
  0x17   : > { %v340_v23 = vsel %vm3509_vm2, %v338_v15, %v339_v19  ;;  %v347_v30 = vrot.slane %v345_v25, 4  ;;  %v351_v35 = vrot.slane %v257_v29, 5  ;;  %v354_v37 = vrot.slane %v258_v33, 5  ;;  %v259_v39 = vld [vmem:[%s3507_s18 + $0x2c] sm:$0xf] }
  0x18   : > { %442 = vrot.lane.b32.xlu2 %v340_v23, %s3464_s19  ;;  %v343_v32 = vsel %vm3509_vm2, %v341_v26, %v342_v22  ;;  %v346_v34 = vsel %vm3509_vm2, %v344_v28, %v345_v25  ;;  %v350_v38 = vrot.slane %v348_v31, 4  ;;  %v260_v41 = vld [vmem:[%s3507_s18 + $0x30] sm:$0xf]  ;;  %v357_v43 = vrot.slane %v259_v39, 5  ;;  %v261_v45 = vld [vmem:[%s3507_s18 + $0x34] sm:$0xf] }
  0x19   : > { %v349_v36 = vsel %vm3509_vm2, %v347_v30, %v348_v31  ;;  %v353_v40 = vrot.slane %v351_v35, 4  ;;  %v356_v42 = vrot.slane %v354_v37, 4  ;;  %v360_v47 = vrot.slane %v260_v41, 5  ;;  %v262_v51 = vld [vmem:[%s3507_s18 + $0x38] sm:$0xf] }
  0x1a   : > { %v352_v44 = vsel %vm3509_vm2, %v350_v38, %v351_v35  ;;  %v363_v49 = vrot.slane %v261_v45, 5  ;;  %v359_v50 = vrot.slane %v357_v43, 4  ;;  %v263_v53 = vld [vmem:[%s3507_s18 + $0x3c] sm:$0xf]  ;;  %v366_v55 = vrot.slane %v262_v51, 5 }
  0x1b   : > { %v355_v46 = vsel %vm3509_vm2, %v353_v40, %v354_v37  ;;  %v358_v48 = vsel %vm3509_vm2, %v356_v42, %v357_v43  ;;  %v362_v52 = vrot.slane %v360_v47, 4  ;;  %v264_v57 = vld [vmem:[%s3507_s18 + $0x40] sm:$0xf]  ;;  %v369_v59 = vrot.slane %v263_v53, 5  ;;  %v265_v63 = vld [vmem:[%s3507_s18 + $0x44] sm:$0xf] }
  0x1c   : > { %436 = vrot.lane.b32.xlu0 %v331_v21, %s3464_s19  ;;  %v365_v54 = vrot.slane %v363_v49, 4  ;;  %v361_v56 = vsel %vm3509_vm2, %v359_v50, %v360_v47  ;;  %v372_v61 = vrot.slane %v264_v57, 5  ;;  %v368_v62 = vrot.slane %v366_v55, 4  ;;  %v266_v2 = vld [vmem:[%s3507_s18 + $0x48] sm:$0xf] }
  0x1d   : > { %v364_v58 = vsel %vm3509_vm2, %v362_v52, %v363_v49  ;;  %v371_v1 = vrot.slane %v369_v59, 4  ;;  %v375_v4 = vrot.slane %v265_v63, 5  ;;  %v267_v6 = vld [vmem:[%s3507_s18 + $0x4c] sm:$0xf]  ;;  %v378_v8 = vrot.slane %v266_v2, 5 }
  0x1e   : > { %440 = vrot.lane.b32.xlu1 %v337_v24, %s3464_s19  ;;  %v367_v60 = vsel %vm3509_vm2, %v365_v54, %v366_v55  ;;  %v374_v3 = vrot.slane %v372_v61, 4  ;;  %v370_v5 = vsel %vm3509_vm2, %v368_v62, %v369_v59  ;;  %v381_v10 = vrot.slane %v267_v6, 5  ;;  %v268_v12 = vld [vmem:[%s3507_s18 + $0x50] sm:$0xf]  ;;  %v269_v14 = vld [vmem:[%s3507_s18 + $0x54] sm:$0xf] }
  0x1f   : > { %v373_v7 = vsel %vm3509_vm2, %v371_v1, %v372_v61  ;;  %v377_v11 = vrot.slane %v375_v4, 4  ;;  %v380_v13 = vrot.slane %v378_v8, 4  ;;  %v384_v16 = vrot.slane %v268_v12, 5  ;;  %v270_v18 = vld [vmem:[%s3507_s18 + $0x58] sm:$0xf] }
  0x20   : > { %444 = vrot.lane.b32.xlu2 %v343_v32, %s3464_s19  ;;  %v376_v9 = vsel %vm3509_vm2, %v374_v3, %v375_v4  ;;  %v383_v15 = vrot.slane %v381_v10, 4  ;;  %v387_v20 = vrot.slane %v269_v14, 5  ;;  %v390_v22 = vrot.slane %v270_v18, 5  ;;  %v271_v24 = vld [vmem:[%s3507_s18 + $0x5c] sm:$0xf] }
  0x21   : > { %v379_v17 = vsel %vm3509_vm2, %v377_v11, %v378_v8  ;;  %v382_v19 = vsel %vm3509_vm2, %v380_v13, %v381_v10  ;;  %v386_v23 = vrot.slane %v384_v16, 4  ;;  %v272_v26 = vld [vmem:[%s3507_s18 + $0x60] sm:$0xf]  ;;  %v393_v28 = vrot.slane %v271_v24, 5  ;;  %v273_v30 = vld [vmem:[%s3507_s18 + $0x64] sm:$0xf] }
  0x22   : > { %v385_v21 = vsel %vm3509_vm2, %v383_v15, %v384_v16  ;;  %v389_v25 = vrot.slane %v387_v20, 4  ;;  %v392_v27 = vrot.slane %v390_v22, 4  ;;  %v396_v32 = vrot.slane %v272_v26, 5  ;;  %v275_v38 = vld [vmem:[%s3507_s18 + $0x6c] sm:$0xf] }
  0x23   : > { %v388_v29 = vsel %vm3509_vm2, %v386_v23, %v387_v20  ;;  %v395_v35 = vrot.slane %v393_v28, 4  ;;  %v276_v42 = vld [vmem:[%s3507_s18 + $0x70] sm:$0xf]  ;;  %v278_v50 = vld [vmem:[%s3507_s18 + $0x78] sm:$0xf] }
  0x24   : > { %446 = vrot.lane.b32.xlu0 %v346_v34, %s3464_s19  ;;  %v391_v31 = vsel %vm3509_vm2, %v389_v25, %v390_v22  ;;  %v394_v33 = vsel %vm3509_vm2, %v392_v27, %v393_v28  ;;  %v399_v34 = vrot.slane %v273_v30, 5  ;;  %v398_v37 = vrot.slane %v396_v32, 4  ;;  %v279_v54 = vld [vmem:[%s3507_s18 + $0x7c] sm:$0xf]  ;;  %v281_v62 = vld [vmem:[%s3507_s18 + $0x84] sm:$0xf] }
  0x25   : > { %v397_v41 = vsel %vm3509_vm2, %v395_v35, %v396_v32  ;;  %v282_v63 = vld [vmem:[%s3507_s18 + $0x88] sm:$0xf]  ;;  %v283_v8 = vld [vmem:[%s3507_s18 + $0x8c] sm:$0xf]  ;;  %v580_v13 = vld [vmem:[%s3507_s18 + $0x4] sm:$0xf] }
  0x26   : > { %448 = vrot.lane.b32.xlu1 %v349_v36, %s3464_s19  ;;  %v274_v36 = vld [vmem:[%s3507_s18 + $0x68] sm:$0xf]  ;;  %v401_v39 = vrot.slane %v399_v34, 4  ;;  %v400_v43 = vsel %vm3509_vm2, %v398_v37, %v399_v34  ;;  %v426_v6 = vrot.slane %v282_v63, 5  ;;  %v429_v12 = vrot.slane %v283_v8, 5 }
  0x27   : > { %v402_v40 = vrot.slane %v274_v36, 5  ;;  %v175_v14 = vld [vmem:[%s3507_s18] sm:$0xf]  ;;  %v179_v16 = vld [vmem:[%s3507_s18 + $0x10] sm:$0xf]  ;;  %v658_v20 = vrot.slane %v580_v13, 6 }
  0x28   : > { %450 = vrot.lane.b32.xlu2 %v352_v44, %s3464_s19  ;;  %v405_v44 = vrot.slane %v275_v38, 5  ;;  %v428_v11 = vrot.slane %v426_v6, 4  ;;  %212 = vst.msk [vmem:[#allocation2] sm:$0xf] %vm211_vm3, %v175_v14  ;;  %v284_v18 = vld [vmem:[%s3507_s18 + $0x90] sm:$0x1] }
  0x29   : > { %v403_v45 = vsel %vm3509_vm2, %v401_v39, %v402_v40  ;;  %v404_v47 = vrot.slane %v402_v40, 4  ;;  %216 = vst.msk [vmem:[#allocation2 + $0x10] sm:$0xf] %vm211_vm3, %v179_v16  ;;  %v581_v22 = vld [vmem:[%s3507_s18 + $0x8] sm:$0xf]  ;;  %v431_v24 = vrot.slane %v429_v12, 4 }
  0x2a   : > { %v407_v49 = vrot.slane %v405_v44, 4  ;;  %v430_v23 = vsel %vm3509_vm2, %v428_v11, %v429_v12  ;;  %v432_v25 = vrot.slane %v284_v18, 5  ;;  %v660_v28 = vrot.slane %v658_v20, 4  ;;  %v582_v30 = vld [vmem:[%s3507_s18 + $0xc] sm:$0xf] }
  0x2b   : > { %v406_v53 = vsel %vm3509_vm2, %v404_v47, %v405_v44  ;;  %v176_v32 = vld [vmem:[%s3507_s18 + $0x4] sm:$0xf]  ;;  %v180_v34 = vld [vmem:[%s3507_s18 + $0x14] sm:$0xf]  ;;  %v178_v35 = vld [vmem:[%s3507_s18 + $0xc] sm:$0xf] }
  0x2c   : > { %452 = vrot.lane.b32.xlu0 %v355_v46, %s3464_s19  ;;  %v408_v46 = vrot.slane %v276_v42, 5  ;;  %213 = vst.msk [vmem:[#allocation2 + $0x4] sm:$0xf] %vm211_vm3, %v176_v32  ;;  %v664_v37 = vrot.slane %v582_v30, 6  ;;  %v584_v39 = vld [vmem:[%s3507_s18 + $0x14] sm:$0xf] }
  0x2d   : > { %217 = vst.msk [vmem:[#allocation2 + $0x14] sm:$0xf] %vm211_vm3, %v180_v34  ;;  %v586_v47 = vld [vmem:[%s3507_s18 + $0x1c] sm:$0xf]  ;;  %v184_v63 = vld [vmem:[%s3507_s18 + $0x24] sm:$0xf] }
  0x2e   : > { %454 = vrot.lane.b32.xlu1 %v358_v48, %s3464_s19  ;;  %v277_v48 = vld [vmem:[%s3507_s18 + $0x74] sm:$0xf]  ;;  %v410_v51 = vrot.slane %v408_v46, 4  ;;  %v409_v55 = vsel %vm3509_vm2, %v407_v49, %v408_v46  ;;  %215 = vst.msk [vmem:[#allocation2 + $0xc] sm:$0xf] %vm211_vm3, %v178_v35 }
  0x2f   : > { %v411_v52 = vrot.slane %v277_v48, 5  ;;  %v585_v46 = vld [vmem:[%s3507_s18 + $0x18] sm:$0xf]  ;;  %221 = vst.msk [vmem:[#allocation2 + $0x24] sm:$0xf] %vm211_vm3, %v184_v63 }
  0x30   : > { %456 = vrot.lane.b32.xlu2 %v361_v56, %s3464_s19  ;;  %v414_v56 = vrot.slane %v278_v50, 5  ;;  %v181_v48 = vld [vmem:[%s3507_s18 + $0x18] sm:$0xf]  ;;  %v183_v50 = vld [vmem:[%s3507_s18 + $0x20] sm:$0xf] }
  0x31   : > { %v412_v57 = vsel %vm3509_vm2, %v410_v51, %v411_v52  ;;  %v413_v59 = vrot.slane %v411_v52, 4  ;;  %218 = vst.msk [vmem:[#allocation2 + $0x18] sm:$0xf] %vm211_vm3, %v181_v48  ;;  %v182_v51 = vld [vmem:[%s3507_s18 + $0x1c] sm:$0xf] }
  0x32   : > { %v416_v61 = vrot.slane %v414_v56, 4  ;;  %220 = vst.msk [vmem:[#allocation2 + $0x20] sm:$0xf] %vm211_vm3, %v183_v50  ;;  %v591_v14 = vld [vmem:[%s3507_s18 + $0x30] sm:$0xf] }
  0x33   : > { %v415_v3 = vsel %vm3509_vm2, %v413_v59, %v414_v56  ;;  %219 = vst.msk [vmem:[#allocation2 + $0x1c] sm:$0xf] %vm211_vm3, %v182_v51  ;;  %v587_v56 = vld [vmem:[%s3507_s18 + $0x20] sm:$0xf]  ;;  %v190_v34 = vld [vmem:[%s3507_s18 + $0x3c] sm:$0xf] }
  0x34   : > { %458 = vrot.lane.b32.xlu0 %v364_v58, %s3464_s19  ;;  %v417_v58 = vrot.slane %v279_v54, 5  ;;  %v676_v54 = vrot.slane %v586_v47, 6  ;;  %227 = vst.msk [vmem:[#allocation2 + $0x3c] sm:$0xf] %vm211_vm3, %v190_v34  ;;  %v596_v47 = vld [vmem:[%s3507_s18 + $0x44] sm:$0xf] }
  0x35   : > { %v597_v51 = vld [vmem:[%s3507_s18 + $0x48] sm:$0xf] }
  0x36   : > { %460 = vrot.lane.b32.xlu1 %v367_v60, %s3464_s19  ;;  %v280_v60 = vld [vmem:[%s3507_s18 + $0x80] sm:$0xf]  ;;  %v419_v1 = vrot.slane %v417_v58, 4  ;;  %v418_v4 = vsel %vm3509_vm2, %v416_v61, %v417_v58  ;;  %v679_v61 = vrot.slane %v587_v56, 6  ;;  %v195_v56 = vld [vmem:[%s3507_s18 + $0x50] sm:$0xf] }
  0x37   : > { %v420_v2 = vrot.slane %v280_v60, 5  ;;  %v678_v60 = vrot.slane %v676_v54, 4  ;;  %232 = vst.msk [vmem:[#allocation2 + $0x50] sm:$0xf] %vm211_vm3, %v195_v56 }
  0x38   : > { %462 = vrot.lane.b32.xlu2 %v370_v5, %s3464_s19  ;;  %v423_v5 = vrot.slane %v281_v62, 5  ;;  %v588_v62 = vld [vmem:[%s3507_s18 + $0x24] sm:$0xf] }
  0x3a   : > { %v425_v10 = vrot.slane %v423_v5, 4 }
  0x3c   : > { %464 = vrot.lane.b32.xlu0 %v373_v7, %s3464_s19  ;;  %v421_v7 = vsel %vm3509_vm2, %v419_v1, %v420_v2 }
  0x3e   : > { %466 = vrot.lane.b32.xlu1 %v376_v9, %s3464_s19  ;;  %v422_v9 = vrot.slane %v420_v2, 4  ;;  %v186_v2 = vld [vmem:[%s3507_s18 + $0x2c] sm:$0xf] }
  0x3f   : > { %223 = vst.msk [vmem:[#allocation2 + $0x2c] sm:$0xf] %vm211_vm3, %v186_v2  ;;  %v599_v2 = vld [vmem:[%s3507_s18 + $0x50] sm:$0xf] }
  0x40   : > { %468 = vrot.lane.b32.xlu2 %v379_v17, %s3464_s19  ;;  %v424_v15 = vsel %vm3509_vm2, %v422_v9, %v423_v5  ;;  %v177_v17 = vld [vmem:[%s3507_s18 + $0x8] sm:$0xf]  ;;  %v681_v9 = vrot.slane %v679_v61, 4 }
  0x41   : > { %214 = vst.msk [vmem:[#allocation2 + $0x8] sm:$0xf] %vm211_vm3, %v177_v17 }
  0x44   : > { %470 = vrot.lane.b32.xlu0 %v382_v19, %s3464_s19  ;;  %v427_v19 = vsel %vm3509_vm2, %v425_v10, %v426_v6  ;;  %v682_v6 = vrot.slane %v588_v62, 6  ;;  %v590_v10 = vld [vmem:[%s3507_s18 + $0x2c] sm:$0xf] }
  0x45   : > { %v688_v17 = vrot.slane %v590_v10, 6 }
  0x46   : > { %472 = vrot.lane.b32.xlu1 %v385_v21, %s3464_s19  ;;  %v579_v21 = vld [vmem:[%s3507_s18] sm:$0xc]  ;;  %v684_v12 = vrot.slane %v682_v6, 4  ;;  %v683_v18 = vsel %vm3664_vm6, %v681_v9, %v682_v6  ;;  %v600_v6 = vld [vmem:[%s3507_s18 + $0x54] sm:$0xf]  ;;  %v715_v9 = vrot.slane %v599_v2, 6 }
  0x47   : > { %v3271_v27 = vrot.slane %v579_v21, 10  ;;  %v592_v21 = vld [vmem:[%s3507_s18 + $0x34] sm:$0xf] }
  0x48   : > { %474 = vrot.lane.b32.xlu2 %v388_v29, %s3464_s19  ;;  %v661_v29 = vrot.slane %v581_v22, 6  ;;  %v188_v22 = vld [vmem:[%s3507_s18 + $0x34] sm:$0xf] }
  0x49   : > { %v659_v36 = vsel %vm3664_vm6, %v3271_v27, %v658_v20  ;;  %v694_v27 = vrot.slane %v592_v21, 6  ;;  %225 = vst.msk [vmem:[#allocation2 + $0x34] sm:$0xf] %vm211_vm3, %v188_v22 }
  0x4a   : > { %v662_v40 = vsel %vm3664_vm6, %v660_v28, %v661_v29  ;;  %v690_v28 = vrot.slane %v688_v17, 4 }
  0x4b   : > { %v696_v35 = vrot.slane %v694_v27, 4 }
  0x4c   : > { %476 = vrot.lane.b32.xlu0 %v391_v31, %s3464_s19  ;;  %v583_v31 = vld [vmem:[%s3507_s18 + $0x10] sm:$0xf] }
  0x4d   : > { %v667_v38 = vrot.slane %v583_v31, 6 }
  0x4e   : > { %478 = vrot.lane.b32.xlu1 %v394_v33, %s3464_s19  ;;  %v433_v33 = vsel %vm3509_vm2, %v431_v24, %v432_v25  ;;  %v691_v24 = vrot.slane %v591_v14, 6  ;;  %v197_v14 = vld [vmem:[%s3507_s18 + $0x58] sm:$0xf] }
  0x4f   : > { %v669_v44 = vrot.slane %v667_v38, 4  ;;  %234 = vst.msk [vmem:[#allocation2 + $0x58] sm:$0xf] %vm211_vm3, %v197_v14 }
  0x50   : > { %480 = vrot.lane.b32.xlu2 %v397_v41, %s3464_s19  ;;  %v663_v41 = vrot.slane %v661_v29, 4  ;;  %v593_v29 = vld [vmem:[%s3507_s18 + $0x38] sm:$0xf]  ;;  %v693_v31 = vrot.slane %v691_v24, 4 }
  0x52   : > { %v665_v49 = vsel %vm3664_vm6, %v663_v41, %v664_v37  ;;  %v191_v41 = vld [vmem:[%s3507_s18 + $0x40] sm:$0xf] }
  0x53   : > { %228 = vst.msk [vmem:[#allocation2 + $0x40] sm:$0xf] %vm211_vm3, %v191_v41 }
  0x54   : > { %482 = vrot.lane.b32.xlu0 %v400_v43, %s3464_s19  ;;  %v666_v43 = vrot.slane %v664_v37, 4  ;;  %v692_v37 = vsel %vm3664_vm6, %v690_v28, %v691_v24  ;;  %v603_v24 = vld [vmem:[%s3507_s18 + $0x60] sm:$0xf] }
  0x56   : > { %484 = vrot.lane.b32.xlu1 %v403_v45, %s3464_s19  ;;  %v670_v45 = vrot.slane %v584_v39, 6  ;;  %v668_v52 = vsel %vm3664_vm6, %v666_v43, %v667_v38  ;;  %v192_v38 = vld [vmem:[%s3507_s18 + $0x44] sm:$0xf] }
  0x57   : > { %229 = vst.msk [vmem:[#allocation2 + $0x44] sm:$0xf] %vm211_vm3, %v192_v38 }
  0x58   : > { %486 = vrot.lane.b32.xlu2 %v406_v53, %s3464_s19  ;;  %v673_v53 = vrot.slane %v585_v46, 6 }
  0x5a   : > { %v675_v59 = vrot.slane %v673_v53, 4 }
  0x5c   : > { %488 = vrot.lane.b32.xlu0 %v409_v55, %s3464_s19  ;;  %v671_v55 = vsel %vm3664_vm6, %v669_v44, %v670_v45  ;;  %v677_v5 = vsel %vm3664_vm6, %v675_v59, %v676_v54  ;;  %v706_v54 = vrot.slane %v596_v47, 6  ;;  %v194_v59 = vld [vmem:[%s3507_s18 + $0x4c] sm:$0xf] }
  0x5d   : > { %231 = vst.msk [vmem:[#allocation2 + $0x4c] sm:$0xf] %vm211_vm3, %v194_v59 }
  0x5e   : > { %490 = vrot.lane.b32.xlu1 %v412_v57, %s3464_s19  ;;  %v672_v57 = vrot.slane %v670_v45, 4 }
  0x60   : > { %492 = vrot.lane.b32.xlu2 %v415_v3, %s3464_s19  ;;  %v674_v1 = vsel %vm3664_vm6, %v672_v57, %v673_v53  ;;  %v185_v3 = vld [vmem:[%s3507_s18 + $0x28] sm:$0xf] }
  0x61   : > { %222 = vst.msk [vmem:[#allocation2 + $0x28] sm:$0xf] %vm211_vm3, %v185_v3 }
  0x64   : > { %494 = vrot.lane.b32.xlu0 %v418_v4, %s3464_s19  ;;  %v589_v4 = vld [vmem:[%s3507_s18 + $0x28] sm:$0xf] }
  0x65   : > { %v685_v8 = vrot.slane %v589_v4, 6 }
  0x66   : > { %496 = vrot.lane.b32.xlu1 %v421_v7, %s3464_s19  ;;  %v680_v7 = vsel %vm3664_vm6, %v678_v60, %v679_v61  ;;  %v709_v61 = vrot.slane %v597_v51, 6  ;;  %v203_v51 = vld [vmem:[%s3507_s18 + $0x70] sm:$0xf] }
  0x67   : > { %v687_v16 = vrot.slane %v685_v8, 4  ;;  %240 = vst.msk [vmem:[#allocation2 + $0x70] sm:$0xf] %vm211_vm3, %v203_v51  ;;  %v913_v51 = vld [vmem:[%s3507_s18 + $0x1c] sm:$0xf] }
  0x68   : > { %498 = vrot.lane.b32.xlu2 %v424_v15, %s3464_s19  ;;  %v187_v15 = vld [vmem:[%s3507_s18 + $0x30] sm:$0xf]  ;;  %v711_v4 = vrot.slane %v709_v61, 4 }
  0x69   : > { %224 = vst.msk [vmem:[#allocation2 + $0x30] sm:$0xf] %vm211_vm3, %v187_v15  ;;  %v689_v25 = vsel %vm3664_vm6, %v687_v16, %v688_v17  ;;  %v718_v16 = vrot.slane %v600_v6, 6  ;;  %v206_v6 = vld [vmem:[%s3507_s18 + $0x7c] sm:$0xf] }
  0x6a   : > { %243 = vst.msk [vmem:[#allocation2 + $0x7c] sm:$0xf] %vm211_vm3, %v206_v6 }
  0x6b   : > { %v720_v22 = vrot.slane %v718_v16, 4 }
  0x6c   : > { %500 = vrot.lane.b32.xlu0 %v427_v19, %s3464_s19  ;;  %v189_v19 = vld [vmem:[%s3507_s18 + $0x38] sm:$0xf] }
  0x6d   : > { %226 = vst.msk [vmem:[#allocation2 + $0x38] sm:$0xf] %vm211_vm3, %v189_v19  ;;  %v717_v19 = vrot.slane %v715_v9, 4 }
  0x6e   : > { %502 = vrot.lane.b32.xlu1 %v430_v23, %s3464_s19  ;;  %v686_v23 = vsel %vm3664_vm6, %v684_v12, %v685_v8 }
  0x70   : > { %504 = vrot.lane.b32.xlu2 %v433_v33, %s3464_s19  ;;  %v594_v33 = vld [vmem:[%s3507_s18 + $0x3c] sm:$0xf] }
  0x71   : > { %v700_v43 = vrot.slane %v594_v33, 6  ;;  %v200_v33 = vld [vmem:[%s3507_s18 + $0x64] sm:$0xf] }
  0x72   : > { %v443_v42 = vpop.permute.xlu2 %442  ;;  %237 = vst.msk [vmem:[#allocation2 + $0x64] sm:$0xf] %vm211_vm3, %v200_v33 }
  0x73   : > { %547 = vst.msk [vmem:[#allocation2 + $0x10] sm:$0xf] %vm542_vm7, %v443_v42  ;;  %v695_v42 = vsel %vm3664_vm6, %v693_v31, %v694_v27 }
  0x74   : > { %765 = vrot.lane.b32.xlu0 %v659_v36, %s3465_s20  ;;  %v697_v36 = vrot.slane %v593_v29, 6  ;;  %v719_v29 = vsel %vm3664_vm6, %v717_v19, %v718_v16  ;;  %v612_v16 = vld [vmem:[%s3507_s18 + $0x84] sm:$0xf] }
  0x76   : > { %767 = vrot.lane.b32.xlu1 %v662_v40, %s3465_s20  ;;  %v595_v40 = vld [vmem:[%s3507_s18 + $0x40] sm:$0xf]  ;;  %v698_v44 = vsel %vm3664_vm6, %v696_v35, %v697_v36  ;;  %v699_v46 = vrot.slane %v697_v36, 4  ;;  %v727_v35 = vrot.slane %v603_v24, 6  ;;  %v209_v24 = vld [vmem:[%s3507_s18 + $0x88] sm:$0xf] }
  0x77   : > { %v703_v45 = vrot.slane %v595_v40, 6  ;;  %246 = vst.msk [vmem:[#allocation2 + $0x88] sm:$0xf] %vm211_vm3, %v209_v24 }
  0x78   : > { %769 = vrot.lane.b32.xlu2 %v665_v49, %s3465_s20  ;;  %v702_v49 = vrot.slane %v700_v43, 4  ;;  %v729_v41 = vrot.slane %v727_v35, 4 }
  0x79   : > { %v705_v53 = vrot.slane %v703_v45, 4 }
  0x7a   : > { %v445_v58 = vpop.permute.xlu2 %444  ;;  %v704_v60 = vsel %vm3664_vm6, %v702_v49, %v703_v45 }
  0x7b   : > { %548 = vst.msk [vmem:[#allocation2 + $0x14] sm:$0xf] %vm542_vm7, %v445_v58  ;;  %v598_v58 = vld [vmem:[%s3507_s18 + $0x4c] sm:$0xf]  ;;  %v707_v62 = vsel %vm3664_vm6, %v705_v53, %v706_v54 }
  0x7c   : > { %771 = vrot.lane.b32.xlu0 %v668_v52, %s3465_s20  ;;  %v193_v52 = vld [vmem:[%s3507_s18 + $0x48] sm:$0xf]  ;;  %v712_v63 = vrot.slane %v598_v58, 6 }
  0x7d   : > { %230 = vst.msk [vmem:[#allocation2 + $0x48] sm:$0xf] %vm211_vm3, %v193_v52 }
  0x7e   : > { %773 = vrot.lane.b32.xlu1 %v671_v55, %s3465_s20  ;;  %v701_v55 = vsel %vm3664_vm6, %v699_v46, %v700_v43  ;;  %v714_v8 = vrot.slane %v712_v63, 4  ;;  %v713_v15 = vsel %vm3664_vm6, %v711_v4, %v712_v63  ;;  %v606_v43 = vld [vmem:[%s3507_s18 + $0x6c] sm:$0xf] }
  0x7f   : > { %v736_v53 = vrot.slane %v606_v43, 6 }
  0x80   : > { %775 = vrot.lane.b32.xlu2 %v674_v1, %s3465_s20  ;;  %v708_v1 = vrot.slane %v706_v54, 4  ;;  %v716_v17 = vsel %vm3664_vm6, %v714_v8, %v715_v9 }
  0x81   : > { %v738_v59 = vrot.slane %v736_v53, 4 }
  0x82   : > { %v451_v11 = vpop.permute.xlu2 %450  ;;  %v710_v10 = vsel %vm3664_vm6, %v708_v1, %v709_v61  ;;  %v609_v61 = vld [vmem:[%s3507_s18 + $0x78] sm:$0xf] }
  0x83   : > { %551 = vst.msk [vmem:[#allocation2 + $0x20] sm:$0xf] %vm542_vm7, %v451_v11  ;;  %v198_v11 = vld [vmem:[%s3507_s18 + $0x5c] sm:$0xf]  ;;  %v745_v8 = vrot.slane %v609_v61, 6 }
  0x84   : > { %777 = vrot.lane.b32.xlu0 %v677_v5, %s3465_s20  ;;  %235 = vst.msk [vmem:[#allocation2 + $0x5c] sm:$0xf] %vm211_vm3, %v198_v11 }
  0x85   : > { %v747_v14 = vrot.slane %v745_v8, 4 }
  0x86   : > { %779 = vrot.lane.b32.xlu1 %v680_v7, %s3465_s20  ;;  %v435_v13 = vpop.permute.xlu0 %434  ;;  %v196_v7 = vld [vmem:[%s3507_s18 + $0x54] sm:$0xf] }
  0x87   : > { %543 = vst.msk [vmem:[#allocation2] sm:$0xf] %vm542_vm7, %v435_v13  ;;  %v601_v13 = vld [vmem:[%s3507_s18 + $0x58] sm:$0xf] }
  0x88   : > { %v439_v20 = vpop.permute.xlu1 %438  ;;  %781 = vrot.lane.b32.xlu2 %v683_v18, %s3465_s20  ;;  %233 = vst.msk [vmem:[#allocation2 + $0x54] sm:$0xf] %vm211_vm3, %v196_v7  ;;  %v721_v18 = vrot.slane %v601_v13, 6 }
  0x89   : > { %545 = vst.msk [vmem:[#allocation2 + $0x8] sm:$0xf] %vm542_vm7, %v439_v20  ;;  %v602_v20 = vld [vmem:[%s3507_s18 + $0x5c] sm:$0xf] }
  0x8a   : > { %v457_v30 = vpop.permute.xlu2 %456  ;;  %v723_v27 = vrot.slane %v721_v18, 4  ;;  %v724_v28 = vrot.slane %v602_v20, 6  ;;  %v722_v34 = vsel %vm3664_vm6, %v720_v22, %v721_v18 }
  0x8b   : > { %554 = vst.msk [vmem:[#allocation2 + $0x2c] sm:$0xf] %vm542_vm7, %v457_v30  ;;  %v201_v30 = vld [vmem:[%s3507_s18 + $0x68] sm:$0xf] }
  0x8c   : > { %783 = vrot.lane.b32.xlu0 %v686_v23, %s3465_s20  ;;  %238 = vst.msk [vmem:[#allocation2 + $0x68] sm:$0xf] %vm211_vm3, %v201_v30  ;;  %v725_v36 = vsel %vm3664_vm6, %v723_v27, %v724_v28  ;;  %v726_v38 = vrot.slane %v724_v28, 4  ;;  %v754_v27 = vrot.slane %v612_v16, 6 }
  0x8e   : > { %785 = vrot.lane.b32.xlu1 %v689_v25, %s3465_s20  ;;  %v437_v32 = vpop.permute.xlu0 %436  ;;  %v199_v25 = vld [vmem:[%s3507_s18 + $0x60] sm:$0xf]  ;;  %v728_v47 = vsel %vm3664_vm6, %v726_v38, %v727_v35  ;;  %v756_v33 = vrot.slane %v754_v27, 4 }
  0x8f   : > { %544 = vst.msk [vmem:[#allocation2 + $0x4] sm:$0xf] %vm542_vm7, %v437_v32  ;;  %v604_v32 = vld [vmem:[%s3507_s18 + $0x64] sm:$0xf] }
  0x90   : > { %v441_v39 = vpop.permute.xlu1 %440  ;;  %787 = vrot.lane.b32.xlu2 %v692_v37, %s3465_s20  ;;  %236 = vst.msk [vmem:[#allocation2 + $0x60] sm:$0xf] %vm211_vm3, %v199_v25  ;;  %v730_v37 = vrot.slane %v604_v32, 6 }
  0x91   : > { %546 = vst.msk [vmem:[#allocation2 + $0xc] sm:$0xf] %vm542_vm7, %v441_v39  ;;  %v605_v39 = vld [vmem:[%s3507_s18 + $0x68] sm:$0xf] }
  0x92   : > { %v463_v48 = vpop.permute.xlu2 %462  ;;  %v732_v45 = vrot.slane %v730_v37, 4  ;;  %v733_v46 = vrot.slane %v605_v39, 6  ;;  %v731_v52 = vsel %vm3664_vm6, %v729_v41, %v730_v37  ;;  %v911_v39 = vld [vmem:[%s3507_s18 + $0x14] sm:$0xf] }
  0x93   : > { %557 = vst.msk [vmem:[#allocation2 + $0x38] sm:$0xf] %vm542_vm7, %v463_v48  ;;  %v204_v48 = vld [vmem:[%s3507_s18 + $0x74] sm:$0xf] }
  0x94   : > { %789 = vrot.lane.b32.xlu0 %v695_v42, %s3465_s20  ;;  %241 = vst.msk [vmem:[#allocation2 + $0x74] sm:$0xf] %vm211_vm3, %v204_v48  ;;  %v734_v54 = vsel %vm3664_vm6, %v732_v45, %v733_v46  ;;  %v735_v56 = vrot.slane %v733_v46, 4 }
  0x96   : > { %791 = vrot.lane.b32.xlu1 %v698_v44, %s3465_s20  ;;  %v447_v50 = vpop.permute.xlu0 %446  ;;  %v202_v44 = vld [vmem:[%s3507_s18 + $0x6c] sm:$0xf]  ;;  %v737_v2 = vsel %vm3664_vm6, %v735_v56, %v736_v53  ;;  %v914_v56 = vld [vmem:[%s3507_s18 + $0x20] sm:$0xf] }
  0x97   : > { %549 = vst.msk [vmem:[#allocation2 + $0x18] sm:$0xf] %vm542_vm7, %v447_v50  ;;  %v607_v50 = vld [vmem:[%s3507_s18 + $0x70] sm:$0xf] }
  0x98   : > { %v449_v57 = vpop.permute.xlu1 %448  ;;  %793 = vrot.lane.b32.xlu2 %v701_v55, %s3465_s20  ;;  %239 = vst.msk [vmem:[#allocation2 + $0x6c] sm:$0xf] %vm211_vm3, %v202_v44  ;;  %v739_v55 = vrot.slane %v607_v50, 6  ;;  %v986_v44 = vrot.slane %v911_v39, 6  ;;  %v923_v39 = vld [vmem:[%s3507_s18 + $0x44] sm:$0xf] }
  0x99   : > { %550 = vst.msk [vmem:[#allocation2 + $0x1c] sm:$0xf] %vm542_vm7, %v449_v57  ;;  %v608_v57 = vld [vmem:[%s3507_s18 + $0x74] sm:$0xf] }
  0x9a   : > { %v469_v3 = vpop.permute.xlu2 %468  ;;  %v741_v63 = vrot.slane %v739_v55, 4  ;;  %v742_v1 = vrot.slane %v608_v57, 6  ;;  %v740_v7 = vsel %vm3664_vm6, %v738_v59, %v739_v55 }
  0x9b   : > { %560 = vst.msk [vmem:[#allocation2 + $0x44] sm:$0xf] %vm542_vm7, %v469_v3  ;;  %v207_v3 = vld [vmem:[%s3507_s18 + $0x80] sm:$0xf] }
  0x9c   : > { %795 = vrot.lane.b32.xlu0 %v704_v60, %s3465_s20  ;;  %244 = vst.msk [vmem:[#allocation2 + $0x80] sm:$0xf] %vm211_vm3, %v207_v3  ;;  %v743_v9 = vsel %vm3664_vm6, %v741_v63, %v742_v1  ;;  %v744_v11 = vrot.slane %v742_v1, 4  ;;  %v916_v3 = vld [vmem:[%s3507_s18 + $0x28] sm:$0xf] }
  0x9e   : > { %797 = vrot.lane.b32.xlu1 %v707_v62, %s3465_s20  ;;  %v453_v5 = vpop.permute.xlu0 %452  ;;  %v205_v62 = vld [vmem:[%s3507_s18 + $0x78] sm:$0xf]  ;;  %v746_v20 = vsel %vm3664_vm6, %v744_v11, %v745_v8  ;;  %v917_v8 = vld [vmem:[%s3507_s18 + $0x2c] sm:$0xf] }
  0x9f   : > { %552 = vst.msk [vmem:[#allocation2 + $0x24] sm:$0xf] %vm542_vm7, %v453_v5  ;;  %v610_v5 = vld [vmem:[%s3507_s18 + $0x7c] sm:$0xf] }
  0xa0   : > { %v455_v12 = vpop.permute.xlu1 %454  ;;  %799 = vrot.lane.b32.xlu2 %v710_v10, %s3465_s20  ;;  %242 = vst.msk [vmem:[#allocation2 + $0x78] sm:$0xf] %vm211_vm3, %v205_v62  ;;  %v748_v10 = vrot.slane %v610_v5, 6  ;;  %v915_v62 = vld [vmem:[%s3507_s18 + $0x24] sm:$0xf] }
  0xa1   : > { %553 = vst.msk [vmem:[#allocation2 + $0x28] sm:$0xf] %vm542_vm7, %v455_v12  ;;  %v611_v12 = vld [vmem:[%s3507_s18 + $0x80] sm:$0xf]  ;;  %v998_v5 = vrot.slane %v915_v62, 6 }
  0xa2   : > { %v475_v21 = vpop.permute.xlu2 %474  ;;  %v750_v18 = vrot.slane %v748_v10, 4  ;;  %v751_v19 = vrot.slane %v611_v12, 6  ;;  %v749_v25 = vsel %vm3664_vm6, %v747_v14, %v748_v10  ;;  %v1001_v10 = vrot.slane %v916_v3, 6  ;;  %v918_v14 = vld [vmem:[%s3507_s18 + $0x30] sm:$0xf] }
  0xa3   : > { %563 = vst.msk [vmem:[#allocation2 + $0x50] sm:$0xf] %vm542_vm7, %v475_v21  ;;  %v210_v21 = vld [vmem:[%s3507_s18 + $0x8c] sm:$0xf]  ;;  %v1004_v12 = vrot.slane %v917_v8, 6 }
  0xa4   : > { %801 = vrot.lane.b32.xlu0 %v713_v15, %s3465_s20  ;;  %247 = vst.msk [vmem:[#allocation2 + $0x8c] sm:$0xf] %vm211_vm3, %v210_v21  ;;  %v752_v28 = vsel %vm3664_vm6, %v750_v18, %v751_v19  ;;  %v753_v30 = vrot.slane %v751_v19, 4  ;;  %v1003_v16 = vrot.slane %v1001_v10, 4  ;;  %v919_v18 = vld [vmem:[%s3507_s18 + $0x34] sm:$0xf] }
  0xa5   : > { %v1006_v19 = vrot.slane %v1004_v12, 4 }
  0xa6   : > { %803 = vrot.lane.b32.xlu1 %v716_v17, %s3465_s20  ;;  %v459_v23 = vpop.permute.xlu0 %458  ;;  %v208_v17 = vld [vmem:[%s3507_s18 + $0x84] sm:$0xf]  ;;  %v755_v37 = vsel %vm3664_vm6, %v753_v30, %v754_v27  ;;  %v1005_v24 = vsel %vm3664_vm6, %v1003_v16, %v1004_v12  ;;  %v921_v30 = vld [vmem:[%s3507_s18 + $0x3c] sm:$0xf]  ;;  %v930_v12 = vld [vmem:[%s3507_s18 + $0x60] sm:$0xf] }
  0xa7   : > { %555 = vst.msk [vmem:[#allocation2 + $0x30] sm:$0xf] %vm542_vm7, %v459_v23  ;;  %v613_v23 = vld [vmem:[%s3507_s18 + $0x88] sm:$0xf]  ;;  %v931_v16 = vld [vmem:[%s3507_s18 + $0x64] sm:$0xf] }
  0xa8   : > { %v461_v31 = vpop.permute.xlu1 %460  ;;  %805 = vrot.lane.b32.xlu2 %v719_v29, %s3465_s20  ;;  %245 = vst.msk [vmem:[#allocation2 + $0x84] sm:$0xf] %vm211_vm3, %v208_v17  ;;  %v757_v29 = vrot.slane %v613_v23, 6  ;;  %v920_v23 = vld [vmem:[%s3507_s18 + $0x38] sm:$0xf]  ;;  %vm2809_vm3 = vcmask 293888  }
  0xa9   : > { %556 = vst.msk [vmem:[#allocation2 + $0x34] sm:$0xf] %vm542_vm7, %v461_v31  ;;  %v614_v31 = vld [vmem:[%s3507_s18 + $0x8c] sm:$0xf] }
  0xaa   : > { %v481_v40 = vpop.permute.xlu2 %480  ;;  %v759_v35 = vrot.slane %v757_v29, 4  ;;  %v758_v41 = vsel %vm3664_vm6, %v756_v33, %v757_v29 }
  0xab   : > { %566 = vst.msk [vmem:[#allocation2 + $0x5c] sm:$0xf] %vm542_vm7, %v481_v40  ;;  %v615_v40 = vld [vmem:[%s3507_s18 + $0x90] sm:$0x3] }
  0xac   : > { %807 = vrot.lane.b32.xlu0 %v722_v34, %s3465_s20  ;;  %v763_v46 = vrot.slane %v615_v40, 6 }
  0xae   : > { %809 = vrot.lane.b32.xlu1 %v725_v36, %s3465_s20  ;;  %v465_v42 = vpop.permute.xlu0 %464  ;;  %v760_v36 = vrot.slane %v614_v31, 6 }
  0xaf   : > { %558 = vst.msk [vmem:[#allocation2 + $0x3c] sm:$0xf] %vm542_vm7, %v465_v42  ;;  %v910_v42 = vld [vmem:[%s3507_s18 + $0x10] sm:$0xc] }
  0xb0   : > { %v467_v49 = vpop.permute.xlu1 %466  ;;  %811 = vrot.lane.b32.xlu2 %v728_v47, %s3465_s20  ;;  %v761_v43 = vsel %vm3664_vm6, %v759_v35, %v760_v36  ;;  %v762_v45 = vrot.slane %v760_v36, 4  ;;  %v912_v47 = vld [vmem:[%s3507_s18 + $0x18] sm:$0xf]  ;;  %v1016_v36 = vrot.slane %v921_v30, 6 }
  0xb1   : > { %559 = vst.msk [vmem:[#allocation2 + $0x40] sm:$0xf] %vm542_vm7, %v467_v49  ;;  %v3272_v49 = vrot.slane %v910_v42, 10  ;;  %v989_v53 = vrot.slane %v912_v47, 6 }
  0xb2   : > { %v487_v58 = vpop.permute.xlu2 %486 }
  0xb3   : > { %569 = vst.msk [vmem:[#allocation2 + $0x68] sm:$0xf] %vm542_vm7, %v487_v58  ;;  %v987_v57 = vsel %vm3664_vm6, %v3272_v49, %v986_v44  ;;  %v992_v58 = vrot.slane %v913_v51, 6  ;;  %v991_v61 = vrot.slane %v989_v53, 4  ;;  %v925_v49 = vld [vmem:[%s3507_s18 + $0x4c] sm:$0xf] }
  0xb4   : > { %813 = vrot.lane.b32.xlu0 %v731_v52, %s3465_s20  ;;  %v988_v52 = vrot.slane %v986_v44, 4  ;;  %v1018_v44 = vrot.slane %v1016_v36, 4 }
  0xb5   : > { %v994_v1 = vrot.slane %v992_v58, 4  ;;  %v993_v6 = vsel %vm3664_vm6, %v991_v61, %v992_v58 }
  0xb6   : > { %815 = vrot.lane.b32.xlu1 %v734_v54, %s3465_s20  ;;  %v471_v60 = vpop.permute.xlu0 %470  ;;  %v764_v54 = vsel %vm3664_vm6, %v762_v45, %v763_v46  ;;  %v990_v59 = vsel %vm3664_vm6, %v988_v52, %v989_v53  ;;  %v924_v45 = vld [vmem:[%s3507_s18 + $0x48] sm:$0xf] }
  0xb7   : > { %561 = vst.msk [vmem:[#allocation2 + $0x48] sm:$0xf] %vm542_vm7, %v471_v60  ;;  %v995_v60 = vrot.slane %v914_v56, 6  ;;  %v1025_v51 = vrot.slane %v924_v45, 6  ;;  %v1028_v56 = vrot.slane %v925_v49, 6 }
  0xb8   : > { %v473_v4 = vpop.permute.xlu1 %472  ;;  %817 = vrot.lane.b32.xlu2 %v737_v2, %s3465_s20 }
  0xb9   : > { %562 = vst.msk [vmem:[#allocation2 + $0x4c] sm:$0xf] %vm542_vm7, %v473_v4  ;;  %v997_v4 = vrot.slane %v995_v60, 4  ;;  %v1030_v62 = vrot.slane %v1028_v56, 4 }
  0xba   : > { %v493_v13 = vpop.permute.xlu2 %492 }
  0xbb   : > { %572 = vst.msk [vmem:[#allocation2 + $0x74] sm:$0xf] %vm542_vm7, %v493_v13  ;;  %v999_v11 = vsel %vm3664_vm6, %v997_v4, %v998_v5  ;;  %v1000_v13 = vrot.slane %v998_v5, 4 }
  0xbc   : > { %819 = vrot.lane.b32.xlu0 %v740_v7, %s3465_s20 }
  0xbd   : > { %v1002_v21 = vsel %vm3664_vm6, %v1000_v13, %v1001_v10 }
  0xbe   : > { %821 = vrot.lane.b32.xlu1 %v743_v9, %s3465_s20  ;;  %v477_v15 = vpop.permute.xlu0 %476  ;;  %v996_v9 = vsel %vm3664_vm6, %v994_v1, %v995_v60  ;;  %v927_v60 = vld [vmem:[%s3507_s18 + $0x54] sm:$0xf]  ;;  %v928_v1 = vld [vmem:[%s3507_s18 + $0x58] sm:$0xf] }
  0xbf   : > { %564 = vst.msk [vmem:[#allocation2 + $0x54] sm:$0xf] %vm542_vm7, %v477_v15  ;;  %v1034_v3 = vrot.slane %v927_v60, 6  ;;  %v1037_v8 = vrot.slane %v928_v1, 6 }
  0xc0   : > { %v479_v22 = vpop.permute.xlu1 %478  ;;  %823 = vrot.lane.b32.xlu2 %v746_v20, %s3465_s20  ;;  %v1007_v20 = vrot.slane %v918_v14, 6 }
  0xc1   : > { %565 = vst.msk [vmem:[#allocation2 + $0x58] sm:$0xf] %vm542_vm7, %v479_v22  ;;  %v1039_v14 = vrot.slane %v1037_v8, 4 }
  0xc2   : > { %v499_v32 = vpop.permute.xlu2 %498  ;;  %v1008_v27 = vsel %vm3664_vm6, %v1006_v19, %v1007_v20  ;;  %v1009_v29 = vrot.slane %v1007_v20, 4 }
  0xc3   : > { %575 = vst.msk [vmem:[#allocation2 + $0x80] sm:$0xf] %vm542_vm7, %v499_v32 }
  0xc4   : > { %825 = vrot.lane.b32.xlu0 %v749_v25, %s3465_s20  ;;  %v1010_v25 = vrot.slane %v919_v18, 6  ;;  %v1043_v18 = vrot.slane %v930_v12, 6 }
  0xc6   : > { %827 = vrot.lane.b32.xlu1 %v752_v28, %s3465_s20  ;;  %v483_v34 = vpop.permute.xlu0 %482  ;;  %v1013_v28 = vrot.slane %v920_v23, 6  ;;  %v1012_v32 = vrot.slane %v1010_v25, 4  ;;  %v1046_v23 = vrot.slane %v931_v16, 6 }
  0xc7   : > { %567 = vst.msk [vmem:[#allocation2 + $0x60] sm:$0xf] %vm542_vm7, %v483_v34  ;;  %v922_v34 = vld [vmem:[%s3507_s18 + $0x40] sm:$0xf] }
  0xc8   : > { %v485_v38 = vpop.permute.xlu1 %484  ;;  %829 = vrot.lane.b32.xlu2 %v755_v37, %s3465_s20  ;;  %v1015_v35 = vrot.slane %v1013_v28, 4  ;;  %v1011_v37 = vsel %vm3664_vm6, %v1009_v29, %v1010_v25  ;;  %v1014_v40 = vsel %vm3664_vm6, %v1012_v32, %v1013_v28  ;;  %v933_v28 = vld [vmem:[%s3507_s18 + $0x6c] sm:$0xf]  ;;  %v1048_v30 = vrot.slane %v1046_v23, 4  ;;  %v934_v32 = vld [vmem:[%s3507_s18 + $0x70] sm:$0xf] }
  0xc9   : > { %568 = vst.msk [vmem:[#allocation2 + $0x64] sm:$0xf] %vm542_vm7, %v485_v38 }
  0xca   : > { %v505_v48 = vpop.permute.xlu2 %504  ;;  %v1017_v42 = vsel %vm3664_vm6, %v1015_v35, %v1016_v36 }
  0xcb   : > { %578 = vst.msk [vmem:[#allocation2 + $0x8c] sm:$0xf] %vm542_vm7, %v505_v48 }
  0xcc   : > { %831 = vrot.lane.b32.xlu0 %v758_v41, %s3465_s20  ;;  %v1019_v41 = vrot.slane %v922_v34, 6  ;;  %v1052_v34 = vrot.slane %v933_v28, 6 }
  0xce   : > { %833 = vrot.lane.b32.xlu1 %v761_v43, %s3465_s20  ;;  %v489_v50 = vpop.permute.xlu0 %488  ;;  %v1022_v43 = vrot.slane %v923_v39, 6  ;;  %v1021_v47 = vrot.slane %v1019_v41, 4  ;;  %v1020_v52 = vsel %vm3664_vm6, %v1018_v44, %v1019_v41  ;;  %v1055_v39 = vrot.slane %v934_v32, 6 }
  0xcf   : > { %570 = vst.msk [vmem:[#allocation2 + $0x6c] sm:$0xf] %vm542_vm7, %v489_v50 }
  0xd0   : > { %v491_v55 = vpop.permute.xlu1 %490  ;;  %835 = vrot.lane.b32.xlu2 %v764_v54, %s3465_s20  ;;  %v1024_v50 = vrot.slane %v1022_v43, 4  ;;  %v926_v54 = vld [vmem:[%s3507_s18 + $0x50] sm:$0xf]  ;;  %v1057_v45 = vrot.slane %v1055_v39, 4 }
  0xd1   : > { %571 = vst.msk [vmem:[#allocation2 + $0x70] sm:$0xf] %vm542_vm7, %v491_v55  ;;  %v1023_v55 = vsel %vm3664_vm6, %v1021_v47, %v1022_v43  ;;  %v1031_v58 = vrot.slane %v926_v54, 6  ;;  %v936_v43 = vld [vmem:[%s3507_s18 + $0x78] sm:$0xf] }
  0xd2   : > { %v770_v63 = vpop.permute.xlu2 %769  ;;  %v937_v47 = vld [vmem:[%s3507_s18 + $0x7c] sm:$0xf]  ;;  %v1061_v49 = vrot.slane %v936_v43, 6 }
  0xd3   : > { %876 = vst.msk [vmem:[#allocation2 + $0x8] sm:$0xf] %vm873_vm8, %v770_v63  ;;  %v1064_v54 = vrot.slane %v937_v47, 6  ;;  %v1241_v47 = vld [vmem:[%s3507_s18 + $0x1c] sm:$0xf] }
  0xd4   : > { %1093 = vrot.lane.b32.xlu0 %v987_v57, %s3466_s21  ;;  %v1026_v57 = vsel %vm3664_vm6, %v1024_v50, %v1025_v51 }
  0xd5   : > { %v1066_v60 = vrot.slane %v1064_v54, 4 }
  0xd6   : > { %1095 = vrot.lane.b32.xlu1 %v990_v59, %s3466_s21  ;;  %v495_v2 = vpop.permute.xlu0 %494  ;;  %v1027_v59 = vrot.slane %v1025_v51, 4 }
  0xd7   : > { %573 = vst.msk [vmem:[#allocation2 + $0x78] sm:$0xf] %vm542_vm7, %v495_v2  ;;  %v1033_v2 = vrot.slane %v1031_v58, 4 }
  0xd8   : > { %v497_v7 = vpop.permute.xlu1 %496  ;;  %1097 = vrot.lane.b32.xlu2 %v993_v6, %s3466_s21  ;;  %v1029_v4 = vsel %vm3664_vm6, %v1027_v59, %v1028_v56  ;;  %v929_v6 = vld [vmem:[%s3507_s18 + $0x5c] sm:$0xf] }
  0xd9   : > { %574 = vst.msk [vmem:[#allocation2 + $0x7c] sm:$0xf] %vm542_vm7, %v497_v7  ;;  %v1032_v7 = vsel %vm3664_vm6, %v1030_v62, %v1031_v58  ;;  %v1040_v10 = vrot.slane %v929_v6, 6  ;;  %v939_v58 = vld [vmem:[%s3507_s18 + $0x84] sm:$0xf] }
  0xda   : > { %v776_v15 = vpop.permute.xlu2 %775  ;;  %v940_v62 = vld [vmem:[%s3507_s18 + $0x88] sm:$0xf]  ;;  %v1070_v1 = vrot.slane %v939_v58, 6  ;;  %v1243_v58 = vld [vmem:[%s3507_s18 + $0x24] sm:$0xf] }
  0xdb   : > { %879 = vst.msk [vmem:[#allocation2 + $0x14] sm:$0xf] %vm873_vm8, %v776_v15  ;;  %v1073_v6 = vrot.slane %v940_v62, 6  ;;  %v1244_v62 = vld [vmem:[%s3507_s18 + $0x28] sm:$0xf] }
  0xdc   : > { %1099 = vrot.lane.b32.xlu0 %v996_v9, %s3466_s21  ;;  %v1035_v9 = vsel %vm3664_vm6, %v1033_v2, %v1034_v3 }
  0xdd   : > { %v1075_v12 = vrot.slane %v1073_v6, 4 }
  0xde   : > { %1101 = vrot.lane.b32.xlu1 %v999_v11, %s3466_s21  ;;  %v501_v17 = vpop.permute.xlu0 %500  ;;  %v1036_v11 = vrot.slane %v1034_v3, 4 }
  0xdf   : > { %576 = vst.msk [vmem:[#allocation2 + $0x84] sm:$0xf] %vm542_vm7, %v501_v17  ;;  %v1042_v17 = vrot.slane %v1040_v10, 4 }
  0xe0   : > { %v503_v22 = vpop.permute.xlu1 %502  ;;  %1103 = vrot.lane.b32.xlu2 %v1002_v21, %s3466_s21  ;;  %v1038_v19 = vsel %vm3664_vm6, %v1036_v11, %v1037_v8  ;;  %v932_v21 = vld [vmem:[%s3507_s18 + $0x68] sm:$0xf] }
  0xe1   : > { %577 = vst.msk [vmem:[#allocation2 + $0x88] sm:$0xf] %vm542_vm7, %v503_v22  ;;  %v1041_v22 = vsel %vm3664_vm6, %v1039_v14, %v1040_v10  ;;  %v1049_v25 = vrot.slane %v932_v21, 6  ;;  %v942_v10 = vld [vmem:[%s3507_s18 + $0x90] sm:$0xf] }
  0xe2   : > { %v782_v31 = vpop.permute.xlu2 %781  ;;  %v943_v14 = vld [vmem:[%s3507_s18 + $0x94] sm:$0xf]  ;;  %v1079_v16 = vrot.slane %v942_v10, 6  ;;  %v1246_v10 = vld [vmem:[%s3507_s18 + $0x30] sm:$0xf] }
  0xe3   : > { %882 = vst.msk [vmem:[#allocation2 + $0x20] sm:$0xf] %vm873_vm8, %v782_v31  ;;  %v1082_v21 = vrot.slane %v943_v14, 6  ;;  %v1247_v14 = vld [vmem:[%s3507_s18 + $0x34] sm:$0xf] }
  0xe4   : > { %1105 = vrot.lane.b32.xlu0 %v1005_v24, %s3466_s21  ;;  %v1044_v24 = vsel %vm3664_vm6, %v1042_v17, %v1043_v18  ;;  %v944_v17 = vld [vmem:[%s3507_s18 + $0x98] sm:$0xf] }
  0xe5   : > { %v1084_v28 = vrot.slane %v1082_v21, 4 }
  0xe6   : > { %1107 = vrot.lane.b32.xlu1 %v1008_v27, %s3466_s21  ;;  %v766_v33 = vpop.permute.xlu0 %765  ;;  %v1045_v27 = vrot.slane %v1043_v18, 4 }
  0xe7   : > { %874 = vst.msk [vmem:[#allocation2] sm:$0xf] %vm873_vm8, %v766_v33  ;;  %v1051_v33 = vrot.slane %v1049_v25, 4 }
  0xe8   : > { %v768_v38 = vpop.permute.xlu1 %767  ;;  %1109 = vrot.lane.b32.xlu2 %v1011_v37, %s3466_s21  ;;  %v1047_v35 = vsel %vm3664_vm6, %v1045_v27, %v1046_v23  ;;  %v935_v37 = vld [vmem:[%s3507_s18 + $0x74] sm:$0xf] }
  0xe9   : > { %875 = vst.msk [vmem:[#allocation2 + $0x4] sm:$0xf] %vm873_vm8, %v768_v38  ;;  %v1050_v38 = vsel %vm3664_vm6, %v1048_v30, %v1049_v25  ;;  %v1058_v41 = vrot.slane %v935_v37, 6  ;;  %v1081_v25 = vrot.slane %v1079_v16, 4 }
  0xea   : > { %v788_v46 = vpop.permute.xlu2 %787 }
  0xeb   : > { %885 = vst.msk [vmem:[#allocation2 + $0x2c] sm:$0xf] %vm873_vm8, %v788_v46  ;;  %v1083_v32 = vsel %vm3664_vm6, %v1081_v25, %v1082_v21  ;;  %v1341_v21 = vrot.slane %v1247_v14, 7  ;;  %v1249_v25 = vld [vmem:[%s3507_s18 + $0x3c] sm:$0xf] }
  0xec   : > { %1111 = vrot.lane.b32.xlu0 %v1014_v40, %s3466_s21  ;;  %v1053_v40 = vsel %vm3664_vm6, %v1051_v33, %v1052_v34 }
  0xee   : > { %1113 = vrot.lane.b32.xlu1 %v1017_v42, %s3466_s21  ;;  %v772_v48 = vpop.permute.xlu0 %771  ;;  %v1054_v42 = vrot.slane %v1052_v34, 4  ;;  %v1239_v34 = vld [vmem:[%s3507_s18 + $0x14] sm:$0xf] }
  0xef   : > { %877 = vst.msk [vmem:[#allocation2 + $0xc] sm:$0xf] %vm873_vm8, %v772_v48  ;;  %v1060_v48 = vrot.slane %v1058_v41, 4 }
  0xf0   : > { %v774_v53 = vpop.permute.xlu1 %773  ;;  %1115 = vrot.lane.b32.xlu2 %v1020_v52, %s3466_s21  ;;  %v1056_v50 = vsel %vm3664_vm6, %v1054_v42, %v1055_v39  ;;  %v938_v52 = vld [vmem:[%s3507_s18 + $0x80] sm:$0xf]  ;;  %v1317_v39 = vrot.slane %v1239_v34, 7  ;;  %v1240_v42 = vld [vmem:[%s3507_s18 + $0x18] sm:$0xf] }
  0xf1   : > { %878 = vst.msk [vmem:[#allocation2 + $0x10] sm:$0xf] %vm873_vm8, %v774_v53  ;;  %v1059_v53 = vsel %vm3664_vm6, %v1057_v45, %v1058_v41  ;;  %v1067_v56 = vrot.slane %v938_v52, 6  ;;  %v1242_v52 = vld [vmem:[%s3507_s18 + $0x20] sm:$0xf] }
  0xf2   : > { %v794_v61 = vpop.permute.xlu2 %793 }
  0xf3   : > { %888 = vst.msk [vmem:[#allocation2 + $0x38] sm:$0xf] %vm873_vm8, %v794_v61 }
  0xf4   : > { %1117 = vrot.lane.b32.xlu0 %v1023_v55, %s3466_s21  ;;  %v1062_v55 = vsel %vm3664_vm6, %v1060_v48, %v1061_v49  ;;  %v1319_v48 = vrot.slane %v1317_v39, 4 }
  0xf6   : > { %1119 = vrot.lane.b32.xlu1 %v1026_v57, %s3466_s21  ;;  %v778_v63 = vpop.permute.xlu0 %777  ;;  %v1063_v57 = vrot.slane %v1061_v49, 4  ;;  %v1320_v49 = vrot.slane %v1240_v42, 7 }
  0xf7   : > { %880 = vst.msk [vmem:[#allocation2 + $0x18] sm:$0xf] %vm873_vm8, %v778_v63  ;;  %v1069_v63 = vrot.slane %v1067_v56, 4 }
  0xf8   : > { %v780_v5 = vpop.permute.xlu1 %779  ;;  %1121 = vrot.lane.b32.xlu2 %v1029_v4, %s3466_s21  ;;  %v1065_v2 = vsel %vm3664_vm6, %v1063_v57, %v1064_v54  ;;  %v941_v4 = vld [vmem:[%s3507_s18 + $0x8c] sm:$0xf]  ;;  %v1323_v54 = vrot.slane %v1241_v47, 7  ;;  %v1322_v57 = vrot.slane %v1320_v49, 4 }
  0xf9   : > { %881 = vst.msk [vmem:[#allocation2 + $0x1c] sm:$0xf] %vm873_vm8, %v780_v5  ;;  %v1068_v5 = vsel %vm3664_vm6, %v1066_v60, %v1067_v56  ;;  %v1076_v8 = vrot.slane %v941_v4, 6  ;;  %v1326_v56 = vrot.slane %v1242_v52, 7  ;;  %v1245_v4 = vld [vmem:[%s3507_s18 + $0x2c] sm:$0xf] }
  0xfa   : > { %v800_v13 = vpop.permute.xlu2 %799  ;;  %v1325_v60 = vrot.slane %v1323_v54, 4 }
  0xfb   : > { %891 = vst.msk [vmem:[#allocation2 + $0x44] sm:$0xf] %vm873_vm8, %v800_v13 }
  0xfc   : > { %1123 = vrot.lane.b32.xlu0 %v1032_v7, %s3466_s21  ;;  %v1071_v7 = vsel %vm3664_vm6, %v1069_v63, %v1070_v1  ;;  %v1328_v63 = vrot.slane %v1326_v56, 4 }
  0xfe   : > { %1125 = vrot.lane.b32.xlu1 %v1035_v9, %s3466_s21  ;;  %v784_v15 = vpop.permute.xlu0 %783  ;;  %v1072_v9 = vrot.slane %v1070_v1, 4  ;;  %v1329_v1 = vrot.slane %v1243_v58, 7 }
  0xff   : > { %883 = vst.msk [vmem:[#allocation2 + $0x24] sm:$0xf] %vm873_vm8, %v784_v15  ;;  %v1078_v15 = vrot.slane %v1076_v8, 4 }
 0x100   : > { %v786_v20 = vpop.permute.xlu1 %785  ;;  %1127 = vrot.lane.b32.xlu2 %v1038_v19, %s3466_s21  ;;  %v1074_v18 = vsel %vm3664_vm6, %v1072_v9, %v1073_v6  ;;  %v1332_v6 = vrot.slane %v1244_v62, 7  ;;  %v1331_v9 = vrot.slane %v1329_v1, 4 }
 0x101   : > { %884 = vst.msk [vmem:[#allocation2 + $0x28] sm:$0xf] %vm873_vm8, %v786_v20  ;;  %v1077_v20 = vsel %vm3664_vm6, %v1075_v12, %v1076_v8  ;;  %v1080_v23 = vsel %vm3664_vm6, %v1078_v15, %v1079_v16  ;;  %v1335_v8 = vrot.slane %v1245_v4, 7  ;;  %v1338_v16 = vrot.slane %v1246_v10, 7 }
 0x102   : > { %v806_v29 = vpop.permute.xlu2 %805  ;;  %v1334_v12 = vrot.slane %v1332_v6, 4 }
 0x103   : > { %894 = vst.msk [vmem:[#allocation2 + $0x50] sm:$0xf] %vm873_vm8, %v806_v29  ;;  %v1337_v15 = vrot.slane %v1335_v8, 4 }
 0x104   : > { %1129 = vrot.lane.b32.xlu0 %v1041_v22, %s3466_s21  ;;  %v1085_v22 = vrot.slane %v944_v17, 6  ;;  %v1333_v17 = vsel %vm4091_vm11, %v1331_v9, %v1332_v6  ;;  %v1258_v9 = vld [vmem:[%s3507_s18 + $0x60] sm:$0xf] }
 0x106   : > { %1131 = vrot.lane.b32.xlu1 %v1044_v24, %s3466_s21  ;;  %v790_v31 = vpop.permute.xlu0 %789  ;;  %v945_v24 = vld [vmem:[%s3507_s18 + $0x9c] sm:$0xf]  ;;  %v1087_v30 = vrot.slane %v1085_v22, 4 }
 0x107   : > { %886 = vst.msk [vmem:[#allocation2 + $0x30] sm:$0xf] %vm873_vm8, %v790_v31  ;;  %v1088_v31 = vrot.slane %v945_v24, 6  ;;  %v1340_v24 = vrot.slane %v1338_v16, 4 }
 0x108   : > { %v792_v36 = vpop.permute.xlu1 %791  ;;  %1133 = vrot.lane.b32.xlu2 %v1047_v35, %s3466_s21  ;;  %v946_v35 = vld [vmem:[%s3507_s18 + $0xa0] sm:$0x3] }
 0x109   : > { %887 = vst.msk [vmem:[#allocation2 + $0x34] sm:$0xf] %vm873_vm8, %v792_v36  ;;  %v1086_v36 = vsel %vm3664_vm6, %v1084_v28, %v1085_v22  ;;  %v1089_v37 = vsel %vm3664_vm6, %v1087_v30, %v1088_v31  ;;  %v1091_v41 = vrot.slane %v946_v35, 6  ;;  %v1339_v22 = vsel %vm4091_vm11, %v1337_v15, %v1338_v16  ;;  %v1250_v30 = vld [vmem:[%s3507_s18 + $0x40] sm:$0xf] }
 0x10a   : > { %v812_v44 = vpop.permute.xlu2 %811  ;;  %v1343_v28 = vrot.slane %v1341_v21, 4  ;;  %v1251_v35 = vld [vmem:[%s3507_s18 + $0x44] sm:$0xf]  ;;  %v1374_v15 = vrot.slane %v1258_v9, 7 }
 0x10b   : > { %897 = vst.msk [vmem:[#allocation2 + $0x5c] sm:$0xf] %vm873_vm8, %v812_v44 }
 0x10c   : > { %1135 = vrot.lane.b32.xlu0 %v1050_v38, %s3466_s21  ;;  %v1238_v38 = vld [vmem:[%s3507_s18 + $0x10] sm:$0x8] }
 0x10d   : > { %v3273_v44 = vrot.slane %v1238_v38, 11 }
 0x10e   : > { %1137 = vrot.lane.b32.xlu1 %v1053_v40, %s3466_s21  ;;  %v796_v46 = vpop.permute.xlu0 %795  ;;  %v1090_v40 = vrot.slane %v1088_v31, 4 }
 0x10f   : > { %889 = vst.msk [vmem:[#allocation2 + $0x3c] sm:$0xf] %vm873_vm8, %v796_v46 }
 0x110   : > { %v798_v51 = vpop.permute.xlu1 %797  ;;  %1139 = vrot.lane.b32.xlu2 %v1056_v50, %s3466_s21  ;;  %v1092_v50 = vsel %vm3664_vm6, %v1090_v40, %v1091_v41  ;;  %v1252_v41 = vld [vmem:[%s3507_s18 + $0x48] sm:$0xf] }
 0x111   : > { %890 = vst.msk [vmem:[#allocation2 + $0x40] sm:$0xf] %vm873_vm8, %v798_v51 }
 0x112   : > { %v818_v59 = vpop.permute.xlu2 %817 }
 0x113   : > { %900 = vst.msk [vmem:[#allocation2 + $0x68] sm:$0xf] %vm873_vm8, %v818_v59 }
 0x114   : > { %1141 = vrot.lane.b32.xlu0 %v1059_v53, %s3466_s21  ;;  %v1318_v53 = vsel %vm4091_vm11, %v3273_v44, %v1317_v39  ;;  %v1353_v39 = vrot.slane %v1251_v35, 7 }
 0x116   : > { %1143 = vrot.lane.b32.xlu1 %v1062_v55, %s3466_s21  ;;  %v802_v61 = vpop.permute.xlu0 %801  ;;  %v1321_v55 = vsel %vm4091_vm11, %v1319_v48, %v1320_v49  ;;  %v1355_v47 = vrot.slane %v1353_v39, 4  ;;  %v1356_v48 = vrot.slane %v1252_v41, 7 }
 0x117   : > { %892 = vst.msk [vmem:[#allocation2 + $0x48] sm:$0xf] %vm873_vm8, %v802_v61 }
 0x118   : > { %v804_v3 = vpop.permute.xlu1 %803  ;;  %1145 = vrot.lane.b32.xlu2 %v1065_v2, %s3466_s21  ;;  %v1324_v2 = vsel %vm4091_vm11, %v1322_v57, %v1323_v54  ;;  %v1357_v54 = vsel %vm4091_vm11, %v1355_v47, %v1356_v48  ;;  %v1255_v57 = vld [vmem:[%s3507_s18 + $0x54] sm:$0xf] }
 0x119   : > { %893 = vst.msk [vmem:[#allocation2 + $0x4c] sm:$0xf] %vm873_vm8, %v804_v3 }
 0x11a   : > { %v824_v11 = vpop.permute.xlu2 %823 }
 0x11b   : > { %903 = vst.msk [vmem:[#allocation2 + $0x74] sm:$0xf] %vm873_vm8, %v824_v11 }
 0x11c   : > { %1147 = vrot.lane.b32.xlu0 %v1068_v5, %s3466_s21  ;;  %v1327_v5 = vsel %vm4091_vm11, %v1325_v60, %v1326_v56  ;;  %v1358_v56 = vrot.slane %v1356_v48, 4 }
 0x11e   : > { %1149 = vrot.lane.b32.xlu1 %v1071_v7, %s3466_s21  ;;  %v808_v13 = vpop.permute.xlu0 %807  ;;  %v1330_v7 = vsel %vm4091_vm11, %v1328_v63, %v1329_v1  ;;  %v1365_v63 = vrot.slane %v1255_v57, 7 }
 0x11f   : > { %895 = vst.msk [vmem:[#allocation2 + $0x54] sm:$0xf] %vm873_vm8, %v808_v13 }
 0x120   : > { %v810_v19 = vpop.permute.xlu1 %809  ;;  %1151 = vrot.lane.b32.xlu2 %v1074_v18, %s3466_s21 }
 0x121   : > { %896 = vst.msk [vmem:[#allocation2 + $0x58] sm:$0xf] %vm873_vm8, %v810_v19  ;;  %v1248_v19 = vld [vmem:[%s3507_s18 + $0x38] sm:$0xf] }
 0x122   : > { %v830_v27 = vpop.permute.xlu2 %829 }
 0x123   : > { %906 = vst.msk [vmem:[#allocation2 + $0x80] sm:$0xf] %vm873_vm8, %v830_v27 }
 0x124   : > { %1153 = vrot.lane.b32.xlu0 %v1077_v20, %s3466_s21  ;;  %v1336_v20 = vsel %vm4091_vm11, %v1334_v12, %v1335_v8  ;;  %v1367_v8 = vrot.slane %v1365_v63, 4 }
 0x126   : > { %1155 = vrot.lane.b32.xlu1 %v1080_v23, %s3466_s21  ;;  %v814_v29 = vpop.permute.xlu0 %813  ;;  %v1344_v23 = vrot.slane %v1248_v19, 7 }
 0x127   : > { %898 = vst.msk [vmem:[#allocation2 + $0x60] sm:$0xf] %vm873_vm8, %v814_v29 }
 0x128   : > { %v816_v33 = vpop.permute.xlu1 %815  ;;  %1157 = vrot.lane.b32.xlu2 %v1083_v32, %s3466_s21  ;;  %v1346_v31 = vrot.slane %v1344_v23, 4  ;;  %v1347_v32 = vrot.slane %v1249_v25, 7 }
 0x129   : > { %899 = vst.msk [vmem:[#allocation2 + $0x64] sm:$0xf] %vm873_vm8, %v816_v33  ;;  %v1342_v33 = vsel %vm4091_vm11, %v1340_v24, %v1341_v21  ;;  %v1261_v24 = vld [vmem:[%s3507_s18 + $0x6c] sm:$0xf] }
 0x12a   : > { %v836_v43 = vpop.permute.xlu2 %835  ;;  %v1348_v38 = vsel %vm4091_vm11, %v1346_v31, %v1347_v32  ;;  %v1349_v40 = vrot.slane %v1347_v32, 4  ;;  %v1383_v31 = vrot.slane %v1261_v24, 7 }
 0x12b   : > { %909 = vst.msk [vmem:[#allocation2 + $0x8c] sm:$0xf] %vm873_vm8, %v836_v43 }
 0x12c   : > { %1159 = vrot.lane.b32.xlu0 %v1086_v36, %s3466_s21  ;;  %v1345_v36 = vsel %vm4091_vm11, %v1343_v28, %v1344_v23  ;;  %v1376_v23 = vrot.slane %v1374_v15, 4 }
 0x12e   : > { %1161 = vrot.lane.b32.xlu1 %v1089_v37, %s3466_s21  ;;  %v820_v45 = vpop.permute.xlu0 %819  ;;  %v1350_v37 = vrot.slane %v1250_v30, 7 }
 0x12f   : > { %901 = vst.msk [vmem:[#allocation2 + $0x6c] sm:$0xf] %vm873_vm8, %v820_v45  ;;  %v1253_v45 = vld [vmem:[%s3507_s18 + $0x4c] sm:$0xf] }
 0x130   : > { %v822_v51 = vpop.permute.xlu1 %821  ;;  %1163 = vrot.lane.b32.xlu2 %v1092_v50, %s3466_s21  ;;  %v1352_v43 = vrot.slane %v1350_v37, 4  ;;  %v1351_v49 = vsel %vm4091_vm11, %v1349_v40, %v1350_v37  ;;  %v1264_v40 = vld [vmem:[%s3507_s18 + $0x78] sm:$0xf] }
 0x131   : > { %902 = vst.msk [vmem:[#allocation2 + $0x70] sm:$0xf] %vm873_vm8, %v822_v51  ;;  %v1254_v51 = vld [vmem:[%s3507_s18 + $0x50] sm:$0xf]  ;;  %v1392_v47 = vrot.slane %v1264_v40, 7 }
 0x132   : > { %v1098_v59 = vpop.permute.xlu2 %1097  ;;  %v1354_v52 = vsel %vm4091_vm11, %v1352_v43, %v1353_v39  ;;  %v1385_v39 = vrot.slane %v1383_v31, 4 }
 0x133   : > { %1204 = vst.msk [vmem:[#allocation2 + $0x8] sm:$0xf] %vm1201_vm12, %v1098_v59 }
 0x134   : > { %1424 = vrot.lane.b32.xlu0 %v1318_v53, %s3467_s22  ;;  %v1359_v53 = vrot.slane %v1253_v45, 7 }
 0x136   : > { %1426 = vrot.lane.b32.xlu1 %v1321_v55, %s3467_s22  ;;  %v826_v61 = vpop.permute.xlu0 %825  ;;  %v1362_v55 = vrot.slane %v1254_v51, 7  ;;  %v1361_v59 = vrot.slane %v1359_v53, 4  ;;  %v1360_v1 = vsel %vm4091_vm11, %v1358_v56, %v1359_v53  ;;  %v1267_v56 = vld [vmem:[%s3507_s18 + $0x84] sm:$0xf] }
 0x137   : > { %904 = vst.msk [vmem:[#allocation2 + $0x78] sm:$0xf] %vm873_vm8, %v826_v61  ;;  %v1256_v61 = vld [vmem:[%s3507_s18 + $0x58] sm:$0xf] }
 0x138   : > { %v828_v3 = vpop.permute.xlu1 %827  ;;  %1428 = vrot.lane.b32.xlu2 %v1324_v2, %s3467_s22  ;;  %v1364_v62 = vrot.slane %v1362_v55, 4  ;;  %v1363_v4 = vsel %vm4091_vm11, %v1361_v59, %v1362_v55  ;;  %v1394_v55 = vrot.slane %v1392_v47, 4 }
 0x139   : > { %905 = vst.msk [vmem:[#allocation2 + $0x7c] sm:$0xf] %vm873_vm8, %v828_v3  ;;  %v1257_v3 = vld [vmem:[%s3507_s18 + $0x5c] sm:$0xf] }
 0x13a   : > { %v1104_v11 = vpop.permute.xlu2 %1103  ;;  %v1366_v6 = vsel %vm4091_vm11, %v1364_v62, %v1365_v63  ;;  %v1401_v62 = vrot.slane %v1267_v56, 7 }
 0x13b   : > { %1207 = vst.msk [vmem:[#allocation2 + $0x14] sm:$0xf] %vm1201_vm12, %v1104_v11 }
 0x13c   : > { %1430 = vrot.lane.b32.xlu0 %v1327_v5, %s3467_s22  ;;  %v1368_v5 = vrot.slane %v1256_v61, 7 }
 0x13e   : > { %1432 = vrot.lane.b32.xlu1 %v1330_v7, %s3467_s22  ;;  %v832_v13 = vpop.permute.xlu0 %831  ;;  %v1371_v7 = vrot.slane %v1257_v3, 7  ;;  %v1370_v11 = vrot.slane %v1368_v5, 4  ;;  %v1369_v16 = vsel %vm4091_vm11, %v1367_v8, %v1368_v5  ;;  %v1270_v8 = vld [vmem:[%s3507_s18 + $0x90] sm:$0xf] }
 0x13f   : > { %907 = vst.msk [vmem:[#allocation2 + $0x84] sm:$0xf] %vm873_vm8, %v832_v13  ;;  %v1259_v13 = vld [vmem:[%s3507_s18 + $0x64] sm:$0xf] }
 0x140   : > { %v834_v18 = vpop.permute.xlu1 %833  ;;  %1434 = vrot.lane.b32.xlu2 %v1333_v17, %s3467_s22  ;;  %v1373_v14 = vrot.slane %v1371_v7, 4  ;;  %v1372_v19 = vsel %vm4091_vm11, %v1370_v11, %v1371_v7  ;;  %v1403_v7 = vrot.slane %v1401_v62, 4 }
 0x141   : > { %908 = vst.msk [vmem:[#allocation2 + $0x88] sm:$0xf] %vm873_vm8, %v834_v18  ;;  %v1260_v18 = vld [vmem:[%s3507_s18 + $0x68] sm:$0xf] }
 0x142   : > { %v1110_v27 = vpop.permute.xlu2 %1109  ;;  %v1375_v21 = vsel %vm4091_vm11, %v1373_v14, %v1374_v15  ;;  %v1410_v14 = vrot.slane %v1270_v8, 7  ;;  %v1584_v8 = vld [vmem:[%s3507_s18 + $0x50] sm:$0xf] }
 0x143   : > { %1210 = vst.msk [vmem:[#allocation2 + $0x20] sm:$0xf] %vm1201_vm12, %v1110_v27 }
 0x144   : > { %1436 = vrot.lane.b32.xlu0 %v1336_v20, %s3467_s22  ;;  %v1377_v20 = vrot.slane %v1259_v13, 7 }
 0x146   : > { %1438 = vrot.lane.b32.xlu1 %v1339_v22, %s3467_s22  ;;  %v1094_v29 = vpop.permute.xlu0 %1093  ;;  %v1380_v22 = vrot.slane %v1260_v18, 7  ;;  %v1379_v27 = vrot.slane %v1377_v20, 4  ;;  %v1378_v32 = vsel %vm4091_vm11, %v1376_v23, %v1377_v20  ;;  %v1273_v23 = vld [vmem:[%s3507_s18 + $0x9c] sm:$0xf] }
 0x147   : > { %1202 = vst.msk [vmem:[#allocation2] sm:$0xf] %vm1201_vm12, %v1094_v29  ;;  %v1262_v29 = vld [vmem:[%s3507_s18 + $0x70] sm:$0xf] }
 0x148   : > { %v1096_v34 = vpop.permute.xlu1 %1095  ;;  %1440 = vrot.lane.b32.xlu2 %v1342_v33, %s3467_s22  ;;  %v1382_v30 = vrot.slane %v1380_v22, 4  ;;  %v1381_v35 = vsel %vm4091_vm11, %v1379_v27, %v1380_v22  ;;  %v1412_v22 = vrot.slane %v1410_v14, 4 }
 0x149   : > { %1203 = vst.msk [vmem:[#allocation2 + $0x4] sm:$0xf] %vm1201_vm12, %v1096_v34  ;;  %v1263_v34 = vld [vmem:[%s3507_s18 + $0x74] sm:$0xf] }
 0x14a   : > { %v1116_v42 = vpop.permute.xlu2 %1115  ;;  %v1384_v37 = vsel %vm4091_vm11, %v1382_v30, %v1383_v31 }
 0x14b   : > { %1213 = vst.msk [vmem:[#allocation2 + $0x2c] sm:$0xf] %vm1201_vm12, %v1116_v42 }
 0x14c   : > { %1442 = vrot.lane.b32.xlu0 %v1345_v36, %s3467_s22  ;;  %v1386_v36 = vrot.slane %v1262_v29, 7  ;;  %v1419_v29 = vrot.slane %v1273_v23, 7 }
 0x14e   : > { %1444 = vrot.lane.b32.xlu1 %v1348_v38, %s3467_s22  ;;  %v1100_v44 = vpop.permute.xlu0 %1099  ;;  %v1389_v38 = vrot.slane %v1263_v34, 7  ;;  %v1388_v42 = vrot.slane %v1386_v36, 4  ;;  %v1387_v48 = vsel %vm4091_vm11, %v1385_v39, %v1386_v36 }
 0x14f   : > { %1205 = vst.msk [vmem:[#allocation2 + $0xc] sm:$0xf] %vm1201_vm12, %v1100_v44  ;;  %v1265_v44 = vld [vmem:[%s3507_s18 + $0x7c] sm:$0xf] }
 0x150   : > { %v1102_v50 = vpop.permute.xlu1 %1101  ;;  %1446 = vrot.lane.b32.xlu2 %v1351_v49, %s3467_s22  ;;  %v1391_v45 = vrot.slane %v1389_v38, 4  ;;  %v1390_v51 = vsel %vm4091_vm11, %v1388_v42, %v1389_v38  ;;  %v1570_v42 = vld [vmem:[%s3507_s18 + $0x18] sm:$0xf] }
 0x151   : > { %1206 = vst.msk [vmem:[#allocation2 + $0x10] sm:$0xf] %vm1201_vm12, %v1102_v50  ;;  %v1266_v50 = vld [vmem:[%s3507_s18 + $0x80] sm:$0xf] }
 0x152   : > { %v1122_v58 = vpop.permute.xlu2 %1121  ;;  %v1393_v53 = vsel %vm4091_vm11, %v1391_v45, %v1392_v47  ;;  %v1572_v47 = vld [vmem:[%s3507_s18 + $0x20] sm:$0xf] }
 0x153   : > { %1216 = vst.msk [vmem:[#allocation2 + $0x38] sm:$0xf] %vm1201_vm12, %v1122_v58 }
 0x154   : > { %1448 = vrot.lane.b32.xlu0 %v1354_v52, %s3467_s22  ;;  %v1395_v52 = vrot.slane %v1265_v44, 7  ;;  %v1571_v44 = vld [vmem:[%s3507_s18 + $0x1c] sm:$0xf] }
 0x156   : > { %1450 = vrot.lane.b32.xlu1 %v1357_v54, %s3467_s22  ;;  %v1106_v60 = vpop.permute.xlu0 %1105  ;;  %v1398_v54 = vrot.slane %v1266_v50, 7  ;;  %v1397_v58 = vrot.slane %v1395_v52, 4  ;;  %v1396_v63 = vsel %vm4091_vm11, %v1394_v55, %v1395_v52 }
 0x157   : > { %1208 = vst.msk [vmem:[#allocation2 + $0x18] sm:$0xf] %vm1201_vm12, %v1106_v60  ;;  %v1268_v60 = vld [vmem:[%s3507_s18 + $0x88] sm:$0xf] }
 0x158   : > { %v1108_v2 = vpop.permute.xlu1 %1107  ;;  %1452 = vrot.lane.b32.xlu2 %v1360_v1, %s3467_s22  ;;  %v1400_v61 = vrot.slane %v1398_v54, 4  ;;  %v1399_v3 = vsel %vm4091_vm11, %v1397_v58, %v1398_v54  ;;  %v1576_v54 = vld [vmem:[%s3507_s18 + $0x30] sm:$0xf] }
 0x159   : > { %1209 = vst.msk [vmem:[#allocation2 + $0x1c] sm:$0xf] %vm1201_vm12, %v1108_v2  ;;  %v1269_v2 = vld [vmem:[%s3507_s18 + $0x8c] sm:$0xf] }
 0x15a   : > { %v1128_v10 = vpop.permute.xlu2 %1127  ;;  %v1402_v5 = vsel %vm4091_vm11, %v1400_v61, %v1401_v62 }
 0x15b   : > { %1219 = vst.msk [vmem:[#allocation2 + $0x44] sm:$0xf] %vm1201_vm12, %v1128_v10 }
 0x15c   : > { %1454 = vrot.lane.b32.xlu0 %v1363_v4, %s3467_s22  ;;  %v1404_v4 = vrot.slane %v1268_v60, 7  ;;  %v1579_v60 = vld [vmem:[%s3507_s18 + $0x3c] sm:$0xf] }
 0x15e   : > { %1456 = vrot.lane.b32.xlu1 %v1366_v6, %s3467_s22  ;;  %v1112_v12 = vpop.permute.xlu0 %1111  ;;  %v1407_v6 = vrot.slane %v1269_v2, 7  ;;  %v1406_v10 = vrot.slane %v1404_v4, 4  ;;  %v1405_v15 = vsel %vm4091_vm11, %v1403_v7, %v1404_v4  ;;  %v1581_v2 = vld [vmem:[%s3507_s18 + $0x44] sm:$0xf] }
 0x15f   : > { %1211 = vst.msk [vmem:[#allocation2 + $0x24] sm:$0xf] %vm1201_vm12, %v1112_v12  ;;  %v1271_v12 = vld [vmem:[%s3507_s18 + $0x94] sm:$0xf] }
 0x160   : > { %v1114_v17 = vpop.permute.xlu1 %1113  ;;  %1458 = vrot.lane.b32.xlu2 %v1369_v16, %s3467_s22  ;;  %v1409_v13 = vrot.slane %v1407_v6, 4  ;;  %v1408_v18 = vsel %vm4091_vm11, %v1406_v10, %v1407_v6  ;;  %v1583_v6 = vld [vmem:[%s3507_s18 + $0x4c] sm:$0xf] }
 0x161   : > { %1212 = vst.msk [vmem:[#allocation2 + $0x28] sm:$0xf] %vm1201_vm12, %v1114_v17  ;;  %v1272_v17 = vld [vmem:[%s3507_s18 + $0x98] sm:$0xf] }
 0x162   : > { %v1134_v25 = vpop.permute.xlu2 %1133  ;;  %v1411_v20 = vsel %vm4091_vm11, %v1409_v13, %v1410_v14  ;;  %v1587_v14 = vld [vmem:[%s3507_s18 + $0x5c] sm:$0xf] }
 0x163   : > { %1222 = vst.msk [vmem:[#allocation2 + $0x50] sm:$0xf] %vm1201_vm12, %v1134_v25 }
 0x164   : > { %1460 = vrot.lane.b32.xlu0 %v1372_v19, %s3467_s22  ;;  %v1413_v19 = vrot.slane %v1271_v12, 7  ;;  %v1586_v12 = vld [vmem:[%s3507_s18 + $0x58] sm:$0xf] }
 0x166   : > { %1462 = vrot.lane.b32.xlu1 %v1375_v21, %s3467_s22  ;;  %v1118_v28 = vpop.permute.xlu0 %1117  ;;  %v1416_v21 = vrot.slane %v1272_v17, 7  ;;  %v1415_v25 = vrot.slane %v1413_v19, 4  ;;  %v1414_v30 = vsel %vm4091_vm11, %v1412_v22, %v1413_v19 }
 0x167   : > { %1214 = vst.msk [vmem:[#allocation2 + $0x30] sm:$0xf] %vm1201_vm12, %v1118_v28 }
 0x168   : > { %v1120_v33 = vpop.permute.xlu1 %1119  ;;  %1464 = vrot.lane.b32.xlu2 %v1378_v32, %s3467_s22  ;;  %v1418_v28 = vrot.slane %v1416_v21, 4  ;;  %v1274_v32 = vld [vmem:[%s3507_s18 + $0xa0] sm:$0x7] }
 0x169   : > { %1215 = vst.msk [vmem:[#allocation2 + $0x34] sm:$0xf] %vm1201_vm12, %v1120_v33  ;;  %v1417_v33 = vsel %vm4091_vm11, %v1415_v25, %v1416_v21  ;;  %v1422_v36 = vrot.slane %v1274_v32, 7  ;;  %v1591_v21 = vld [vmem:[%s3507_s18 + $0x6c] sm:$0xf] }
 0x16a   : > { %v1140_v41 = vpop.permute.xlu2 %1139  ;;  %v1420_v34 = vsel %vm4091_vm11, %v1418_v28, %v1419_v29  ;;  %v1594_v28 = vld [vmem:[%s3507_s18 + $0x78] sm:$0xf] }
 0x16b   : > { %1225 = vst.msk [vmem:[#allocation2 + $0x5c] sm:$0xf] %vm1201_vm12, %v1140_v41  ;;  %v1569_v41 = vld [vmem:[%s3507_s18 + $0x14] sm:$0xf] }
 0x16c   : > { %1466 = vrot.lane.b32.xlu0 %v1381_v35, %s3467_s22  ;;  %v1421_v35 = vrot.slane %v1419_v29, 4 }
 0x16e   : > { %1468 = vrot.lane.b32.xlu1 %v1384_v37, %s3467_s22  ;;  %v1124_v43 = vpop.permute.xlu0 %1123  ;;  %v1423_v39 = vsel %vm4091_vm11, %v1421_v35, %v1422_v36 }
 0x16f   : > { %1217 = vst.msk [vmem:[#allocation2 + $0x3c] sm:$0xf] %vm1201_vm12, %v1124_v43 }
 0x170   : > { %v1126_v49 = vpop.permute.xlu1 %1125  ;;  %1470 = vrot.lane.b32.xlu2 %v1387_v48, %s3467_s22  ;;  %v1573_v48 = vld [vmem:[%s3507_s18 + $0x24] sm:$0xf] }
 0x171   : > { %1218 = vst.msk [vmem:[#allocation2 + $0x40] sm:$0xf] %vm1201_vm12, %v1126_v49 }
 0x172   : > { %v1146_v57 = vpop.permute.xlu2 %1145 }
 0x173   : > { %1228 = vst.msk [vmem:[#allocation2 + $0x68] sm:$0xf] %vm1201_vm12, %v1146_v57  ;;  %v1577_v57 = vld [vmem:[%s3507_s18 + $0x34] sm:$0xf] }
 0x174   : > { %1472 = vrot.lane.b32.xlu0 %v1390_v51, %s3467_s22  ;;  %v1574_v51 = vld [vmem:[%s3507_s18 + $0x28] sm:$0xf] }
 0x176   : > { %1474 = vrot.lane.b32.xlu1 %v1393_v53, %s3467_s22  ;;  %v1130_v59 = vpop.permute.xlu0 %1129  ;;  %v1575_v53 = vld [vmem:[%s3507_s18 + $0x2c] sm:$0xf] }
 0x177   : > { %1220 = vst.msk [vmem:[#allocation2 + $0x48] sm:$0xf] %vm1201_vm12, %v1130_v59  ;;  %v1578_v59 = vld [vmem:[%s3507_s18 + $0x38] sm:$0xf] }
 0x178   : > { %v1132_v1 = vpop.permute.xlu1 %1131  ;;  %1476 = vrot.lane.b32.xlu2 %v1396_v63, %s3467_s22  ;;  %v1580_v63 = vld [vmem:[%s3507_s18 + $0x40] sm:$0xf] }
 0x179   : > { %1221 = vst.msk [vmem:[#allocation2 + $0x4c] sm:$0xf] %vm1201_vm12, %v1132_v1 }
 0x17a   : > { %v1152_v9 = vpop.permute.xlu2 %1151 }
 0x17b   : > { %1231 = vst.msk [vmem:[#allocation2 + $0x74] sm:$0xf] %vm1201_vm12, %v1152_v9  ;;  %v1585_v9 = vld [vmem:[%s3507_s18 + $0x54] sm:$0xf] }
 0x17c   : > { %1478 = vrot.lane.b32.xlu0 %v1399_v3, %s3467_s22  ;;  %v1582_v3 = vld [vmem:[%s3507_s18 + $0x48] sm:$0xf] }
 0x17e   : > { %1480 = vrot.lane.b32.xlu1 %v1402_v5, %s3467_s22  ;;  %v1136_v11 = vpop.permute.xlu0 %1135 }
 0x17f   : > { %1223 = vst.msk [vmem:[#allocation2 + $0x54] sm:$0xf] %vm1201_vm12, %v1136_v11 }
 0x180   : > { %v1138_v16 = vpop.permute.xlu1 %1137  ;;  %1482 = vrot.lane.b32.xlu2 %v1405_v15, %s3467_s22  ;;  %v1588_v15 = vld [vmem:[%s3507_s18 + $0x60] sm:$0xf] }
 0x181   : > { %1224 = vst.msk [vmem:[#allocation2 + $0x58] sm:$0xf] %vm1201_vm12, %v1138_v16 }
 0x182   : > { %v1158_v24 = vpop.permute.xlu2 %1157 }
 0x183   : > { %1234 = vst.msk [vmem:[#allocation2 + $0x80] sm:$0xf] %vm1201_vm12, %v1158_v24  ;;  %v1592_v24 = vld [vmem:[%s3507_s18 + $0x70] sm:$0xf] }
 0x184   : > { %1484 = vrot.lane.b32.xlu0 %v1408_v18, %s3467_s22  ;;  %v1589_v18 = vld [vmem:[%s3507_s18 + $0x64] sm:$0xf] }
 0x186   : > { %1486 = vrot.lane.b32.xlu1 %v1411_v20, %s3467_s22  ;;  %v1142_v27 = vpop.permute.xlu0 %1141  ;;  %v1590_v20 = vld [vmem:[%s3507_s18 + $0x68] sm:$0xf] }
 0x187   : > { %1226 = vst.msk [vmem:[#allocation2 + $0x60] sm:$0xf] %vm1201_vm12, %v1142_v27  ;;  %v1593_v27 = vld [vmem:[%s3507_s18 + $0x74] sm:$0xf] }
 0x188   : > { %v1144_v31 = vpop.permute.xlu1 %1143  ;;  %1488 = vrot.lane.b32.xlu2 %v1414_v30, %s3467_s22 }
 0x189   : > { %1227 = vst.msk [vmem:[#allocation2 + $0x64] sm:$0xf] %vm1201_vm12, %v1144_v31  ;;  %v1595_v31 = vld [vmem:[%s3507_s18 + $0x7c] sm:$0xf] }
 0x18a   : > { %v1164_v37 = vpop.permute.xlu2 %1163 }
 0x18b   : > { %1237 = vst.msk [vmem:[#allocation2 + $0x8c] sm:$0xf] %vm1201_vm12, %v1164_v37  ;;  %v1598_v37 = vld [vmem:[%s3507_s18 + $0x88] sm:$0xf] }
 0x18c   : > { %1490 = vrot.lane.b32.xlu0 %v1417_v33, %s3467_s22  ;;  %v1596_v33 = vld [vmem:[%s3507_s18 + $0x80] sm:$0xf] }
 0x18e   : > { %1492 = vrot.lane.b32.xlu1 %v1420_v34, %s3467_s22  ;;  %v1148_v38 = vpop.permute.xlu0 %1147  ;;  %v1597_v34 = vld [vmem:[%s3507_s18 + $0x84] sm:$0xf] }
 0x18f   : > { %1229 = vst.msk [vmem:[#allocation2 + $0x6c] sm:$0xf] %vm1201_vm12, %v1148_v38 }
 0x190   : > { %v1150_v40 = vpop.permute.xlu1 %1149  ;;  %1494 = vrot.lane.b32.xlu2 %v1423_v39, %s3467_s22  ;;  %v1599_v39 = vld [vmem:[%s3507_s18 + $0x8c] sm:$0xf] }
 0x191   : > { %1230 = vst.msk [vmem:[#allocation2 + $0x70] sm:$0xf] %vm1201_vm12, %v1150_v40  ;;  %v1600_v40 = vld [vmem:[%s3507_s18 + $0x90] sm:$0xf] }
 0x192   : > { %v1429_v43 = vpop.permute.xlu2 %1428 }
 0x193   : > { %1535 = vst.msk [vmem:[#allocation2 + $0x8] sm:$0xf] %vm1532_vm13, %v1429_v43  ;;  %v1601_v43 = vld [vmem:[%s3507_s18 + $0x94] sm:$0xf] }
 0x194   : > { %1641 = vrot.lane.b32.xlu0 %v1569_v41, %s3468_s23 }
 0x196   : > { %1643 = vrot.lane.b32.xlu1 %v1570_v42, %s3468_s23  ;;  %v1154_v46 = vpop.permute.xlu0 %1153 }
 0x197   : > { %1232 = vst.msk [vmem:[#allocation2 + $0x78] sm:$0xf] %vm1201_vm12, %v1154_v46 }
 0x198   : > { %v1156_v45 = vpop.permute.xlu1 %1155  ;;  %1645 = vrot.lane.b32.xlu2 %v1571_v44, %s3468_s23  ;;  %v1602_v44 = vld [vmem:[%s3507_s18 + $0x98] sm:$0xf] }
 0x199   : > { %1233 = vst.msk [vmem:[#allocation2 + $0x7c] sm:$0xf] %vm1201_vm12, %v1156_v45  ;;  %v1603_v45 = vld [vmem:[%s3507_s18 + $0x9c] sm:$0xf] }
 0x19a   : > { %v1435_v49 = vpop.permute.xlu2 %1434 }
 0x19b   : > { %1538 = vst.msk [vmem:[#allocation2 + $0x14] sm:$0xf] %vm1532_vm13, %v1435_v49  ;;  %v1604_v49 = vld [vmem:[%s3507_s18 + $0xa0] sm:$0xf] }
 0x19c   : > { %1647 = vrot.lane.b32.xlu0 %v1572_v47, %s3468_s23 }
 0x19e   : > { %1649 = vrot.lane.b32.xlu1 %v1573_v48, %s3468_s23  ;;  %v1160_v50 = vpop.permute.xlu0 %1159 }
 0x19f   : > { %1235 = vst.msk [vmem:[#allocation2 + $0x84] sm:$0xf] %vm1201_vm12, %v1160_v50 }
 0x1a0   : > { %v1162_v52 = vpop.permute.xlu1 %1161  ;;  %1651 = vrot.lane.b32.xlu2 %v1574_v51, %s3468_s23  ;;  %v1786_v51 = vld [vmem:[%s3507_s18 + $0x24] sm:$0xf] }
 0x1a1   : > { %1236 = vst.msk [vmem:[#allocation2 + $0x88] sm:$0xf] %vm1201_vm12, %v1162_v52  ;;  %v1787_v52 = vld [vmem:[%s3507_s18 + $0x28] sm:$0xf] }
 0x1a2   : > { %v1441_v55 = vpop.permute.xlu2 %1440 }
 0x1a3   : > { %1541 = vst.msk [vmem:[#allocation2 + $0x20] sm:$0xf] %vm1532_vm13, %v1441_v55  ;;  %v1788_v55 = vld [vmem:[%s3507_s18 + $0x2c] sm:$0xf] }
 0x1a4   : > { %1653 = vrot.lane.b32.xlu0 %v1575_v53, %s3468_s23 }
 0x1a6   : > { %1655 = vrot.lane.b32.xlu1 %v1576_v54, %s3468_s23  ;;  %v1425_v56 = vpop.permute.xlu0 %1424 }
 0x1a7   : > { %1533 = vst.msk [vmem:[#allocation2] sm:$0xf] %vm1532_vm13, %v1425_v56 }
 0x1a8   : > { %v1427_v58 = vpop.permute.xlu1 %1426  ;;  %1657 = vrot.lane.b32.xlu2 %v1577_v57, %s3468_s23  ;;  %v1789_v57 = vld [vmem:[%s3507_s18 + $0x30] sm:$0xf] }
 0x1a9   : > { %1534 = vst.msk [vmem:[#allocation2 + $0x4] sm:$0xf] %vm1532_vm13, %v1427_v58  ;;  %v1790_v58 = vld [vmem:[%s3507_s18 + $0x34] sm:$0xf] }
 0x1aa   : > { %v1447_v61 = vpop.permute.xlu2 %1446 }
 0x1ab   : > { %1544 = vst.msk [vmem:[#allocation2 + $0x2c] sm:$0xf] %vm1532_vm13, %v1447_v61  ;;  %v1791_v61 = vld [vmem:[%s3507_s18 + $0x38] sm:$0xf] }
 0x1ac   : > { %1659 = vrot.lane.b32.xlu0 %v1578_v59, %s3468_s23 }
 0x1ae   : > { %1661 = vrot.lane.b32.xlu1 %v1579_v60, %s3468_s23  ;;  %v1431_v62 = vpop.permute.xlu0 %1430 }
 0x1af   : > { %1536 = vst.msk [vmem:[#allocation2 + $0xc] sm:$0xf] %vm1532_vm13, %v1431_v62 }
 0x1b0   : > { %v1433_v1 = vpop.permute.xlu1 %1432  ;;  %1663 = vrot.lane.b32.xlu2 %v1580_v63, %s3468_s23  ;;  %v1792_v63 = vld [vmem:[%s3507_s18 + $0x3c] sm:$0xf] }
 0x1b1   : > { %1537 = vst.msk [vmem:[#allocation2 + $0x10] sm:$0xf] %vm1532_vm13, %v1433_v1  ;;  %v1793_v1 = vld [vmem:[%s3507_s18 + $0x40] sm:$0xf] }
 0x1b2   : > { %v1453_v4 = vpop.permute.xlu2 %1452 }
 0x1b3   : > { %1547 = vst.msk [vmem:[#allocation2 + $0x38] sm:$0xf] %vm1532_vm13, %v1453_v4  ;;  %v1794_v4 = vld [vmem:[%s3507_s18 + $0x44] sm:$0xf] }
 0x1b4   : > { %1665 = vrot.lane.b32.xlu0 %v1581_v2, %s3468_s23 }
 0x1b6   : > { %1667 = vrot.lane.b32.xlu1 %v1582_v3, %s3468_s23  ;;  %v1437_v5 = vpop.permute.xlu0 %1436 }
 0x1b7   : > { %1539 = vst.msk [vmem:[#allocation2 + $0x18] sm:$0xf] %vm1532_vm13, %v1437_v5 }
 0x1b8   : > { %v1439_v7 = vpop.permute.xlu1 %1438  ;;  %1669 = vrot.lane.b32.xlu2 %v1583_v6, %s3468_s23  ;;  %v1795_v6 = vld [vmem:[%s3507_s18 + $0x48] sm:$0xf] }
 0x1b9   : > { %1540 = vst.msk [vmem:[#allocation2 + $0x1c] sm:$0xf] %vm1532_vm13, %v1439_v7  ;;  %v1796_v7 = vld [vmem:[%s3507_s18 + $0x4c] sm:$0xf] }
 0x1ba   : > { %v1459_v10 = vpop.permute.xlu2 %1458 }
 0x1bb   : > { %1550 = vst.msk [vmem:[#allocation2 + $0x44] sm:$0xf] %vm1532_vm13, %v1459_v10  ;;  %v1797_v10 = vld [vmem:[%s3507_s18 + $0x50] sm:$0xf] }
 0x1bc   : > { %1671 = vrot.lane.b32.xlu0 %v1584_v8, %s3468_s23 }
 0x1be   : > { %1673 = vrot.lane.b32.xlu1 %v1585_v9, %s3468_s23  ;;  %v1443_v11 = vpop.permute.xlu0 %1442 }
 0x1bf   : > { %1542 = vst.msk [vmem:[#allocation2 + $0x24] sm:$0xf] %vm1532_vm13, %v1443_v11 }
 0x1c0   : > { %v1445_v13 = vpop.permute.xlu1 %1444  ;;  %1675 = vrot.lane.b32.xlu2 %v1586_v12, %s3468_s23  ;;  %v1798_v12 = vld [vmem:[%s3507_s18 + $0x54] sm:$0xf] }
 0x1c1   : > { %1543 = vst.msk [vmem:[#allocation2 + $0x28] sm:$0xf] %vm1532_vm13, %v1445_v13  ;;  %v1799_v13 = vld [vmem:[%s3507_s18 + $0x58] sm:$0xf] }
 0x1c2   : > { %v1465_v16 = vpop.permute.xlu2 %1464 }
 0x1c3   : > { %1553 = vst.msk [vmem:[#allocation2 + $0x50] sm:$0xf] %vm1532_vm13, %v1465_v16  ;;  %v1800_v16 = vld [vmem:[%s3507_s18 + $0x5c] sm:$0xf] }
 0x1c4   : > { %1677 = vrot.lane.b32.xlu0 %v1587_v14, %s3468_s23 }
 0x1c6   : > { %1679 = vrot.lane.b32.xlu1 %v1588_v15, %s3468_s23  ;;  %v1449_v17 = vpop.permute.xlu0 %1448 }
 0x1c7   : > { %1545 = vst.msk [vmem:[#allocation2 + $0x30] sm:$0xf] %vm1532_vm13, %v1449_v17 }
 0x1c8   : > { %v1451_v19 = vpop.permute.xlu1 %1450  ;;  %1681 = vrot.lane.b32.xlu2 %v1589_v18, %s3468_s23  ;;  %v1801_v18 = vld [vmem:[%s3507_s18 + $0x60] sm:$0xf] }
 0x1c9   : > { %1546 = vst.msk [vmem:[#allocation2 + $0x34] sm:$0xf] %vm1532_vm13, %v1451_v19  ;;  %v1802_v19 = vld [vmem:[%s3507_s18 + $0x64] sm:$0xf] }
 0x1ca   : > { %v1471_v22 = vpop.permute.xlu2 %1470 }
 0x1cb   : > { %1556 = vst.msk [vmem:[#allocation2 + $0x5c] sm:$0xf] %vm1532_vm13, %v1471_v22  ;;  %v1803_v22 = vld [vmem:[%s3507_s18 + $0x68] sm:$0xf] }
 0x1cc   : > { %1683 = vrot.lane.b32.xlu0 %v1590_v20, %s3468_s23 }
 0x1ce   : > { %1685 = vrot.lane.b32.xlu1 %v1591_v21, %s3468_s23  ;;  %v1455_v23 = vpop.permute.xlu0 %1454 }
 0x1cf   : > { %1548 = vst.msk [vmem:[#allocation2 + $0x3c] sm:$0xf] %vm1532_vm13, %v1455_v23 }
 0x1d0   : > { %v1457_v25 = vpop.permute.xlu1 %1456  ;;  %1687 = vrot.lane.b32.xlu2 %v1592_v24, %s3468_s23  ;;  %v4439_v24 = vld [vmem:[%s3507_s18 + $0x74] sm:$0xf] }
 0x1d1   : > { %1549 = vst.msk [vmem:[#allocation2 + $0x40] sm:$0xf] %vm1532_vm13, %v1457_v25  ;;  %v1804_v25 = vld [vmem:[%s3507_s18 + $0x6c] sm:$0xf] }
 0x1d2   : > { %v1477_v29 = vpop.permute.xlu2 %1476 }
 0x1d3   : > { %1559 = vst.msk [vmem:[#allocation2 + $0x68] sm:$0xf] %vm1532_vm13, %v1477_v29  ;;  %v2024_v29 = vld [vmem:[%s3507_s18 + $0x78] sm:$0xf] }
 0x1d4   : > { %1689 = vrot.lane.b32.xlu0 %v1593_v27, %s3468_s23  ;;  %v1805_v27 = vld [vmem:[%s3507_s18 + $0x70] sm:$0xf] }
 0x1d6   : > { %1691 = vrot.lane.b32.xlu1 %v1594_v28, %s3468_s23  ;;  %v1461_v30 = vpop.permute.xlu0 %1460  ;;  %v2136_v28 = vrot.slane %v4439_v24, 5 }
 0x1d7   : > { %1551 = vst.msk [vmem:[#allocation2 + $0x48] sm:$0xf] %vm1532_vm13, %v1461_v30 }
 0x1d8   : > { %v1463_v32 = vpop.permute.xlu1 %1462  ;;  %1693 = vrot.lane.b32.xlu2 %v1595_v31, %s3468_s23 }
 0x1d9   : > { %1552 = vst.msk [vmem:[#allocation2 + $0x4c] sm:$0xf] %vm1532_vm13, %v1463_v32  ;;  %v4451_v32 = vld [vmem:[%s3507_s18 + $0x74] sm:$0xf] }
 0x1da   : > { %v1483_v35 = vpop.permute.xlu2 %1482 }
 0x1db   : > { %1562 = vst.msk [vmem:[#allocation2 + $0x74] sm:$0xf] %vm1532_vm13, %v1483_v35  ;;  %v1806_v35 = vld [vmem:[%s3507_s18 + $0x74] sm:$0xf] }
 0x1dc   : > { %1695 = vrot.lane.b32.xlu0 %v1596_v33, %s3468_s23  ;;  %v2138_v33 = vrot.slane %v2136_v28, 4 }
 0x1de   : > { %1697 = vrot.lane.b32.xlu1 %v1597_v34, %s3468_s23  ;;  %v1467_v36 = vpop.permute.xlu0 %1466  ;;  %v2139_v34 = vrot.slane %v2024_v29, 5 }
 0x1df   : > { %1554 = vst.msk [vmem:[#allocation2 + $0x54] sm:$0xf] %vm1532_vm13, %v1467_v36 }
 0x1e0   : > { %v1469_v38 = vpop.permute.xlu1 %1468  ;;  %1699 = vrot.lane.b32.xlu2 %v1598_v37, %s3468_s23  ;;  %v2352_v37 = vld [vmem:[%s3507_s18 + $0x78] sm:$0xf] }
 0x1e1   : > { %1555 = vst.msk [vmem:[#allocation2 + $0x58] sm:$0xf] %vm1532_vm13, %v1469_v38  ;;  %v4459_v38 = vld [vmem:[%s3507_s18 + $0x7c] sm:$0xf] }
 0x1e2   : > { %v1489_v41 = vpop.permute.xlu2 %1488 }
 0x1e3   : > { %1565 = vst.msk [vmem:[#allocation2 + $0x80] sm:$0xf] %vm1532_vm13, %v1489_v41  ;;  %v2140_v41 = vsel %vm3509_vm2, %v2138_v33, %v2139_v34  ;;  %v4544_v33 = vld [vmem:[%s3507_s18 + $0x54] sm:$0xf] }
 0x1e4   : > { %1701 = vrot.lane.b32.xlu0 %v1599_v39, %s3468_s23  ;;  %v1807_v39 = vld [vmem:[%s3507_s18 + $0x78] sm:$0xf] }
 0x1e6   : > { %1703 = vrot.lane.b32.xlu1 %v1600_v40, %s3468_s23  ;;  %v1473_v42 = vpop.permute.xlu0 %1472  ;;  %v2464_v40 = vrot.slane %v4451_v32, 6 }
 0x1e7   : > { %1557 = vst.msk [vmem:[#allocation2 + $0x60] sm:$0xf] %vm1532_vm13, %v1473_v42  ;;  %v2467_v42 = vrot.slane %v2352_v37, 6 }
 0x1e8   : > { %v1475_v46 = vpop.permute.xlu1 %1474  ;;  %1705 = vrot.lane.b32.xlu2 %v1601_v43, %s3468_s23  ;;  %v2141_v43 = vrot.slane %v2139_v34, 4 }
 0x1e9   : > { %1558 = vst.msk [vmem:[#allocation2 + $0x64] sm:$0xf] %vm1532_vm13, %v1475_v46  ;;  %v2142_v46 = vrot.slane %v4459_v38, 5 }
 0x1ea   : > { %v1495_v47 = vpop.permute.xlu2 %1494 }
 0x1eb   : > { %1568 = vst.msk [vmem:[#allocation2 + $0x8c] sm:$0xf] %vm1532_vm13, %v1495_v47  ;;  %v2466_v47 = vrot.slane %v2464_v40, 4 }
 0x1ec   : > { %1707 = vrot.lane.b32.xlu0 %v1602_v44, %s3468_s23  ;;  %v4470_v44 = vld [vmem:[%s3507_s18 + $0x7c] sm:$0xf] }
 0x1ee   : > { %1709 = vrot.lane.b32.xlu1 %v1603_v45, %s3468_s23  ;;  %v1479_v48 = vpop.permute.xlu0 %1478 }
 0x1ef   : > { %1560 = vst.msk [vmem:[#allocation2 + $0x6c] sm:$0xf] %vm1532_vm13, %v1479_v48 }
 0x1f0   : > { %v1481_v50 = vpop.permute.xlu1 %1480  ;;  %1711 = vrot.lane.b32.xlu2 %v1604_v49, %s3468_s23  ;;  %v2004_v49 = vld [vmem:[%s3507_s18 + $0x28] sm:$0xf] }
 0x1f1   : > { %1561 = vst.msk [vmem:[#allocation2 + $0x70] sm:$0xf] %vm1532_vm13, %v1481_v50  ;;  %v2469_v50 = vrot.slane %v2467_v42, 4 }
 0x1f2   : > { %v1646_v53 = vpop.permute.xlu2 %1645 }
 0x1f3   : > { %1752 = vst.msk [vmem:[#allocation2 + $0x8] sm:$0xf] %vm1749_vm14, %v1646_v53 }
 0x1f4   : > { %1858 = vrot.lane.b32.xlu0 %v1786_v51, %s3469_s24  ;;  %v2470_v51 = vrot.slane %v4470_v44, 6 }
 0x1f6   : > { %1860 = vrot.lane.b32.xlu1 %v1787_v52, %s3469_s24  ;;  %v1485_v54 = vpop.permute.xlu0 %1484  ;;  %v2143_v52 = vsel %vm3509_vm2, %v2141_v43, %v2142_v46 }
 0x1f7   : > { %1563 = vst.msk [vmem:[#allocation2 + $0x78] sm:$0xf] %vm1532_vm13, %v1485_v54  ;;  %v4484_v54 = vld [vmem:[%s3507_s18 + $0x4c] sm:$0xf] }
 0x1f8   : > { %v1487_v56 = vpop.permute.xlu1 %1486  ;;  %1862 = vrot.lane.b32.xlu2 %v1788_v55, %s3469_s24  ;;  %v2003_v55 = vld [vmem:[%s3507_s18 + $0x24] sm:$0xe] }
 0x1f9   : > { %1564 = vst.msk [vmem:[#allocation2 + $0x7c] sm:$0xf] %vm1532_vm13, %v1487_v56  ;;  %v2468_v56 = vsel %vm3664_vm6, %v2466_v47, %v2467_v42 }
 0x1fa   : > { %v1652_v59 = vpop.permute.xlu2 %1651 }
 0x1fb   : > { %1755 = vst.msk [vmem:[#allocation2 + $0x14] sm:$0xf] %vm1749_vm14, %v1652_v59  ;;  %v2471_v59 = vsel %vm3664_vm6, %v2469_v50, %v2470_v51  ;;  %v4570_v50 = vld [vmem:[%s3507_s18 + $0x84] sm:$0xf] }
 0x1fc   : > { %1864 = vrot.lane.b32.xlu0 %v1789_v57, %s3469_s24  ;;  %v2079_v57 = vrot.slane %v2004_v49, 5 }
 0x1fe   : > { %1866 = vrot.lane.b32.xlu1 %v1790_v58, %s3469_s24  ;;  %v1491_v60 = vpop.permute.xlu0 %1490  ;;  %v4491_v58 = vld [vmem:[%s3507_s18 + $0x2c] sm:$0xf] }
 0x1ff   : > { %1566 = vst.msk [vmem:[#allocation2 + $0x84] sm:$0xf] %vm1532_vm13, %v1491_v60  ;;  %v2106_v60 = vrot.slane %v4484_v54, 5 }
 0x200   : > { %v1493_v62 = vpop.permute.xlu1 %1492  ;;  %1868 = vrot.lane.b32.xlu2 %v1791_v61, %s3469_s24  ;;  %v3274_v61 = vrot.slane %v2003_v55, 9 }
 0x201   : > { %1567 = vst.msk [vmem:[#allocation2 + $0x88] sm:$0xf] %vm1532_vm13, %v1493_v62  ;;  %v2014_v62 = vld [vmem:[%s3507_s18 + $0x50] sm:$0xf] }
 0x202   : > { %v1658_v2 = vpop.permute.xlu2 %1657 }
 0x203   : > { %1758 = vst.msk [vmem:[#allocation2 + $0x20] sm:$0xf] %vm1749_vm14, %v1658_v2  ;;  %v2082_v2 = vrot.slane %v4491_v58, 5 }
 0x204   : > { %1870 = vrot.lane.b32.xlu0 %v1792_v63, %s3469_s24 }
 0x205   : > { %v2084_v44 = vrot.slane %v2082_v2, 4 }
 0x206   : > { %1872 = vrot.lane.b32.xlu1 %v1793_v1, %s3469_s24  ;;  %v1642_v3 = vpop.permute.xlu0 %1641  ;;  %v2081_v1 = vrot.slane %v2079_v57, 4 }
 0x207   : > { %1750 = vst.msk [vmem:[#allocation2] sm:$0xf] %vm1749_vm14, %v1642_v3 }
 0x208   : > { %v1644_v5 = vpop.permute.xlu1 %1643  ;;  %1874 = vrot.lane.b32.xlu2 %v1794_v4, %s3469_s24  ;;  %v2108_v4 = vrot.slane %v2106_v60, 4 }
 0x209   : > { %1751 = vst.msk [vmem:[#allocation2 + $0x4] sm:$0xf] %vm1749_vm14, %v1644_v5  ;;  %v2109_v5 = vrot.slane %v2014_v62, 5 }
 0x20a   : > { %v1664_v8 = vpop.permute.xlu2 %1663 }
 0x20b   : > { %1761 = vst.msk [vmem:[#allocation2 + $0x2c] sm:$0xf] %vm1749_vm14, %v1664_v8  ;;  %v2332_v8 = vld [vmem:[%s3507_s18 + $0x28] sm:$0xf] }
 0x20c   : > { %1876 = vrot.lane.b32.xlu0 %v1795_v6, %s3469_s24  ;;  %v2080_v6 = vsel %vm3509_vm2, %v3274_v61, %v2079_v57  ;;  %v1809_v61 = vld [vmem:[%s3507_s18 + $0x80] sm:$0xf] }
 0x20e   : > { %1878 = vrot.lane.b32.xlu1 %v1796_v7, %s3469_s24  ;;  %v1648_v9 = vpop.permute.xlu0 %1647 }
 0x20f   : > { %1753 = vst.msk [vmem:[#allocation2 + $0xc] sm:$0xf] %vm1749_vm14, %v1648_v9  ;;  %v4511_v9 = vld [vmem:[%s3507_s18 + $0x54] sm:$0xf] }
 0x210   : > { %v1650_v11 = vpop.permute.xlu1 %1649  ;;  %1880 = vrot.lane.b32.xlu2 %v1797_v10, %s3469_s24  ;;  %v2083_v10 = vsel %vm3509_vm2, %v2081_v1, %v2082_v2 }
 0x211   : > { %1754 = vst.msk [vmem:[#allocation2 + $0x10] sm:$0xf] %vm1749_vm14, %v1650_v11  ;;  %v2331_v11 = vld [vmem:[%s3507_s18 + $0x24] sm:$0xc] }
 0x212   : > { %v1670_v14 = vpop.permute.xlu2 %1669 }
 0x213   : > { %1764 = vst.msk [vmem:[#allocation2 + $0x38] sm:$0xf] %vm1749_vm14, %v1670_v14  ;;  %v2111_v14 = vrot.slane %v2109_v5, 4 }
 0x214   : > { %1882 = vrot.lane.b32.xlu0 %v1798_v12, %s3469_s24  ;;  %v2110_v12 = vsel %vm3509_vm2, %v2108_v4, %v2109_v5  ;;  %v2006_v4 = vld [vmem:[%s3507_s18 + $0x30] sm:$0xf] }
 0x216   : > { %1884 = vrot.lane.b32.xlu1 %v1799_v13, %s3469_s24  ;;  %v1654_v15 = vpop.permute.xlu0 %1653  ;;  %v2407_v13 = vrot.slane %v2332_v8, 6 }
 0x217   : > { %1756 = vst.msk [vmem:[#allocation2 + $0x18] sm:$0xf] %vm1749_vm14, %v1654_v15  ;;  %v2112_v15 = vrot.slane %v4511_v9, 5 }
 0x218   : > { %v1656_v17 = vpop.permute.xlu1 %1655  ;;  %1886 = vrot.lane.b32.xlu2 %v1800_v16, %s3469_s24  ;;  %v4525_v16 = vld [vmem:[%s3507_s18 + $0x2c] sm:$0xf] }
 0x219   : > { %1757 = vst.msk [vmem:[#allocation2 + $0x1c] sm:$0xf] %vm1749_vm14, %v1656_v17 }
 0x21a   : > { %v1676_v20 = vpop.permute.xlu2 %1675 }
 0x21b   : > { %1767 = vst.msk [vmem:[#allocation2 + $0x44] sm:$0xf] %vm1749_vm14, %v1676_v20 }
 0x21c   : > { %1888 = vrot.lane.b32.xlu0 %v1801_v18, %s3469_s24  ;;  %v4528_v18 = vld [vmem:[%s3507_s18 + $0x4c] sm:$0xf] }
 0x21e   : > { %1890 = vrot.lane.b32.xlu1 %v1802_v19, %s3469_s24  ;;  %v1660_v21 = vpop.permute.xlu0 %1659  ;;  %v3275_v19 = vrot.slane %v2331_v11, 10 }
 0x21f   : > { %1759 = vst.msk [vmem:[#allocation2 + $0x24] sm:$0xf] %vm1749_vm14, %v1660_v21  ;;  %v2342_v21 = vld [vmem:[%s3507_s18 + $0x50] sm:$0xf] }
 0x220   : > { %v1662_v23 = vpop.permute.xlu1 %1661  ;;  %1892 = vrot.lane.b32.xlu2 %v1803_v22, %s3469_s24  ;;  %v2409_v22 = vrot.slane %v2407_v13, 4 }
 0x221   : > { %1760 = vst.msk [vmem:[#allocation2 + $0x28] sm:$0xf] %vm1749_vm14, %v1662_v23  ;;  %v2410_v23 = vrot.slane %v4525_v16, 6 }
 0x222   : > { %v1682_v30 = vpop.permute.xlu2 %1681 }
 0x223   : > { %1770 = vst.msk [vmem:[#allocation2 + $0x50] sm:$0xf] %vm1749_vm14, %v1682_v30  ;;  %v2408_v30 = vsel %vm3664_vm6, %v3275_v19, %v2407_v13  ;;  %v2411_v34 = vsel %vm3664_vm6, %v2409_v22, %v2410_v23  ;;  %v4605_v13 = vld [vmem:[%s3507_s18 + $0x34] sm:$0xf]  ;;  %v2114_v22 = vrot.slane %v2112_v15, 4 }
 0x224   : > { %1894 = vrot.lane.b32.xlu0 %v1804_v25, %s3469_s24  ;;  %v2113_v25 = vsel %vm3509_vm2, %v2111_v14, %v2112_v15  ;;  %v2088_v19 = vrot.slane %v4605_v13, 5 }
 0x226   : > { %1896 = vrot.lane.b32.xlu1 %v1805_v27, %s3469_s24  ;;  %v1666_v31 = vpop.permute.xlu0 %1665  ;;  %v2434_v27 = vrot.slane %v4528_v18, 6 }
 0x227   : > { %1762 = vst.msk [vmem:[#allocation2 + $0x30] sm:$0xf] %vm1749_vm14, %v1666_v31  ;;  %v2437_v31 = vrot.slane %v2342_v21, 6 }
 0x228   : > { %v1668_v36 = vpop.permute.xlu1 %1667  ;;  %1898 = vrot.lane.b32.xlu2 %v1806_v35, %s3469_s24  ;;  %v2436_v35 = vrot.slane %v2434_v27, 4 }
 0x229   : > { %1763 = vst.msk [vmem:[#allocation2 + $0x34] sm:$0xf] %vm1749_vm14, %v1668_v36  ;;  %v2439_v37 = vrot.slane %v2437_v31, 4 }
 0x22a   : > { %v1688_v45 = vpop.permute.xlu2 %1687  ;;  %v2438_v42 = vsel %vm3664_vm6, %v2436_v35, %v2437_v31 }
 0x22b   : > { %1773 = vst.msk [vmem:[#allocation2 + $0x5c] sm:$0xf] %vm1749_vm14, %v1688_v45  ;;  %v2026_v45 = vld [vmem:[%s3507_s18 + $0x80] sm:$0xf] }
 0x22c   : > { %1900 = vrot.lane.b32.xlu0 %v1807_v39, %s3469_s24  ;;  %v2440_v39 = vrot.slane %v4544_v33, 6  ;;  %v2145_v49 = vrot.slane %v2026_v45, 5 }
 0x22e   : > { %2226 = vrot.lane.b32.xlu1 %v2140_v41, %s3470_s25  ;;  %v1672_v48 = vpop.permute.xlu0 %1671  ;;  %v2441_v47 = vsel %vm3664_vm6, %v2439_v37, %v2440_v39  ;;  %v2147_v57 = vrot.slane %v2145_v49, 4 }
 0x22f   : > { %1765 = vst.msk [vmem:[#allocation2 + $0x3c] sm:$0xf] %vm1749_vm14, %v1672_v48  ;;  %v1808_v48 = vld [vmem:[%s3507_s18 + $0x7c] sm:$0xf] }
 0x230   : > { %v1674_v53 = vpop.permute.xlu1 %1673  ;;  %2228 = vrot.lane.b32.xlu2 %v2143_v52, %s3470_s25 }
 0x231   : > { %1766 = vst.msk [vmem:[#allocation2 + $0x40] sm:$0xf] %vm1749_vm14, %v1674_v53  ;;  %v2144_v53 = vrot.slane %v2142_v46, 4 }
 0x232   : > { %v1694_v63 = vpop.permute.xlu2 %1693 }
 0x233   : > { %1776 = vst.msk [vmem:[#allocation2 + $0x68] sm:$0xf] %vm1749_vm14, %v1694_v63  ;;  %v2146_v38 = vsel %vm3509_vm2, %v2144_v53, %v2145_v49  ;;  %v4584_v63 = vld [vmem:[%s3507_s18 + $0x84] sm:$0xf]  ;;  %v2442_v49 = vrot.slane %v2440_v39, 4 }
 0x234   : > { %2554 = vrot.lane.b32.xlu0 %v2468_v56, %s3471_s26  ;;  %v2354_v56 = vld [vmem:[%s3507_s18 + $0x80] sm:$0xf]  ;;  %v4655_v53 = vld [vmem:[%s3507_s18 + $0x5c] sm:$0xf] }
 0x235   : > { %v2473_v46 = vrot.slane %v2354_v56, 6  ;;  %v2446_v56 = vrot.slane %v4655_v53, 6 }
 0x236   : > { %2556 = vrot.lane.b32.xlu1 %v2471_v59, %s3471_s26  ;;  %v1678_v3 = vpop.permute.xlu0 %1677  ;;  %v2148_v59 = vrot.slane %v4570_v50, 5 }
 0x237   : > { %1768 = vst.msk [vmem:[#allocation2 + $0x48] sm:$0xf] %vm1749_vm14, %v1678_v3  ;;  %v2472_v3 = vrot.slane %v2470_v51, 4 }
 0x238   : > { %v1680_v7 = vpop.permute.xlu1 %1679  ;;  %2186 = vrot.lane.b32.xlu2 %v2080_v6, %s3470_s25  ;;  %v2149_v1 = vsel %vm3509_vm2, %v2147_v57, %v2148_v59  ;;  %v2475_v6 = vrot.slane %v2473_v46, 4 }
 0x239   : > { %1769 = vst.msk [vmem:[#allocation2 + $0x4c] sm:$0xf] %vm1749_vm14, %v1680_v7  ;;  %v2476_v7 = vrot.slane %v4584_v63, 6  ;;  %v2474_v51 = vsel %vm3664_vm6, %v2472_v3, %v2473_v46 }
 0x23a   : > { %v1700_v17 = vpop.permute.xlu2 %1699 }
 0x23b   : > { %1779 = vst.msk [vmem:[#allocation2 + $0x74] sm:$0xf] %vm1749_vm14, %v1700_v17  ;;  %v2477_v14 = vsel %vm3664_vm6, %v2475_v6, %v2476_v7  ;;  %v2478_v50 = vrot.slane %v2476_v7, 4  ;;  %v3428_v7 = vld [vmem:[%s5325_s1 + $0x8] sm:$0xff] }
 0x23c   : > { %2188 = vrot.lane.b32.xlu0 %v2083_v10, %s3470_s25  ;;  %v2085_v10 = vrot.slane %v2006_v4, 5  ;;  %v4680_v4 = vld [vmem:[%s3507_s18 + $0x9c] sm:$0xf] }
 0x23e   : > { %2206 = vrot.lane.b32.xlu1 %v2110_v12, %s3470_s25  ;;  %v1684_v20 = vpop.permute.xlu0 %1683  ;;  %v2016_v12 = vld [vmem:[%s3507_s18 + $0x58] sm:$0xf]  ;;  %v2086_v58 = vsel %vm3509_vm2, %v2084_v44, %v2085_v10  ;;  %v2087_v17 = vrot.slane %v2085_v10, 4  ;;  %v1817_v44 = vld [vmem:[%s3507_s18 + $0xa0] sm:$0xf]  ;;  %v2494_v10 = vrot.slane %v4680_v4, 6 }
 0x23f   : > { %1771 = vst.msk [vmem:[#allocation2 + $0x54] sm:$0xf] %vm1749_vm14, %v1684_v20  ;;  %v2115_v2 = vrot.slane %v2016_v12, 5  ;;  %v4618_v20 = vld [vmem:[%s3507_s18 + $0x5c] sm:$0xf] }
 0x240   : > { %v1686_v29 = vpop.permute.xlu1 %1685  ;;  %2208 = vrot.lane.b32.xlu2 %v2113_v25, %s3470_s25  ;;  %v2118_v31 = vrot.slane %v4618_v20, 5 }
 0x241   : > { %1772 = vst.msk [vmem:[#allocation2 + $0x58] sm:$0xf] %vm1749_vm14, %v1686_v29  ;;  %v2334_v29 = vld [vmem:[%s3507_s18 + $0x30] sm:$0xf]  ;;  %v2116_v9 = vsel %vm3509_vm2, %v2114_v22, %v2115_v2 }
 0x242   : > { %v1706_v36 = vpop.permute.xlu2 %1705  ;;  %v2413_v15 = vrot.slane %v2334_v29, 6  ;;  %v4703_v29 = vld [vmem:[%s3507_s18 + $0xa4] sm:$0xf] }
 0x243   : > { %1782 = vst.msk [vmem:[#allocation2 + $0x80] sm:$0xf] %vm1749_vm14, %v1706_v36  ;;  %v4635_v36 = vld [vmem:[%s3507_s18 + $0x34] sm:$0xf] }
 0x244   : > { %2514 = vrot.lane.b32.xlu0 %v2408_v30, %s3471_s26  ;;  %v2117_v30 = vrot.slane %v2115_v2, 4  ;;  %v2415_v45 = vrot.slane %v2413_v15, 4 }
 0x246   : > { %2516 = vrot.lane.b32.xlu1 %v2411_v34, %s3471_s26  ;;  %v1690_v41 = vpop.permute.xlu0 %1689  ;;  %v2089_v34 = vsel %vm3509_vm2, %v2087_v17, %v2088_v19  ;;  %v2119_v37 = vsel %vm3509_vm2, %v2117_v30, %v2118_v31  ;;  %v2496_v17 = vrot.slane %v2494_v10, 4 }
 0x247   : > { %1774 = vst.msk [vmem:[#allocation2 + $0x60] sm:$0xf] %vm1749_vm14, %v1690_v41  ;;  %v2412_v41 = vrot.slane %v2410_v23, 4 }
 0x248   : > { %v1692_v43 = vpop.permute.xlu1 %1691  ;;  %2534 = vrot.lane.b32.xlu2 %v2438_v42, %s3471_s26  ;;  %v2344_v42 = vld [vmem:[%s3507_s18 + $0x58] sm:$0xf] }
 0x249   : > { %1775 = vst.msk [vmem:[#allocation2 + $0x64] sm:$0xf] %vm1749_vm14, %v1692_v43  ;;  %v2443_v16 = vrot.slane %v2344_v42, 6  ;;  %v2414_v23 = vsel %vm3664_vm6, %v2412_v41, %v2413_v15  ;;  %v2028_v41 = vld [vmem:[%s3507_s18 + $0x88] sm:$0xf] }
 0x24a   : > { %v1712_v52 = vpop.permute.xlu2 %1711 }
 0x24b   : > { %1785 = vst.msk [vmem:[#allocation2 + $0x8c] sm:$0xf] %vm1749_vm14, %v1712_v52  ;;  %v2444_v33 = vsel %vm3664_vm6, %v2442_v49, %v2443_v16  ;;  %v2445_v39 = vrot.slane %v2443_v16, 4  ;;  %v2699_v49 = vld [vmem:[%s5325_s1 + $0x10] sm:$0x3] }
 0x24c   : > { %2536 = vrot.lane.b32.xlu0 %v2441_v47, %s3471_s26  ;;  %v2416_v47 = vrot.slane %v4635_v36, 6  ;;  %v4729_v16 = vld [vmem:[%s3507_s18 + $0x8c] sm:$0xf] }
 0x24d   : > { %v2447_v46 = vsel %vm3664_vm6, %v2445_v39, %v2446_v56 }
 0x24e   : > { %1902 = vrot.lane.b32.xlu1 %v1808_v48, %s3469_s24  ;;  %v1696_v55 = vpop.permute.xlu0 %1695  ;;  %v2418_v20 = vrot.slane %v2416_v47, 4 }
 0x24f   : > { %1777 = vst.msk [vmem:[#allocation2 + $0x6c] sm:$0xf] %vm1749_vm14, %v1696_v55  ;;  %v2417_v55 = vsel %vm3664_vm6, %v2415_v45, %v2416_v47  ;;  %v1810_v45 = vld [vmem:[%s3507_s18 + $0x84] sm:$0xf] }
 0x250   : > { %v1698_v62 = vpop.permute.xlu1 %1697  ;;  %1904 = vrot.lane.b32.xlu2 %v1809_v61, %s3469_s24  ;;  %v4668_v61 = vld [vmem:[%s3507_s18 + $0x9c] sm:$0xf] }
 0x251   : > { %1778 = vst.msk [vmem:[#allocation2 + $0x70] sm:$0xf] %vm1749_vm14, %v1698_v62 }
 0x252   : > { %v1863_v5 = vpop.permute.xlu2 %1862 }
 0x253   : > { %1969 = vst.msk [vmem:[#allocation2 + $0x8] sm:$0xf] %vm1966_vm15, %v1863_v5  ;;  %v1816_v5 = vld [vmem:[%s3507_s18 + $0x9c] sm:$0xf] }
 0x254   : > { %2230 = vrot.lane.b32.xlu0 %v2146_v38, %s3470_s25  ;;  %v2034_v38 = vld [vmem:[%s3507_s18 + $0xa0] sm:$0xf] }
 0x255   : > { %v2169_v6 = vrot.slane %v2034_v38, 5  ;;  %v2154_v38 = vrot.slane %v4729_v16, 5 }
 0x256   : > { %2232 = vrot.lane.b32.xlu1 %v2149_v1, %s3470_s25  ;;  %v1702_v8 = vpop.permute.xlu0 %1701  ;;  %v2166_v1 = vrot.slane %v4668_v61, 5 }
 0x257   : > { %1780 = vst.msk [vmem:[#allocation2 + $0x78] sm:$0xf] %vm1749_vm14, %v1702_v8  ;;  %v4685_v8 = vld [vmem:[%s3507_s18 + $0xa4] sm:$0xf] }
 0x258   : > { %v1704_v11 = vpop.permute.xlu1 %1703  ;;  %2558 = vrot.lane.b32.xlu2 %v2474_v51, %s3471_s26  ;;  %v2168_v51 = vrot.slane %v2166_v1, 4 }
 0x259   : > { %1781 = vst.msk [vmem:[#allocation2 + $0x7c] sm:$0xf] %vm1749_vm14, %v1704_v11  ;;  %v2362_v11 = vld [vmem:[%s3507_s18 + $0xa0] sm:$0xf] }
 0x25a   : > { %v1869_v21 = vpop.permute.xlu2 %1868  ;;  %v2170_v22 = vsel %vm3509_vm2, %v2168_v51, %v2169_v6  ;;  %v4748_v51 = vld [vmem:[%s3507_s18 + $0x8c] sm:$0xf] }
 0x25b   : > { %1972 = vst.msk [vmem:[#allocation2 + $0x14] sm:$0xf] %vm1966_vm15, %v1869_v21  ;;  %v2497_v21 = vrot.slane %v2362_v11, 6 }
 0x25c   : > { %2560 = vrot.lane.b32.xlu0 %v2477_v14, %s3471_s26  ;;  %v2171_v14 = vrot.slane %v2169_v6, 4 }
 0x25e   : > { %2190 = vrot.lane.b32.xlu1 %v2086_v58, %s3470_s25  ;;  %v1708_v25 = vpop.permute.xlu0 %1707  ;;  %v2172_v58 = vrot.slane %v4685_v8, 5  ;;  %v4857_v8 = vld [vmem:[%s3507_s18 + $0xac] sm:$0xf] }
 0x25f   : > { %1783 = vst.msk [vmem:[#allocation2 + $0x84] sm:$0xf] %vm1749_vm14, %v1708_v25 }
 0x260   : > { %v1710_v35 = vpop.permute.xlu1 %1709  ;;  %2192 = vrot.lane.b32.xlu2 %v2089_v34, %s3470_s25  ;;  %v2173_v30 = vsel %vm3509_vm2, %v2171_v14, %v2172_v58  ;;  %v2498_v34 = vsel %vm3664_vm6, %v2496_v17, %v2497_v21  ;;  %v4764_v17 = vld [vmem:[%s3507_s18 + $0x3c] sm:$0xf] }
 0x261   : > { %1784 = vst.msk [vmem:[#allocation2 + $0x88] sm:$0xf] %vm1749_vm14, %v1710_v35  ;;  %v2499_v35 = vrot.slane %v2497_v21, 4 }
 0x262   : > { %v1875_v43 = vpop.permute.xlu2 %1874 }
 0x263   : > { %1975 = vst.msk [vmem:[#allocation2 + $0x20] sm:$0xf] %vm1966_vm15, %v1875_v43 }
 0x264   : > { %2210 = vrot.lane.b32.xlu0 %v2116_v9, %s3470_s25  ;;  %v2500_v9 = vrot.slane %v4703_v29, 6 }
 0x266   : > { %2212 = vrot.lane.b32.xlu1 %v2119_v37, %s3470_s25  ;;  %v1859_v48 = vpop.permute.xlu0 %1858  ;;  %v2501_v42 = vsel %vm3664_vm6, %v2499_v35, %v2500_v9 }
 0x267   : > { %1967 = vst.msk [vmem:[#allocation2] sm:$0xf] %vm1966_vm15, %v1859_v48  ;;  %v2151_v48 = vrot.slane %v2028_v41, 5 }
 0x268   : > { %v1861_v52 = vpop.permute.xlu1 %1860  ;;  %2518 = vrot.lane.b32.xlu2 %v2414_v23, %s3471_s26  ;;  %v2803_v23 = vunpack.c.l.b16 %v2699_v49 }
 0x269   : > { %1968 = vst.msk [vmem:[#allocation2 + $0x4] sm:$0xf] %vm1966_vm15, %v1861_v52  ;;  %v1811_v52 = vld [vmem:[%s3507_s18 + $0x88] sm:$0xf] }
 0x26a   : > { %v1881_v57 = vpop.permute.xlu2 %1880 }
 0x26b   : > { %1978 = vst.msk [vmem:[#allocation2 + $0x2c] sm:$0xf] %vm1966_vm15, %v1881_v57  ;;  %v2806_v57 = vpack.c.b16 %v2803_v23, %v2803_v23 }
 0x26c   : > { %2520 = vrot.lane.b32.xlu0 %v2417_v55, %s3471_s26  ;;  %v2150_v55 = vrot.slane %v2148_v59, 4 }
 0x26e   : > { %2538 = vrot.lane.b32.xlu1 %v2444_v33, %s3471_s26  ;;  %v1865_v62 = vpop.permute.xlu0 %1864  ;;  %v2356_v33 = vld [vmem:[%s3507_s18 + $0x88] sm:$0xf] }
 0x26f   : > { %1970 = vst.msk [vmem:[#allocation2 + $0xc] sm:$0xf] %vm1966_vm15, %v1865_v62  ;;  %v2153_v62 = vrot.slane %v2151_v48, 4  ;;  %v2479_v59 = vrot.slane %v2356_v33, 6 }
 0x270   : > { %v1867_v3 = vpop.permute.xlu1 %1866  ;;  %2540 = vrot.lane.b32.xlu2 %v2447_v46, %s3471_s26 }
 0x271   : > { %1971 = vst.msk [vmem:[#allocation2 + $0x10] sm:$0xf] %vm1966_vm15, %v1867_v3  ;;  %v2866_v3 = vsel %vm653_vm4, %v2806_v57, 0  ;;  %v2155_v63 = vsel %vm3509_vm2, %v2153_v62, %v2154_v38  ;;  %v2480_v11 = vsel %vm3664_vm6, %v2478_v50, %v2479_v59  ;;  %v2481_v14 = vrot.slane %v2479_v59, 4  ;;  %v2346_v57 = vld [vmem:[%s3507_s18 + $0x60] sm:$0xf] }
 0x272   : > { %v1887_v12 = vpop.permute.xlu2 %1886  ;;  %3430 = vmatpush.bf16.msra.mxu2 %v2866_v3  ;;  %2873 = vmatpush.bf16.msra.mxu0 %v2866_v3  ;;  %v4804_v62 = vld [vmem:[%s3507_s18 + $0x3c] sm:$0xf]  ;;  %v2449_v47 = vrot.slane %v2346_v57, 6  ;;  %v4817_v59 = vld [vmem:[%s3507_s18 + $0x64] sm:$0xf] }
 0x273   : > { %1981 = vst.msk [vmem:[#allocation2 + $0x38] sm:$0xf] %vm1966_vm15, %v1887_v12  ;;  %3429 = vmatpush.bf16.msra.mxu1 %v2866_v3  ;;  %3431 = vmatpush.bf16.msra.mxu3 %v2866_v3  ;;  %v2422_v50 = vrot.slane %v4804_v62, 6  ;;  %v2030_v57 = vld [vmem:[%s3507_s18 + $0x90] sm:$0xf] }
 0x274   : > { %1918 = vrot.lane.b32.xlu0 %v1816_v5, %s3469_s24  ;;  %v2152_v5 = vsel %vm3509_vm2, %v2150_v55, %v2151_v48  ;;  %v2336_v48 = vld [vmem:[%s3507_s18 + $0x38] sm:$0xf] }
 0x276   : > { %1920 = vrot.lane.b32.xlu1 %v1817_v44, %s3469_s24  ;;  %v1871_v2 = vpop.permute.xlu0 %1870  ;;  %v2008_v44 = vld [vmem:[%s3507_s18 + $0x38] sm:$0xf]  ;;  %3433 = vmatpush.bf16.msra.mxu2 %v3428_v7 }
 0x277   : > { %1973 = vst.msk [vmem:[#allocation2 + $0x18] sm:$0xf] %vm1966_vm15, %v1871_v2  ;;  %v2091_v12 = vrot.slane %v2008_v44, 5  ;;  %v2482_v2 = vrot.slane %v4748_v51, 6  ;;  %2874 = vmatpush.bf16.msra.mxu0 %v3428_v7  ;;  %3432 = vmatpush.bf16.msra.mxu1 %v3428_v7 }
 0x278   : > { %v1873_v25 = vpop.permute.xlu1 %1872  ;;  %2246 = vrot.lane.b32.xlu2 %v2170_v22, %s3470_s25  ;;  %v2090_v22 = vrot.slane %v2088_v19, 4  ;;  %3434 = vmatpush.bf16.msra.mxu3 %v3428_v7  ;;  %v2452_v7 = vrot.slane %v4817_v59, 6 }
 0x279   : > { %1974 = vst.msk [vmem:[#allocation2 + $0x1c] sm:$0xf] %vm1966_vm15, %v1873_v25  ;;  %v3427_v25 = vld [vmem:[%s5325_s1] sm:$0xff]  ;;  %v2093_v35 = vrot.slane %v2091_v12, 4  ;;  %v2483_v13 = vsel %vm3664_vm6, %v2481_v14, %v2482_v2  ;;  %v2036_v14 = vld [vmem:[%s3507_s18 + $0xa8] sm:$0xf] }
 0x27a   : > { %v1893_v15 = vpop.permute.xlu2 %1892  ;;  %3436 = vmatpush.bf16.msra.mxu2 %v3427_v25 }
 0x27b   : > { %1984 = vst.msk [vmem:[#allocation2 + $0x44] sm:$0xf] %vm1966_vm15, %v1893_v15  ;;  %v2094_v15 = vrot.slane %v4764_v17, 5  ;;  %2875 = vmatpush.bf16.msra.mxu0 %v3427_v25  ;;  %3435 = vmatpush.bf16.msra.mxu1 %v3427_v25 }
 0x27c   : > { %2248 = vrot.lane.b32.xlu0 %v2173_v30, %s3470_s25  ;;  %3437 = vmatpush.bf16.msra.mxu3 %v3427_v25  ;;  %v2174_v25 = vrot.slane %v2172_v58, 4 }
 0x27e   : > { %2574 = vrot.lane.b32.xlu1 %v2498_v34, %s3471_s26  ;;  %v1877_v37 = vpop.permute.xlu0 %1876  ;;  %v2018_v34 = vld [vmem:[%s3507_s18 + $0x60] sm:$0xf] }
 0x27f   : > { %1976 = vst.msk [vmem:[#allocation2 + $0x24] sm:$0xf] %vm1966_vm15, %v1877_v37  ;;  %v2092_v37 = vsel %vm3509_vm2, %v2090_v22, %v2091_v12  ;;  %v2121_v41 = vrot.slane %v2018_v34, 5  ;;  %v1818_v34 = vld [vmem:[%s3507_s18 + $0xa4] sm:$0xf] }
 0x280   : > { %v1879_v43 = vpop.permute.xlu1 %1878  ;;  %2576 = vrot.lane.b32.xlu2 %v2501_v42, %s3471_s26  ;;  %v4783_v42 = vld [vmem:[%s3507_s18 + $0x64] sm:$0xf] }
 0x281   : > { %1977 = vst.msk [vmem:[#allocation2 + $0x28] sm:$0xf] %vm1966_vm15, %v1879_v43  ;;  %v2095_v43 = vsel %vm3509_vm2, %v2093_v35, %v2094_v15  ;;  %v2123_v23 = vrot.slane %v2121_v41, 4 }
 0x282   : > { %v1899_v39 = vpop.permute.xlu2 %1898 }
 0x283   : > { %1987 = vst.msk [vmem:[#allocation2 + $0x50] sm:$0xf] %vm1966_vm15, %v1899_v39 }
 0x284   : > { %1906 = vrot.lane.b32.xlu0 %v1810_v45, %s3469_s24  ;;  %v2120_v45 = vrot.slane %v2118_v31, 4  ;;  %v2419_v31 = vrot.slane %v2336_v48, 6 }
 0x286   : > { %1908 = vrot.lane.b32.xlu1 %v1811_v52, %s3469_s24  ;;  %v1883_v46 = vpop.permute.xlu0 %1882  ;;  %v2124_v52 = vrot.slane %v4783_v42, 5  ;;  %v2122_v33 = vsel %vm3509_vm2, %v2120_v45, %v2121_v41  ;;  %v2420_v36 = vsel %vm3664_vm6, %v2418_v20, %v2419_v31  ;;  %v2421_v3 = vrot.slane %v2419_v31, 4 }
 0x287   : > { %1979 = vst.msk [vmem:[#allocation2 + $0x30] sm:$0xf] %vm1966_vm15, %v1883_v46  ;;  %v2506_v20 = vrot.slane %v4857_v8, 6 }
 0x288   : > { %v1885_v6 = vpop.permute.xlu1 %1884  ;;  %2234 = vrot.lane.b32.xlu2 %v2152_v5, %s3470_s25  ;;  %v2125_v46 = vsel %vm3509_vm2, %v2123_v23, %v2124_v52 }
 0x289   : > { %1980 = vst.msk [vmem:[#allocation2 + $0x34] sm:$0xf] %vm1966_vm15, %v1885_v6  ;;  %v2448_v6 = vrot.slane %v2446_v56, 4 }
 0x28a   : > { %v2229_v21 = vpop.permute.xlu2 %2228 }
 0x28b   : > { %v2450_v56 = vsel %vm3664_vm6, %v2448_v6, %v2449_v47 }
 0x28c   : > { %2236 = vrot.lane.b32.xlu0 %v2155_v63, %s3470_s25  ;;  %v2451_v63 = vrot.slane %v2449_v47, 4  ;;  %v2156_v47 = vrot.slane %v2154_v38, 4  ;;  %v4898_v38 = vld [vmem:[%s3507_s18 + $0x94] sm:$0xf] }
 0x28e   : > { %2562 = vrot.lane.b32.xlu1 %v2480_v11, %s3471_s26  ;;  %v1889_v30 = vpop.permute.xlu0 %1888  ;;  %v2423_v11 = vsel %vm3664_vm6, %v2421_v3, %v2422_v50  ;;  %v2453_v12 = vsel %vm3664_vm6, %v2451_v63, %v2452_v7  ;;  %v2157_v3 = vrot.slane %v2030_v57, 5  ;;  %v4888_v63 = vld [vmem:[%s3507_s18 + $0x94] sm:$0xf]  ;;  %v4938_v57 = vld [vmem:[%s3507_s18 + $0x6c] sm:$0xf] }
 0x28f   : > { %1982 = vst.msk [vmem:[#allocation2 + $0x3c] sm:$0xf] %vm1966_vm15, %v1889_v30  ;;  %v2175_v30 = vrot.slane %v2036_v14, 5  ;;  %v2160_v16 = vrot.slane %v4888_v63, 5 }
 0x290   : > { %v1891_v19 = vpop.permute.xlu1 %1890  ;;  %2564 = vrot.lane.b32.xlu2 %v2483_v13, %s3471_s26  ;;  %v2364_v13 = vld [vmem:[%s3507_s18 + $0xa8] sm:$0xf] }
 0x291   : > { %1983 = vst.msk [vmem:[#allocation2 + $0x40] sm:$0xf] %vm1966_vm15, %v1891_v19  ;;  %v4847_v19 = vld [vmem:[%s3507_s18 + $0xac] sm:$0xf]  ;;  %v2176_v41 = vsel %vm3509_vm2, %v2174_v25, %v2175_v30  ;;  %v2177_v45 = vrot.slane %v2175_v30, 4 }
 0x292   : > { %v2187_v49 = vpop.permute.xlu2 %2186  ;;  %v2178_v48 = vrot.slane %v4847_v19, 5  ;;  %v2010_v25 = vld [vmem:[%s3507_s18 + $0x40] sm:$0xf] }
 0x293   : > { %2295 = vst.msk [vmem:[#allocation2] sm:$0xf] %vm2294_vm0, %v2187_v49  ;;  %v2502_v49 = vrot.slane %v2500_v9, 4 }
 0x294   : > { %2194 = vrot.lane.b32.xlu0 %v2092_v37, %s3470_s25  ;;  %v1819_v37 = vld [vmem:[%s3507_s18 + $0xa8] sm:$0xf]  ;;  %v2179_v31 = vsel %vm3509_vm2, %v2177_v45, %v2178_v48  ;;  %v2096_v45 = vrot.slane %v2094_v15, 4 }
 0x296   : > { %2196 = vrot.lane.b32.xlu1 %v2095_v43, %s3470_s25  ;;  %v1895_v55 = vpop.permute.xlu0 %1894  ;;  %v2503_v43 = vrot.slane %v2364_v13, 6 }
 0x297   : > { %1985 = vst.msk [vmem:[#allocation2 + $0x48] sm:$0xf] %vm1966_vm15, %v1895_v55 }
 0x298   : > { %v1897_v39 = vpop.permute.xlu1 %1896  ;;  %2214 = vrot.lane.b32.xlu2 %v2122_v33, %s3470_s25  ;;  %v2505_v55 = vrot.slane %v2503_v43, 4  ;;  %v2504_v9 = vsel %vm3664_vm6, %v2502_v49, %v2503_v43 }
 0x299   : > { %1986 = vst.msk [vmem:[#allocation2 + $0x4c] sm:$0xf] %vm1966_vm15, %v1897_v39 }
 0x29a   : > { %v2209_v5 = vpop.permute.xlu2 %2208  ;;  %v2507_v39 = vsel %vm3664_vm6, %v2505_v55, %v2506_v20 }
 0x29b   : > { %2306 = vst.msk [vmem:[#allocation2 + $0x2c] sm:$0xf] %vm2294_vm0, %v2209_v5  ;;  %v1812_v5 = vld [vmem:[%s3507_s18 + $0x8c] sm:$0xf] }
 0x29c   : > { %2216 = vrot.lane.b32.xlu0 %v2125_v46, %s3470_s25 }
 0x29e   : > { %2522 = vrot.lane.b32.xlu1 %v2420_v36, %s3471_s26  ;;  %v1901_v44 = vpop.permute.xlu0 %1900 }
 0x29f   : > { %1988 = vst.msk [vmem:[#allocation2 + $0x54] sm:$0xf] %vm1966_vm15, %v1901_v44  ;;  %v2358_v44 = vld [vmem:[%s3507_s18 + $0x90] sm:$0xf] }
 0x2a0   : > { %2316 = vst.msk [vmem:[#allocation2 + $0x54] sm:$0xf] %vm2294_vm0, %v2229_v21  ;;  %v2227_v53 = vpop.permute.xlu1 %2226  ;;  %2524 = vrot.lane.b32.xlu2 %v2423_v11, %s3471_s26  ;;  %v1813_v11 = vld [vmem:[%s3507_s18 + $0x90] sm:$0xf] }
 0x2a1   : > { %2315 = vst.msk [vmem:[#allocation2 + $0x50] sm:$0xf] %vm2294_vm0, %v2227_v53  ;;  %v2158_v53 = vsel %vm3509_vm2, %v2156_v47, %v2157_v3  ;;  %v2130_v47 = vrot.slane %v4938_v57, 5 }
 0x2a2   : > { %v2535_v21 = vpop.permute.xlu2 %2534 }
 0x2a4   : > { %2542 = vrot.lane.b32.xlu0 %v2450_v56, %s3471_s26  ;;  %v2485_v56 = vrot.slane %v2358_v44, 6 }
 0x2a6   : > { %2544 = vrot.lane.b32.xlu1 %v2453_v12, %s3471_s26  ;;  %v2555_v22 = vpop.permute.xlu0 %2554  ;;  %v2159_v12 = vrot.slane %v2157_v3, 4  ;;  %v2487_v30 = vrot.slane %v2485_v56, 4  ;;  %v4951_v3 = vld [vmem:[%s3507_s18 + $0x44] sm:$0xf] }
 0x2a7   : > { %2643 = vst.msk [vmem:[#allocation2 + $0x50] sm:$0xf] %vm2622_vm1, %v2555_v22 }
 0x2a8   : > { %v2557_v35 = vpop.permute.xlu1 %2556  ;;  %1922 = vrot.lane.b32.xlu2 %v1818_v34, %s3469_s24  ;;  %v2488_v34 = vrot.slane %v4898_v38, 6 }
 0x2a9   : > { %2644 = vst.msk [vmem:[#allocation2 + $0x54] sm:$0xf] %vm2622_vm1, %v2557_v35  ;;  %v2161_v35 = vsel %vm3509_vm2, %v2159_v12, %v2160_v16 }
 0x2aa   : > { %v1905_v58 = vpop.permute.xlu2 %1904  ;;  %v2489_v43 = vsel %vm3664_vm6, %v2487_v30, %v2488_v34 }
 0x2ab   : > { %1990 = vst.msk [vmem:[#allocation2 + $0x5c] sm:$0xf] %vm1966_vm15, %v1905_v58  ;;  %v2020_v58 = vld [vmem:[%s3507_s18 + $0x68] sm:$0xf] }
 0x2ac   : > { %1924 = vrot.lane.b32.xlu0 %v1819_v37, %s3469_s24  ;;  %v2097_v37 = vrot.slane %v2010_v25, 5  ;;  %v2127_v17 = vrot.slane %v2020_v58, 5  ;;  %v2454_v25 = vrot.slane %v2452_v7, 4  ;;  %v2038_v7 = vld [vmem:[%s3507_s18 + $0xb0] sm:$0xf] }
 0x2ad   : > { %v2181_v58 = vrot.slane %v2038_v7, 5 }
 0x2ae   : > { %2250 = vrot.lane.b32.xlu1 %v2176_v41, %s3470_s25  ;;  %v2189_v23 = vpop.permute.xlu0 %2188  ;;  %v4916_v41 = vld [vmem:[%s3507_s18 + $0x44] sm:$0xf]  ;;  %v2098_v15 = vsel %vm3509_vm2, %v2096_v45, %v2097_v37  ;;  %v1820_v45 = vld [vmem:[%s3507_s18 + $0xac] sm:$0xf] }
 0x2af   : > { %2296 = vst.msk [vmem:[#allocation2 + $0x4] sm:$0xf] %vm2294_vm0, %v2189_v23  ;;  %v2099_v23 = vrot.slane %v2097_v37, 4  ;;  %v2100_v55 = vrot.slane %v4916_v41, 5 }
 0x2b0   : > { %v2207_v33 = vpop.permute.xlu1 %2206  ;;  %v3419_v29 = vld [vmem:[#allocation2 + $0x50] sm:$0xff]  ;;  %2252 = vrot.lane.b32.xlu2 %v2179_v31, %s3470_s25 }
 0x2b1   : > { %2305 = vst.msk [vmem:[#allocation2 + $0x28] sm:$0xf] %vm2294_vm0, %v2207_v33  ;;  %3366 = vmatmul.msk.bf16.vlgmr.msra.gmra.mxu2 %vm2809_vm3, %v3419_v29  ;;  %v2126_v29 = vrot.slane %v2124_v52, 4  ;;  %v2101_v42 = vsel %vm3509_vm2, %v2099_v23, %v2100_v55  ;;  %v2102_v61 = vrot.slane %v2100_v55, 4 }
 0x2b2   : > { %2633 = vst.msk [vmem:[#allocation2 + $0x28] sm:$0xf] %vm2622_vm1, %v2535_v21  ;;  %v2559_v46 = vpop.permute.xlu2 %2558  ;;  %v2484_v21 = vrot.slane %v2482_v2, 4 }
 0x2b3   : > { %v2128_v52 = vsel %vm3509_vm2, %v2126_v29, %v2127_v17  ;;  %v2366_v29 = vld [vmem:[%s3507_s18 + $0xb0] sm:$0xf] }
 0x2b4   : > { %2578 = vrot.lane.b32.xlu0 %v2504_v9, %s3471_s26  ;;  %v2486_v2 = vsel %vm3664_vm6, %v2484_v21, %v2485_v56  ;;  %v2428_v56 = vrot.slane %v4951_v3, 6  ;;  %v4968_v21 = vld [vmem:[%s3507_s18 + $0x6c] sm:$0xf] }
 0x2b6   : > { %2580 = vrot.lane.b32.xlu1 %v2507_v39, %s3471_s26  ;;  %v2515_v36 = vpop.permute.xlu0 %2514  ;;  %v2338_v39 = vld [vmem:[%s3507_s18 + $0x40] sm:$0xf]  ;;  %v2430_v54 = vrot.slane %v2428_v56, 4 }
 0x2b7   : > { %2623 = vst.msk [vmem:[#allocation2] sm:$0xf] %vm2622_vm1, %v2515_v36  ;;  %v2129_v36 = vrot.slane %v2127_v17, 4  ;;  %v2183_v17 = vrot.slane %v2181_v58, 4 }
 0x2b8   : > { %v2517_v6 = vpop.permute.xlu1 %2516  ;;  %1910 = vrot.lane.b32.xlu2 %v1812_v5, %s3469_s24 }
 0x2b9   : > { %2624 = vst.msk [vmem:[#allocation2 + $0x4] sm:$0xf] %vm2622_vm1, %v2517_v6  ;;  %v2424_v6 = vrot.slane %v2422_v50, 4  ;;  %v2131_v12 = vsel %vm3509_vm2, %v2129_v36, %v2130_v47 }
 0x2ba   : > { %v2193_v14 = vpop.permute.xlu2 %2192 }
 0x2bb   : > { %2298 = vst.msk [vmem:[#allocation2 + $0xc] sm:$0xf] %vm2294_vm0, %v2193_v14 }
 0x2bc   : > { %1912 = vrot.lane.b32.xlu0 %v1813_v11, %s3469_s24  ;;  %v2348_v11 = vld [vmem:[%s3507_s18 + $0x68] sm:$0xf] }
 0x2bd   : > { %v2455_v50 = vrot.slane %v2348_v11, 6 }
 0x2be   : > { %2238 = vrot.lane.b32.xlu1 %v2158_v53, %s3470_s25  ;;  %v2537_v22 = vpop.permute.xlu0 %2536 }
 0x2bf   : > { %2634 = vst.msk [vmem:[#allocation2 + $0x2c] sm:$0xf] %vm2622_vm1, %v2537_v22  ;;  %v2456_v37 = vsel %vm3664_vm6, %v2454_v25, %v2455_v50  ;;  %v2162_v25 = vrot.slane %v2160_v16, 4  ;;  %v2490_v16 = vrot.slane %v2488_v34, 4 }
 0x2c0   : > { %v1903_v51 = vpop.permute.xlu1 %1902  ;;  %v3409_v13 = vld [vmem:[#allocation2] sm:$0xff]  ;;  %2240 = vrot.lane.b32.xlu2 %v2161_v35, %s3470_s25  ;;  %v2457_v35 = vrot.slane %v2455_v50, 4 }
 0x2c1   : > { %1989 = vst.msk [vmem:[#allocation2 + $0x58] sm:$0xf] %vm1966_vm15, %v1903_v51  ;;  %3356 = vmatmul.msk.bf16.vlgmr.msra.gmra.mxu0 %vm2809_vm3, %v3409_v13  ;;  %v2458_v51 = vrot.slane %v4968_v21, 6 }
 0x2c2   : > { %v2519_v49 = vpop.permute.xlu2 %2518 }
 0x2c3   : > { %v2460_v24 = vrot.slane %v2458_v51, 4 }
 0x2c4   : > { %2566 = vrot.lane.b32.xlu0 %v2486_v2, %s3471_s26 }
 0x2c6   : > { %2568 = vrot.lane.b32.xlu1 %v2489_v43, %s3471_s26  ;;  %v2231_v31 = vpop.permute.xlu0 %2230  ;;  %v3414_v33 = vld [vmem:[#allocation2 + $0x28] sm:$0xff]  ;;  %v2459_v43 = vsel %vm3664_vm6, %v2457_v35, %v2458_v51  ;;  %v2360_v35 = vld [vmem:[%s3507_s18 + $0x98] sm:$0xf] }
 0x2c7   : > { %2317 = vst.msk [vmem:[#allocation2 + $0x58] sm:$0xf] %vm2294_vm0, %v2231_v31  ;;  %3361 = vmatmul.msk.bf16.vlgmr.msra.gmra.mxu1 %vm2809_vm3, %v3414_v33  ;;  %v2180_v31 = vrot.slane %v2178_v48, 4  ;;  %v2508_v48 = vrot.slane %v2506_v20, 4  ;;  %v2491_v7 = vrot.slane %v2360_v35, 6 }
 0x2c8   : > { %2645 = vst.msk [vmem:[#allocation2 + $0x58] sm:$0xf] %vm2622_vm1, %v2559_v46  ;;  %v2233_v9 = vpop.permute.xlu1 %2232  ;;  %2198 = vrot.lane.b32.xlu2 %v2098_v15, %s3470_s25  ;;  %v2425_v46 = vrot.slane %v2338_v39, 6 }
 0x2c9   : > { %2318 = vst.msk [vmem:[#allocation2 + $0x5c] sm:$0xf] %vm2294_vm0, %v2233_v9  ;;  %v1821_v9 = vld [vmem:[%s3507_s18 + $0xb0] sm:$0xf]  ;;  %v2492_v38 = vsel %vm3664_vm6, %v2490_v16, %v2491_v7 }
 0x2ca   : > { %v2541_v5 = vpop.permute.xlu2 %2540  ;;  %v2427_v53 = vrot.slane %v2425_v46, 4  ;;  %v2426_v62 = vsel %vm3664_vm6, %v2424_v6, %v2425_v46  ;;  %v2367_v46 = vld [vmem:[%s3507_s18 + $0xb4] sm:$0x3] }
 0x2cb   : > { %v2512_v6 = vrot.slane %v2367_v46, 6 }
 0x2cc   : > { %2200 = vrot.lane.b32.xlu0 %v2101_v42, %s3470_s25  ;;  %v2429_v22 = vsel %vm3664_vm6, %v2427_v53, %v2428_v56  ;;  %v2182_v42 = vsel %vm3509_vm2, %v2180_v31, %v2181_v58  ;;  %v2493_v58 = vrot.slane %v2491_v7, 4  ;;  %v2022_v31 = vld [vmem:[%s3507_s18 + $0x70] sm:$0xf] }
 0x2cd   : > { %v2133_v55 = vrot.slane %v2022_v31, 5 }
 0x2ce   : > { %2218 = vrot.lane.b32.xlu1 %v2128_v52, %s3470_s25  ;;  %v2561_v44 = vpop.permute.xlu0 %2560  ;;  %v2509_v52 = vrot.slane %v2366_v29, 6 }
 0x2cf   : > { %2646 = vst.msk [vmem:[#allocation2 + $0x5c] sm:$0xf] %vm2622_vm1, %v2561_v44 }
 0x2d0   : > { %v2191_v14 = vpop.permute.xlu1 %2190  ;;  %2220 = vrot.lane.b32.xlu2 %v2131_v12, %s3470_s25  ;;  %v2510_v53 = vsel %vm3664_vm6, %v2508_v48, %v2509_v52  ;;  %v2032_v12 = vld [vmem:[%s3507_s18 + $0x98] sm:$0xf] }
 0x2d1   : > { %2297 = vst.msk [vmem:[#allocation2 + $0x8] sm:$0xf] %vm2294_vm0, %v2191_v14  ;;  %v2163_v50 = vrot.slane %v2032_v12, 5 }
 0x2d2   : > { %2625 = vst.msk [vmem:[#allocation2 + $0x8] sm:$0xf] %vm2622_vm1, %v2519_v49  ;;  %v2247_v30 = vpop.permute.xlu2 %2246  ;;  %v2039_v49 = vld [vmem:[%s3507_s18 + $0xb4] sm:$0x1] }
 0x2d3   : > { %v2184_v15 = vrot.slane %v2039_v49, 5 }
 0x2d4   : > { %2526 = vrot.lane.b32.xlu0 %v2426_v62, %s3471_s26  ;;  %v1814_v62 = vld [vmem:[%s3507_s18 + $0x94] sm:$0xf] }
 0x2d5   : > { %v2185_v19 = vsel %vm3509_vm2, %v2183_v17, %v2184_v15  ;;  %v2132_v15 = vrot.slane %v2130_v47, 4 }
 0x2d6   : > { %2528 = vrot.lane.b32.xlu1 %v2429_v22, %s3471_s26  ;;  %v2211_v13 = vpop.permute.xlu0 %2210  ;;  %v3420_v2 = vld [vmem:[#allocation2 + $0x58] sm:$0xff] }
 0x2d7   : > { %2307 = vst.msk [vmem:[#allocation2 + $0x30] sm:$0xf] %vm2294_vm0, %v2211_v13  ;;  %3367 = vmatmul.msk.bf16.gmra.mxu2 %vm2809_vm3, %v3420_v2  ;;  %v2165_v13 = vrot.slane %v2163_v50, 4  ;;  %v1815_v2 = vld [vmem:[%s3507_s18 + $0x98] sm:$0xf]  ;;  %v2134_v57 = vsel %vm3509_vm2, %v2132_v15, %v2133_v55 }
 0x2d8   : > { %v2213_v59 = vpop.permute.xlu1 %2212  ;;  %2546 = vrot.lane.b32.xlu2 %v2456_v37, %s3471_s26 }
 0x2d9   : > { %2308 = vst.msk [vmem:[#allocation2 + $0x34] sm:$0xf] %vm2294_vm0, %v2213_v59  ;;  %v2164_v59 = vsel %vm3509_vm2, %v2162_v25, %v2163_v50  ;;  %v2167_v63 = vsel %vm3509_vm2, %v2165_v13, %v2166_v1  ;;  %v5131_v13 = vld [vmem:[%s5326_s2] ss:$0 sm:$0xff] }
 0x2da   : > { %2636 = vst.msk [vmem:[#allocation2 + $0x34] sm:$0xf] %vm2622_vm1, %v2541_v5  ;;  %v2577_v23 = vpop.permute.xlu2 %2576  ;;  %v2511_v5 = vrot.slane %v2509_v52, 4 }
 0x2dc   : > { %2548 = vrot.lane.b32.xlu0 %v2459_v43, %s3471_s26  ;;  %v2513_v14 = vsel %vm3664_vm6, %v2511_v5, %v2512_v6  ;;  %v2012_v43 = vld [vmem:[%s3507_s18 + $0x48] sm:$0xf] }
 0x2dd   : > { %v2103_v1 = vrot.slane %v2012_v43, 5 }
 0x2de   : > { %1926 = vrot.lane.b32.xlu1 %v1820_v45, %s3469_s24  ;;  %v2521_v33 = vpop.permute.xlu0 %2520 }
 0x2df   : > { %2626 = vst.msk [vmem:[#allocation2 + $0xc] sm:$0xf] %vm2622_vm1, %v2521_v33  ;;  %v2495_v33 = vsel %vm3664_vm6, %v2493_v58, %v2494_v10  ;;  %v2104_v41 = vsel %vm3509_vm2, %v2102_v61, %v2103_v1  ;;  %v2105_v29 = vrot.slane %v2103_v1, 4  ;;  %v2340_v10 = vld [vmem:[%s3507_s18 + $0x48] sm:$0xf] }
 0x2e0   : > { %v2539_v39 = vpop.permute.xlu1 %2538  ;;  %1928 = vrot.lane.b32.xlu2 %v1821_v9, %s3469_s24  ;;  %v2135_v9 = vrot.slane %v2133_v55, 4  ;;  %v2431_v47 = vrot.slane %v2340_v10, 6 }
 0x2e1   : > { %2635 = vst.msk [vmem:[#allocation2 + $0x30] sm:$0xf] %vm2622_vm1, %v2539_v39  ;;  %v2107_v39 = vsel %vm3509_vm2, %v2105_v29, %v2106_v60  ;;  %v2350_v60 = vld [vmem:[%s3507_s18 + $0x70] sm:$0xf] }
 0x2e2   : > { %v2235_v36 = vpop.permute.xlu2 %2234  ;;  %v2137_v52 = vsel %vm3509_vm2, %v2135_v9, %v2136_v28  ;;  %v2461_v0 = vrot.slane %v2350_v60, 6  ;;  %v2432_v28 = vsel %vm3664_vm6, %v2430_v54, %v2431_v47  ;;  %vm3075_vm2 = vcmask 125952  }
 0x2e4   : > { %2254 = vrot.lane.b32.xlu0 %v2182_v42, %s3470_s25  ;;  %v2462_v21 = vsel %vm3664_vm6, %v2460_v24, %v2461_v0  ;;  %v2463_v51 = vrot.slane %v2461_v0, 4 }
 0x2e6   : > { %2256 = vrot.lane.b32.xlu1 %v2185_v19, %s3470_s25  ;;  %v1919_v44 = vpop.permute.xlu0 %1918  ;;  %v3410_v11 = vld [vmem:[#allocation2 + $0x8] sm:$0xff]  ;;  %v2433_v19 = vrot.slane %v2431_v47, 4  ;;  %v2465_v18 = vsel %vm3664_vm6, %v2463_v51, %v2464_v40 }
 0x2e7   : > { %1997 = vst.msk [vmem:[#allocation2 + $0x78] sm:$0xf] %vm1966_vm15, %v1919_v44  ;;  %3357 = vmatmul.msk.bf16.gmra.mxu0 %vm2809_vm3, %v3410_v11 }
 0x2e8   : > { %2325 = vst.msk [vmem:[#allocation2 + $0x78] sm:$0xf] %vm2294_vm0, %v2247_v30  ;;  %v1921_v8 = vpop.permute.xlu1 %1920  ;;  %v3415_v20 = vld [vmem:[#allocation2 + $0x30] sm:$0xff]  ;;  %2582 = vrot.lane.b32.xlu2 %v2510_v53, %s3471_s26 }
 0x2e9   : > { %1998 = vst.msk [vmem:[#allocation2 + $0x7c] sm:$0xf] %vm1966_vm15, %v1921_v8  ;;  %3362 = vmatmul.msk.bf16.gmra.mxu1 %vm2809_vm3, %v3415_v20 }
 0x2ea   : > { %v2565_v22 = vpop.permute.xlu2 %2564 }
 0x2ec   : > { %2584 = vrot.lane.b32.xlu0 %v2513_v14, %s3471_s26 }
 0x2ee   : > { %1914 = vrot.lane.b32.xlu1 %v1814_v62, %s3469_s24  ;;  %v2249_v30 = vpop.permute.xlu0 %2248 }
 0x2ef   : > { %2326 = vst.msk [vmem:[#allocation2 + $0x7c] sm:$0xf] %vm2294_vm0, %v2249_v30 }
 0x2f0   : > { %2654 = vst.msk [vmem:[#allocation2 + $0x7c] sm:$0xf] %vm2622_vm1, %v2577_v23  ;;  %v2575_v37 = vpop.permute.xlu1 %2574  ;;  %1916 = vrot.lane.b32.xlu2 %v1815_v2, %s3469_s24 }
 0x2f1   : > { %2653 = vst.msk [vmem:[#allocation2 + $0x78] sm:$0xf] %vm2622_vm1, %v2575_v37 }
 0x2f2   : > { %v2215_v45 = vpop.permute.xlu2 %2214 }
 0x2f3   : > { %2309 = vst.msk [vmem:[#allocation2 + $0x38] sm:$0xf] %vm2294_vm0, %v2215_v45 }
 0x2f4   : > { %2242 = vrot.lane.b32.xlu0 %v2164_v59, %s3470_s25 }
 0x2f6   : > { %2244 = vrot.lane.b32.xlu1 %v2167_v63, %s3470_s25  ;;  %v1907_v49 = vpop.permute.xlu0 %1906 }
 0x2f7   : > { %1991 = vst.msk [vmem:[#allocation2 + $0x60] sm:$0xf] %vm1966_vm15, %v1907_v49 }
 0x2f8   : > { %2319 = vst.msk [vmem:[#allocation2 + $0x60] sm:$0xf] %vm2294_vm0, %v2235_v36  ;;  %v1909_v34 = vpop.permute.xlu1 %1908  ;;  %v3424_v23 = vld [vmem:[#allocation2 + $0x78] sm:$0xff]  ;;  %2570 = vrot.lane.b32.xlu2 %v2492_v38, %s3471_s26  ;;  %v2435_v36 = vsel %vm3664_vm6, %v2433_v19, %v2434_v27 }
 0x2f9   : > { %1992 = vst.msk [vmem:[#allocation2 + $0x64] sm:$0xf] %vm1966_vm15, %v1909_v34  ;;  %3371 = vmatmul.msk.bf16.vlgmr.msra.gmra.mxu3 %vm2809_vm3, %v3424_v23 }
 0x2fa   : > { %v2525_v17 = vpop.permute.xlu2 %2524 }
 0x2fc   : > { %2572 = vrot.lane.b32.xlu0 %v2495_v33, %s3471_s26 }
 0x2fe   : > { %2202 = vrot.lane.b32.xlu1 %v2104_v41, %s3470_s25  ;;  %v2237_v4 = vpop.permute.xlu0 %2236 }
 0x2ff   : > { %2320 = vst.msk [vmem:[#allocation2 + $0x64] sm:$0xf] %vm2294_vm0, %v2237_v4 }
 0x300   : > { %2648 = vst.msk [vmem:[#allocation2 + $0x64] sm:$0xf] %vm2622_vm1, %v2565_v22  ;;  %v2563_v42 = vpop.permute.xlu1 %2562  ;;  %2204 = vrot.lane.b32.xlu2 %v2107_v39, %s3470_s25 }
 0x301   : > { %2647 = vst.msk [vmem:[#allocation2 + $0x60] sm:$0xf] %vm2622_vm1, %v2563_v42 }
 0x302   : > { %v1923_v46 = vpop.permute.xlu2 %1922 }
 0x303   : > { %1999 = vst.msk [vmem:[#allocation2 + $0x80] sm:$0xf] %vm1966_vm15, %v1923_v46 }
 0x304   : > { %2222 = vrot.lane.b32.xlu0 %v2134_v57, %s3470_s25 }
 0x306   : > { %2224 = vrot.lane.b32.xlu1 %v2137_v52, %s3470_s25  ;;  %v2195_v48 = vpop.permute.xlu0 %2194 }
 0x307   : > { %2299 = vst.msk [vmem:[#allocation2 + $0x10] sm:$0xf] %vm2294_vm0, %v2195_v48 }
 0x308   : > { %v2197_v3 = vpop.permute.xlu1 %2196  ;;  %v3421_v56 = vld [vmem:[#allocation2 + $0x60] sm:$0xff]  ;;  %2530 = vrot.lane.b32.xlu2 %v2432_v28, %s3471_s26 }
 0x309   : > { %2300 = vst.msk [vmem:[#allocation2 + $0x14] sm:$0xf] %vm2294_vm0, %v2197_v3  ;;  %3368 = vmatmul.msk.bf16.gmra.mxu2 %vm2809_vm3, %v3421_v56 }
 0x30a   : > { %2628 = vst.msk [vmem:[#allocation2 + $0x14] sm:$0xf] %vm2622_vm1, %v2525_v17  ;;  %v2253_v5 = vpop.permute.xlu2 %2252 }
 0x30c   : > { %2532 = vrot.lane.b32.xlu0 %v2435_v36, %s3471_s26 }
 0x30e   : > { %2550 = vrot.lane.b32.xlu1 %v2462_v21, %s3471_s26  ;;  %v2217_v6 = vpop.permute.xlu0 %2216 }
 0x30f   : > { %2310 = vst.msk [vmem:[#allocation2 + $0x3c] sm:$0xf] %vm2294_vm0, %v2217_v6 }
 0x310   : > { %v2523_v27 = vpop.permute.xlu1 %2522  ;;  %2552 = vrot.lane.b32.xlu2 %v2465_v18, %s3471_s26 }
 0x311   : > { %2627 = vst.msk [vmem:[#allocation2 + $0x10] sm:$0xf] %vm2622_vm1, %v2523_v27 }
 0x312   : > { %v1911_v44 = vpop.permute.xlu2 %1910 }
 0x313   : > { %1993 = vst.msk [vmem:[#allocation2 + $0x68] sm:$0xf] %vm1966_vm15, %v1911_v44 }
 0x316   : > { %v2543_v11 = vpop.permute.xlu0 %2542 }
 0x317   : > { %2637 = vst.msk [vmem:[#allocation2 + $0x38] sm:$0xf] %vm2622_vm1, %v2543_v11 }
 0x318   : > { %v2545_v53 = vpop.permute.xlu1 %2544  ;;  %v3411_v8 = vld [vmem:[#allocation2 + $0x10] sm:$0xff] }
 0x319   : > { %2638 = vst.msk [vmem:[#allocation2 + $0x3c] sm:$0xf] %vm2622_vm1, %v2545_v53  ;;  %3358 = vmatmul.msk.bf16.gmra.mxu0 %vm2809_vm3, %v3411_v8 }
 0x31a   : > { %v2241_v32 = vpop.permute.xlu2 %2240 }
 0x31e   : > { %v1925_v40 = vpop.permute.xlu0 %1924 }
 0x31f   : > { %2000 = vst.msk [vmem:[#allocation2 + $0x84] sm:$0xf] %vm1966_vm15, %v1925_v40 }
 0x320   : > { %2328 = vst.msk [vmem:[#allocation2 + $0x84] sm:$0xf] %vm2294_vm0, %v2253_v5  ;;  %v2251_v20 = vpop.permute.xlu1 %2250  ;;  %v3416_v12 = vld [vmem:[#allocation2 + $0x38] sm:$0xff] }
 0x321   : > { %2327 = vst.msk [vmem:[#allocation2 + $0x80] sm:$0xf] %vm2294_vm0, %v2251_v20  ;;  %3363 = vmatmul.msk.bf16.gmra.mxu1 %vm2809_vm3, %v3416_v12 }
 0x322   : > { %v2199_v14 = vpop.permute.xlu2 %2198 }
 0x323   : > { %2301 = vst.msk [vmem:[#allocation2 + $0x18] sm:$0xf] %vm2294_vm0, %v2199_v14 }
 0x326   : > { %v2579_v62 = vpop.permute.xlu0 %2578 }
 0x327   : > { %2655 = vst.msk [vmem:[#allocation2 + $0x80] sm:$0xf] %vm2622_vm1, %v2579_v62 }
 0x328   : > { %v2581_v50 = vpop.permute.xlu1 %2580 }
 0x329   : > { %2656 = vst.msk [vmem:[#allocation2 + $0x84] sm:$0xf] %vm2622_vm1, %v2581_v50 }
 0x32a   : > { %v2221_v22 = vpop.permute.xlu2 %2220 }
 0x32b   : > { %2312 = vst.msk [vmem:[#allocation2 + $0x44] sm:$0xf] %vm2294_vm0, %v2221_v22 }
 0x32e   : > { %v1913_v25 = vpop.permute.xlu0 %1912 }
 0x32f   : > { %1994 = vst.msk [vmem:[#allocation2 + $0x6c] sm:$0xf] %vm1966_vm15, %v1913_v25 }
 0x330   : > { %2322 = vst.msk [vmem:[#allocation2 + $0x6c] sm:$0xf] %vm2294_vm0, %v2241_v32  ;;  %v2239_v30 = vpop.permute.xlu1 %2238  ;;  %v3425_v35 = vld [vmem:[#allocation2 + $0x80] sm:$0xff] }
 0x331   : > { %2321 = vst.msk [vmem:[#allocation2 + $0x68] sm:$0xf] %vm2294_vm0, %v2239_v30  ;;  %3372 = vmatmul.msk.bf16.gmra.mxu3 %vm2809_vm3, %v3425_v35 }
 0x332   : > { %v2547_v2 = vpop.permute.xlu2 %2546 }
 0x334   : > { %v2927_v37 = vpop.f32.mrf.mxu2 }
 0x335   : > { %v2928_v7 = vadd.f32 %v5131_v13, %v2927_v37 }
 0x336   : > { %v2567_v59 = vpop.permute.xlu0 %2566 }
 0x337   : > { %2649 = vst.msk [vmem:[#allocation2 + $0x68] sm:$0xf] %vm2622_vm1, %v2567_v59  ;;  %v2987_v63 = vmul.f32 0.2, %v2928_v7 }
 0x338   : > { %v2569_v16 = vpop.permute.xlu1 %2568 }
 0x339   : > { %2650 = vst.msk [vmem:[#allocation2 + $0x6c] sm:$0xf] %vm2622_vm1, %v2569_v16  ;;  %v3023_v43 = vmax.f32 %v2928_v7, %v2987_v63 }
 0x33a   : > { %v1929_v58 = vpop.permute.xlu2 %1928 }
 0x33b   : > { %v3059_v45 = vpack.c.bf16 %v3023_v43, %v3023_v43  ;;  %2002 = vst.msk [vmem:[#allocation2 + $0x8c] sm:$0xf] %vm1966_vm15, %v1929_v58 }
 0x33c   : > { %v2929_v49 = vpop.f32.mrf.mxu2 }
 0x33d   : > { %3390 = vst.msk [vmem:[%s5139_s13 + $0x48] sm:$0xf] %vm3075_vm2, %v3059_v45  ;;  %v2930_v1 = vadd.f32 %v5131_v13, %v2929_v49 }
 0x33e   : > { %v2201_v61 = vpop.permute.xlu0 %2200  ;;  %v2877_v38 = vpop.f32.mrf.mxu0 }
 0x33f   : > { %2302 = vst.msk [vmem:[#allocation2 + $0x1c] sm:$0xf] %vm2294_vm0, %v2201_v61  ;;  %v2988_v34 = vmul.f32 0.2, %v2930_v1  ;;  %v2878_v31 = vadd.f32 %v5131_v13, %v2877_v38 }
 0x340   : > { %v2219_v23 = vpop.permute.xlu1 %2218  ;;  %v3422_v33 = vld [vmem:[#allocation2 + $0x68] sm:$0xff] }
 0x341   : > { %2311 = vst.msk [vmem:[#allocation2 + $0x40] sm:$0xf] %vm2294_vm0, %v2219_v23  ;;  %v3024_v41 = vmax.f32 %v2930_v1, %v2988_v34  ;;  %v2967_v55 = vmul.f32 0.2, %v2878_v31  ;;  %3369 = vmatmul.msk.bf16.gmra.mxu2 %vm2809_vm3, %v3422_v33 }
 0x342   : > { %2639 = vst.msk [vmem:[#allocation2 + $0x40] sm:$0xf] %vm2622_vm1, %v2547_v2  ;;  %v2583_v15 = vpop.permute.xlu2 %2582 }
 0x343   : > { %v3060_v29 = vpack.c.bf16 %v3024_v41, %v3024_v41  ;;  %v3003_v17 = vmax.f32 %v2878_v31, %v2967_v55 }
 0x344   : > { %v2902_v4 = vpop.f32.mrf.mxu1 }
 0x345   : > { %3391 = vst.msk [vmem:[%s5139_s13 + $0x4c] sm:$0xf] %vm3075_vm2, %v3060_v29  ;;  %v3039_v10 = vpack.c.bf16 %v3003_v17, %v3003_v17  ;;  %v2903_v39 = vadd.f32 %v5131_v13, %v2902_v4 }
 0x346   : > { %v2527_v9 = vpop.permute.xlu0 %2526  ;;  %v2879_v42 = vpop.f32.mrf.mxu0 }
 0x347   : > { %2629 = vst.msk [vmem:[#allocation2 + $0x18] sm:$0xf] %vm2622_vm1, %v2527_v9  ;;  %v2977_v57 = vmul.f32 0.2, %v2903_v39  ;;  %v2880_v52 = vadd.f32 %v5131_v13, %v2879_v42 }
 0x348   : > { %3076 = vst.msk [vmem:[%s5139_s13] sm:$0xf] %vm3075_vm2, %v3039_v10  ;;  %v2529_v47 = vpop.permute.xlu1 %2528 }
 0x349   : > { %2630 = vst.msk [vmem:[#allocation2 + $0x1c] sm:$0xf] %vm2622_vm1, %v2529_v47  ;;  %v3013_v54 = vmax.f32 %v2903_v39, %v2977_v57  ;;  %v2968_v60 = vmul.f32 0.2, %v2880_v52 }
 0x34a   : > { %v1917_v48 = vpop.permute.xlu2 %1916 }
 0x34b   : > { %v3049_v46 = vpack.c.bf16 %v3013_v54, %v3013_v54  ;;  %v3004_v19 = vmax.f32 %v2880_v52, %v2968_v60  ;;  %1996 = vst.msk [vmem:[#allocation2 + $0x74] sm:$0xf] %vm1966_vm15, %v1917_v48 }
 0x34c   : > { %v2904_v24 = vpop.f32.mrf.mxu1 }
 0x34d   : > { %3380 = vst.msk [vmem:[%s5139_s13 + $0x24] sm:$0xf] %vm3075_vm2, %v3049_v46  ;;  %v3040_v0 = vpack.c.bf16 %v3004_v19, %v3004_v19  ;;  %v2905_v3 = vadd.f32 %v5131_v13, %v2904_v24 }
 0x34e   : > { %v2549_v28 = vpop.permute.xlu0 %2548 }
 0x34f   : > { %2640 = vst.msk [vmem:[#allocation2 + $0x44] sm:$0xf] %vm2622_vm1, %v2549_v28  ;;  %v2978_v56 = vmul.f32 0.2, %v2905_v3 }
 0x350   : > { %3077 = vst.msk [vmem:[%s5139_s13 + $0x4] sm:$0xf] %vm3075_vm2, %v3040_v0  ;;  %v1927_v36 = vpop.permute.xlu1 %1926  ;;  %v3412_v21 = vld [vmem:[#allocation2 + $0x18] sm:$0xff] }
 0x351   : > { %2001 = vst.msk [vmem:[#allocation2 + $0x88] sm:$0xf] %vm1966_vm15, %v1927_v36  ;;  %v3014_v51 = vmax.f32 %v2905_v3, %v2978_v56  ;;  %3359 = vmatmul.msk.bf16.gmra.mxu0 %vm2809_vm3, %v3412_v21 }
 0x352   : > { %v2571_v6 = vpop.permute.xlu2 %2570 }
 0x353   : > { %v3050_v5 = vpack.c.bf16 %v3014_v51, %v3014_v51 }
 0x355   : > { %3381 = vst.msk [vmem:[%s5139_s13 + $0x28] sm:$0xf] %vm3075_vm2, %v3050_v5 }
 0x356   : > { %v2255_v18 = vpop.permute.xlu0 %2254  ;;  %v3417_v27 = vld [vmem:[#allocation2 + $0x40] sm:$0xff] }
 0x357   : > { %2329 = vst.msk [vmem:[#allocation2 + $0x88] sm:$0xf] %vm2294_vm0, %v2255_v18  ;;  %3364 = vmatmul.msk.bf16.gmra.mxu1 %vm2809_vm3, %v3417_v27 }
 0x358   : > { %2657 = vst.msk [vmem:[#allocation2 + $0x88] sm:$0xf] %vm2622_vm1, %v2583_v15  ;;  %v2257_v44 = vpop.permute.xlu1 %2256 }
 0x359   : > { %2330 = vst.msk [vmem:[#allocation2 + $0x8c] sm:$0xf] %vm2294_vm0, %v2257_v44 }
 0x35a   : > { %v2932_v11 = vpop.f32.mrf.mxu2  ;;  %v2205_v8 = vpop.permute.xlu2 %2204 }
 0x35b   : > { %v2933_v53 = vadd.f32 %v5131_v13, %v2932_v11  ;;  %2304 = vst.msk [vmem:[#allocation2 + $0x24] sm:$0xf] %vm2294_vm0, %v2205_v8 }
 0x35d   : > { %v2989_v40 = vmul.f32 0.2, %v2933_v53 }
 0x35e   : > { %v2585_v32 = vpop.permute.xlu0 %2584 }
 0x35f   : > { %2658 = vst.msk [vmem:[#allocation2 + $0x8c] sm:$0xf] %vm2622_vm1, %v2585_v32  ;;  %v3025_v14 = vmax.f32 %v2933_v53, %v2989_v40 }
 0x360   : > { %v1915_v20 = vpop.permute.xlu1 %1914 }
 0x361   : > { %1995 = vst.msk [vmem:[#allocation2 + $0x70] sm:$0xf] %vm1966_vm15, %v1915_v20  ;;  %v3061_v37 = vpack.c.bf16 %v3025_v14, %v3025_v14 }
 0x362   : > { %v2934_v12 = vpop.f32.mrf.mxu2  ;;  %v2531_v23 = vpop.permute.xlu2 %2530 }
 0x363   : > { %v2935_v62 = vadd.f32 %v5131_v13, %v2934_v12  ;;  %v3392_v49 = vrot.slane %v3061_v37, 10 }
 0x364   : > { %v2882_v50 = vpop.f32.mrf.mxu0 }
 0x365   : > { %v2990_v22 = vmul.f32 0.2, %v2935_v62  ;;  %v2883_v30 = vadd.f32 %v5131_v13, %v2882_v50 }
 0x366   : > { %v2243_v25 = vpop.permute.xlu0 %2242  ;;  %v3426_v35 = vld [vmem:[#allocation2 + $0x88] sm:$0xff]  ;;  %v2907_v2 = vpop.f32.mrf.mxu1 }
 0x367   : > { %2323 = vst.msk [vmem:[#allocation2 + $0x70] sm:$0xf] %vm2294_vm0, %v2243_v25  ;;  %v3026_v59 = vmax.f32 %v2935_v62, %v2990_v22  ;;  %v2969_v7 = vmul.f32 0.2, %v2883_v30  ;;  %v2908_v16 = vadd.f32 %v5131_v13, %v2907_v2  ;;  %3373 = vmatmul.msk.bf16.gmra.mxu3 %vm2809_vm3, %v3426_v35 }
 0x368   : > { %2651 = vst.msk [vmem:[#allocation2 + $0x70] sm:$0xf] %vm2622_vm1, %v2571_v6  ;;  %v2245_v63 = vpop.permute.xlu1 %2244 }
 0x369   : > { %2324 = vst.msk [vmem:[#allocation2 + $0x74] sm:$0xf] %vm2294_vm0, %v2245_v63  ;;  %v3062_v43 = vpack.c.bf16 %v3026_v59, %v3026_v59  ;;  %v3005_v45 = vmax.f32 %v2883_v30, %v2969_v7  ;;  %v2979_v58 = vmul.f32 0.2, %v2908_v16 }
 0x36a   : > { %v2553_v9 = vpop.permute.xlu2 %2552 }
 0x36b   : > { %v3151_v61 = vrot.slane %v3062_v43, 6  ;;  %v3041_v1 = vpack.c.bf16 %v3005_v45, %v3005_v45  ;;  %v3015_v38 = vmax.f32 %v2908_v16, %v2979_v58 }
 0x36c   : > { %v2884_v34 = vpop.f32.mrf.mxu0 }
 0x36d   : > { %v3152_v31 = vsel %vm3664_vm6, %v3392_v49, %v3151_v61  ;;  %3078 = vst.msk [vmem:[%s5139_s13 + $0x8] sm:$0xf] %vm3075_vm2, %v3041_v1  ;;  %v3051_v33 = vpack.c.bf16 %v3015_v38, %v3015_v38  ;;  %v2885_v55 = vadd.f32 %v5131_v13, %v2884_v34  ;;  %v3153_v51 = vrot.slane %v3151_v61, 4 }
 0x36e   : > { %v2573_v41 = vpop.permute.xlu0 %2572  ;;  %3393 = vst.msk [vmem:[%s5139_s13 + $0x50] sm:$0xf] %vm3075_vm2, %v3152_v31  ;;  %v2909_v5 = vpop.f32.mrf.mxu1 }
 0x36f   : > { %3382 = vst.msk [vmem:[%s5139_s13 + $0x2c] sm:$0xf] %vm3075_vm2, %v3051_v33  ;;  %v2970_v29 = vmul.f32 0.2, %v2885_v55  ;;  %v2910_v8 = vadd.f32 %v5131_v13, %v2909_v5 }
 0x370   : > { %v2203_v17 = vpop.permute.xlu1 %2202  ;;  %2652 = vst.msk [vmem:[#allocation2 + $0x74] sm:$0xf] %vm2622_vm1, %v2573_v41 }
 0x371   : > { %v3006_v15 = vmax.f32 %v2885_v55, %v2970_v29  ;;  %2303 = vst.msk [vmem:[#allocation2 + $0x20] sm:$0xf] %vm2294_vm0, %v2203_v17  ;;  %v2980_v12 = vmul.f32 0.2, %v2910_v8 }
 0x372   : > { %2631 = vst.msk [vmem:[#allocation2 + $0x20] sm:$0xf] %vm2622_vm1, %v2531_v23 }
 0x373   : > { %v3042_v4 = vpack.c.bf16 %v3006_v15, %v3006_v15  ;;  %v3016_v2 = vmax.f32 %v2910_v8, %v2980_v12 }
 0x375   : > { %3079 = vst.msk [vmem:[%s5139_s13 + $0xc] sm:$0xf] %vm3075_vm2, %v3042_v4  ;;  %v3052_v43 = vpack.c.bf16 %v3016_v2, %v3016_v2 }
 0x376   : > { %v2223_v10 = vpop.permute.xlu0 %2222 }
 0x377   : > { %2313 = vst.msk [vmem:[#allocation2 + $0x48] sm:$0xf] %vm2294_vm0, %v2223_v10  ;;  %v3423_v42 = vld [vmem:[#allocation2 + $0x70] sm:$0xff]  ;;  %v3383_v23 = vrot.slane %v3052_v43, 10 }
 0x378   : > { %v2225_v39 = vpop.permute.xlu1 %2224  ;;  %3370 = vmatmul.msk.bf16.gmra.mxu2 %vm2809_vm3, %v3423_v42 }
 0x379   : > { %2314 = vst.msk [vmem:[#allocation2 + $0x4c] sm:$0xf] %vm2294_vm0, %v2225_v39 }
 0x37a   : > { %2642 = vst.msk [vmem:[#allocation2 + $0x4c] sm:$0xf] %vm2622_vm1, %v2553_v9 }
 0x37c   : > { %v2952_v57 = vpop.f32.mrf.mxu3 }
 0x37d   : > { %v2953_v52 = vadd.f32 %v5131_v13, %v2952_v57 }
 0x37e   : > { %v2533_v47 = vpop.permute.xlu0 %2532 }
 0x37f   : > { %2632 = vst.msk [vmem:[#allocation2 + $0x24] sm:$0xf] %vm2622_vm1, %v2533_v47  ;;  %v2997_v54 = vmul.f32 0.2, %v2953_v52 }
 0x380   : > { %v2551_v60 = vpop.permute.xlu1 %2550 }
 0x381   : > { %2641 = vst.msk [vmem:[#allocation2 + $0x48] sm:$0xf] %vm2622_vm1, %v2551_v60  ;;  %v3033_v46 = vmax.f32 %v2953_v52, %v2997_v54 }
 0x383   : > { %v3069_v19 = vpack.c.bf16 %v3033_v46, %v3033_v46 }
 0x384   : > { %v2954_v55 = vpop.f32.mrf.mxu3 }
 0x385   : > { %3400 = vst.msk [vmem:[%s5139_s13 + $0x6c] sm:$0xf] %vm3075_vm2, %v3069_v19  ;;  %v2955_v15 = vadd.f32 %v5131_v13, %v2954_v55 }
 0x386   : > { %v3413_v48 = vld [vmem:[#allocation2 + $0x20] sm:$0xff] }
 0x387   : > { %3360 = vmatmul.msk.bf16.gmra.mxu0 %vm2809_vm3, %v3413_v48  ;;  %v2998_v39 = vmul.f32 0.2, %v2955_v15 }
 0x388   : > { %v3418_v24 = vld [vmem:[#allocation2 + $0x48] sm:$0xff] }
 0x389   : > { %3365 = vmatmul.msk.bf16.gmra.mxu1 %vm2809_vm3, %v3418_v24  ;;  %v3034_v47 = vmax.f32 %v2955_v15, %v2998_v39 }
 0x38b   : > { %v3070_v60 = vpack.c.bf16 %v3034_v47, %v3034_v47 }
 0x38c   : > { %v2937_v0 = vpop.f32.mrf.mxu2 }
 0x38d   : > { %v2938_v28 = vadd.f32 %v5131_v13, %v2937_v0  ;;  %v3401_v24 = vrot.slane %v3070_v60, 10 }
 0x38f   : > { %v2991_v3 = vmul.f32 0.2, %v2938_v28 }
 0x391   : > { %v3027_v56 = vmax.f32 %v2938_v28, %v2991_v3 }
 0x393   : > { %v3063_v36 = vpack.c.bf16 %v3027_v56, %v3027_v56 }
 0x394   : > { %v2939_v21 = vpop.f32.mrf.mxu2 }
 0x395   : > { %v3154_v6 = vrot.slane %v3063_v36, 6  ;;  %v2940_v18 = vadd.f32 %v5131_v13, %v2939_v21 }
 0x396   : > { %v2887_v27 = vpop.f32.mrf.mxu0 }
 0x397   : > { %v3155_v44 = vsel %vm3664_vm6, %v3153_v51, %v3154_v6  ;;  %v2992_v11 = vmul.f32 0.2, %v2940_v18  ;;  %v2888_v53 = vadd.f32 %v5131_v13, %v2887_v27  ;;  %v3156_v14 = vrot.slane %v3154_v6, 4 }
 0x398   : > { %3394 = vst.msk [vmem:[%s5139_s13 + $0x54] sm:$0xf] %vm3075_vm2, %v3155_v44 }
 0x399   : > { %v3028_v32 = vmax.f32 %v2940_v18, %v2992_v11  ;;  %v2971_v20 = vmul.f32 0.2, %v2888_v53 }
 0x39b   : > { %v3064_v40 = vpack.c.bf16 %v3028_v32, %v3028_v32  ;;  %v3007_v30 = vmax.f32 %v2888_v53, %v2971_v20 }
 0x39d   : > { %v5217_v62 = vrot.slane %v3064_v40, 6  ;;  %v3043_v63 = vpack.c.bf16 %v3007_v30, %v3007_v30 }
 0x39e   : > { %v2889_v50 = vpop.f32.mrf.mxu0  ;;  %v2912_v22 = vpop.f32.mrf.mxu1 }
 0x39f   : > { %v3158_v25 = vsel %vm3664_vm6, %v3156_v14, %v5217_v62  ;;  %v2890_v35 = vadd.f32 %v5131_v13, %v2889_v50  ;;  %v2913_v37 = vadd.f32 %v5131_v13, %v2912_v22  ;;  %v3374_v1 = vrot.slane %v3043_v63, 10 }
 0x3a0   : > { %3395 = vst.msk [vmem:[%s5139_s13 + $0x58] sm:$0xf] %vm3075_vm2, %v3158_v25  ;;  %v3159_v32 = vrot.slane %v5217_v62, 4 }
 0x3a1   : > { %v2972_v59 = vmul.f32 0.2, %v2890_v35  ;;  %v2981_v7 = vmul.f32 0.2, %v2913_v37 }
 0x3a3   : > { %v3008_v16 = vmax.f32 %v2890_v35, %v2972_v59  ;;  %v3017_v45 = vmax.f32 %v2913_v37, %v2981_v7 }
 0x3a5   : > { %v3044_v58 = vpack.c.bf16 %v3008_v16, %v3008_v16  ;;  %v3053_v49 = vpack.c.bf16 %v3017_v45, %v3017_v45 }
 0x3a6   : > { %v2914_v61 = vpop.f32.mrf.mxu1 }
 0x3a7   : > { %v5226_v38 = vrot.slane %v3044_v58, 6  ;;  %v2915_v34 = vadd.f32 %v5131_v13, %v2914_v61  ;;  %v3119_v31 = vrot.slane %v3053_v49, 6 }
 0x3a9   : > { %v3088_v33 = vsel %vm3664_vm6, %v3374_v1, %v5226_v38  ;;  %v2982_v41 = vmul.f32 0.2, %v2915_v34  ;;  %v3120_v29 = vsel %vm3664_vm6, %v3383_v23, %v3119_v31  ;;  %v3121_v10 = vrot.slane %v3119_v31, 4 }
 0x3aa   : > { %3375 = vst.msk [vmem:[%s5139_s13 + $0x10] sm:$0xf] %vm3075_vm2, %v3088_v33  ;;  %v3089_v63 = vrot.slane %v5226_v38, 4 }
 0x3ab   : > { %3384 = vst.msk [vmem:[%s5139_s13 + $0x30] sm:$0xf] %vm3075_vm2, %v3120_v29  ;;  %v3018_v17 = vmax.f32 %v2915_v34, %v2982_v41 }
 0x3ad   : > { %v3054_v4 = vpack.c.bf16 %v3018_v17, %v3018_v17 }
 0x3af   : > { %v5239_v9 = vrot.slane %v3054_v4, 6 }
 0x3b1   : > { %v3123_v42 = vsel %vm3664_vm6, %v3121_v10, %v5239_v9  ;;  %v3124_v31 = vrot.slane %v5239_v9, 4 }
 0x3b2   : > { %3385 = vst.msk [vmem:[%s5139_s13 + $0x34] sm:$0xf] %vm3075_vm2, %v3123_v42 }
 0x3b4   : > { %v2957_v57 = vpop.f32.mrf.mxu3 }
 0x3b5   : > { %v2958_v52 = vadd.f32 %v5131_v13, %v2957_v57 }
 0x3b7   : > { %v2999_v54 = vmul.f32 0.2, %v2958_v52 }
 0x3b9   : > { %v3035_v46 = vmax.f32 %v2958_v52, %v2999_v54 }
 0x3bb   : > { %v3071_v19 = vpack.c.bf16 %v3035_v46, %v3035_v46 }
 0x3bc   : > { %v2959_v48 = vpop.f32.mrf.mxu3 }
 0x3bd   : > { %v3183_v0 = vrot.slane %v3071_v19, 6  ;;  %v2960_v28 = vadd.f32 %v5131_v13, %v2959_v48 }
 0x3bf   : > { %v3184_v3 = vsel %vm3664_vm6, %v3401_v24, %v3183_v0  ;;  %v3000_v56 = vmul.f32 0.2, %v2960_v28  ;;  %v3185_v5 = vrot.slane %v3183_v0, 4 }
 0x3c0   : > { %3402 = vst.msk [vmem:[%s5139_s13 + $0x70] sm:$0xf] %vm3075_vm2, %v3184_v3 }
 0x3c1   : > { %v3036_v36 = vmax.f32 %v2960_v28, %v3000_v56 }
 0x3c3   : > { %v3072_v21 = vpack.c.bf16 %v3036_v36, %v3036_v36 }
 0x3c4   : > { %v2942_v51 = vpop.f32.mrf.mxu2 }
 0x3c5   : > { %v5252_v6 = vrot.slane %v3072_v21, 6  ;;  %v2943_v18 = vadd.f32 %v5131_v13, %v2942_v51 }
 0x3c7   : > { %v3187_v27 = vsel %vm3664_vm6, %v3185_v5, %v5252_v6  ;;  %v2993_v44 = vmul.f32 0.2, %v2943_v18  ;;  %v3188_v48 = vrot.slane %v5252_v6, 4 }
 0x3c8   : > { %3403 = vst.msk [vmem:[%s5139_s13 + $0x74] sm:$0xf] %vm3075_vm2, %v3187_v27 }
 0x3c9   : > { %v3029_v11 = vmax.f32 %v2943_v18, %v2993_v44 }
 0x3cb   : > { %v3065_v53 = vpack.c.bf16 %v3029_v11, %v3029_v11 }
 0x3cc   : > { %v2944_v8 = vpop.f32.mrf.mxu2 }
 0x3cd   : > { %v3160_v40 = vrot.slane %v3065_v53, 6  ;;  %v2945_v20 = vadd.f32 %v5131_v13, %v2944_v8 }
 0x3ce   : > { %v2892_v12 = vpop.f32.mrf.mxu0 }
 0x3cf   : > { %v3161_v14 = vsel %vm3664_vm6, %v3159_v32, %v3160_v40  ;;  %v2994_v50 = vmul.f32 0.2, %v2945_v20  ;;  %v2893_v22 = vadd.f32 %v5131_v13, %v2892_v12 }
 0x3d0   : > { %3396 = vst.msk [vmem:[%s5139_s13 + $0x5c] sm:$0xf] %vm3075_vm2, %v3161_v14 }
 0x3d1   : > { %v3030_v25 = vmax.f32 %v2945_v20, %v2994_v50  ;;  %v2973_v30 = vmul.f32 0.2, %v2893_v22 }
 0x3d3   : > { %v3066_v35 = vpack.c.bf16 %v3030_v25, %v3030_v25  ;;  %v3009_v2 = vmax.f32 %v2893_v22, %v2973_v30 }
 0x3d4   : > { %v2917_v37 = vpop.f32.mrf.mxu1 }
 0x3d5   : > { %3397 = vst.msk [vmem:[%s5139_s13 + $0x60] sm:$0xf] %vm3075_vm2, %v3066_v35  ;;  %v3045_v62 = vpack.c.bf16 %v3009_v2, %v3009_v2  ;;  %v2918_v59 = vadd.f32 %v5131_v13, %v2917_v37 }
 0x3d6   : > { %v2894_v7 = vpop.f32.mrf.mxu0 }
 0x3d7   : > { %v3090_v16 = vrot.slane %v3045_v62, 6  ;;  %v2983_v43 = vmul.f32 0.2, %v2918_v59  ;;  %v2895_v45 = vadd.f32 %v5131_v13, %v2894_v7 }
 0x3d9   : > { %v3091_v58 = vsel %vm3664_vm6, %v3089_v63, %v3090_v16  ;;  %v3019_v49 = vmax.f32 %v2918_v59, %v2983_v43  ;;  %v2974_v61 = vmul.f32 0.2, %v2895_v45  ;;  %v3092_v55 = vrot.slane %v3090_v16, 4 }
 0x3da   : > { %3376 = vst.msk [vmem:[%s5139_s13 + $0x14] sm:$0xf] %vm3075_vm2, %v3091_v58 }
 0x3db   : > { %v3055_v1 = vpack.c.bf16 %v3019_v49, %v3019_v49  ;;  %v3010_v34 = vmax.f32 %v2895_v45, %v2974_v61 }
 0x3dc   : > { %v2919_v23 = vpop.f32.mrf.mxu1 }
 0x3dd   : > { %v3125_v38 = vrot.slane %v3055_v1, 6  ;;  %v3046_v33 = vpack.c.bf16 %v3010_v34, %v3010_v34  ;;  %v2920_v41 = vadd.f32 %v5131_v13, %v2919_v23 }
 0x3df   : > { %v3126_v29 = vsel %vm3664_vm6, %v3124_v31, %v3125_v38  ;;  %v3093_v17 = vrot.slane %v3046_v33, 6  ;;  %v2984_v15 = vmul.f32 0.2, %v2920_v41  ;;  %v3127_v39 = vrot.slane %v3125_v38, 4 }
 0x3e0   : > { %3386 = vst.msk [vmem:[%s5139_s13 + $0x38] sm:$0xf] %vm3075_vm2, %v3126_v29 }
 0x3e1   : > { %v3094_v4 = vsel %vm3664_vm6, %v3092_v55, %v3093_v17  ;;  %v3020_v10 = vmax.f32 %v2920_v41, %v2984_v15  ;;  %v3095_v59 = vrot.slane %v3093_v17, 4 }
 0x3e2   : > { %3377 = vst.msk [vmem:[%s5139_s13 + $0x18] sm:$0xf] %vm3075_vm2, %v3094_v4 }
 0x3e3   : > { %v3056_v9 = vpack.c.bf16 %v3020_v10, %v3020_v10 }
 0x3e5   : > { %v3128_v42 = vrot.slane %v3056_v9, 6 }
 0x3e7   : > { %v3129_v57 = vsel %vm3664_vm6, %v3127_v39, %v3128_v42 }
 0x3e8   : > { %3387 = vst.msk [vmem:[%s5139_s13 + $0x3c] sm:$0xf] %vm3075_vm2, %v3129_v57 }
 0x3ea   : > { %v2962_v47 = vpop.f32.mrf.mxu3 }
 0x3eb   : > { %v2963_v52 = vadd.f32 %v5131_v13, %v2962_v47 }
 0x3ed   : > { %v3001_v54 = vmul.f32 0.2, %v2963_v52 }
 0x3ef   : > { %v3037_v60 = vmax.f32 %v2963_v52, %v3001_v54 }
 0x3f1   : > { %v3073_v46 = vpack.c.bf16 %v3037_v60, %v3037_v60 }
 0x3f2   : > { %v2964_v19 = vpop.f32.mrf.mxu3 }
 0x3f3   : > { %v3189_v24 = vrot.slane %v3073_v46, 6  ;;  %v2965_v0 = vadd.f32 %v5131_v13, %v2964_v19 }
 0x3f5   : > { %v3190_v28 = vsel %vm3664_vm6, %v3188_v48, %v3189_v24  ;;  %v3002_v3 = vmul.f32 0.2, %v2965_v0  ;;  %v3191_v21 = vrot.slane %v3189_v24, 4 }
 0x3f6   : > { %3404 = vst.msk [vmem:[%s5139_s13 + $0x78] sm:$0xf] %vm3075_vm2, %v3190_v28 }
 0x3f7   : > { %v3038_v56 = vmax.f32 %v2965_v0, %v3002_v3 }
 0x3f9   : > { %v3074_v36 = vpack.c.bf16 %v3038_v56, %v3038_v56 }
 0x3fb   : > { %v3192_v51 = vrot.slane %v3074_v36, 6  ;;  %v2947_v5 = vpop.f32.mrf.mxu2 }
 0x3fc   : > { %v2948_v6 = vadd.f32 %v5131_v13, %v2947_v5 }
 0x3fd   : > { %v3193_v18 = vsel %vm3664_vm6, %v3191_v21, %v3192_v51 }
 0x3fe   : > { %3405 = vst.msk [vmem:[%s5139_s13 + $0x7c] sm:$0xf] %vm3075_vm2, %v3193_v18  ;;  %v2995_v27 = vmul.f32 0.2, %v2948_v6 }
 0x400   : > { %v3031_v44 = vmax.f32 %v2948_v6, %v2995_v27 }
 0x402   : > { %v3067_v11 = vpack.c.bf16 %v3031_v44, %v3031_v44 }
 0x403   : > { %v2949_v53 = vpop.f32.mrf.mxu2 }
 0x404   : > { %v2897_v8 = vpop.f32.mrf.mxu0  ;;  %3398 = vst.msk [vmem:[%s5139_s13 + $0x64] sm:$0xf] %vm3075_vm2, %v3067_v11  ;;  %v2950_v32 = vadd.f32 %v5131_v13, %v2949_v53 }
 0x405   : > { %v2898_v40 = vadd.f32 %v5131_v13, %v2897_v8 }
 0x406   : > { %v2922_v20 = vpop.f32.mrf.mxu1  ;;  %v2996_v12 = vmul.f32 0.2, %v2950_v32 }
 0x407   : > { %v2975_v14 = vmul.f32 0.2, %v2898_v40  ;;  %v2923_v50 = vadd.f32 %v5131_v13, %v2922_v20 }
 0x408   : > { %v3032_v22 = vmax.f32 %v2950_v32, %v2996_v12 }
 0x409   : > { %v3011_v25 = vmax.f32 %v2898_v40, %v2975_v14  ;;  %v2985_v30 = vmul.f32 0.2, %v2923_v50 }
 0x40a   : > { %v3068_v35 = vpack.c.bf16 %v3032_v22, %v3032_v22 }
 0x40b   : > { %v3047_v2 = vpack.c.bf16 %v3011_v25, %v3011_v25  ;;  %v3021_v37 = vmax.f32 %v2923_v50, %v2985_v30 }
 0x40c   : > { %v2899_v62 = vpop.f32.mrf.mxu0  ;;  %3399 = vst.msk [vmem:[%s5139_s13 + $0x68] sm:$0xf] %vm3075_vm2, %v3068_v35 }
 0x40d   : > { %v3096_v7 = vrot.slane %v3047_v2, 6  ;;  %v3057_v63 = vpack.c.bf16 %v3021_v37, %v3021_v37  ;;  %v2900_v16 = vadd.f32 %v5131_v13, %v2899_v62 }
 0x40e   : > { %v2924_v43 = vpop.f32.mrf.mxu1 }
 0x40f   : > { %v3097_v45 = vsel %vm3664_vm6, %v3095_v59, %v3096_v7  ;;  %3388 = vst.msk [vmem:[%s5139_s13 + $0x40] sm:$0xf] %vm3075_vm2, %v3057_v63  ;;  %v2976_v58 = vmul.f32 0.2, %v2900_v16  ;;  %v2925_v49 = vadd.f32 %v5131_v13, %v2924_v43 }
 0x410   : > { %3378 = vst.msk [vmem:[%s5139_s13 + $0x1c] sm:$0xf] %vm3075_vm2, %v3097_v45 }
 0x411   : > { %v3012_v61 = vmax.f32 %v2900_v16, %v2976_v58  ;;  %v2986_v1 = vmul.f32 0.2, %v2925_v49 }
 0x413   : > { %v3048_v34 = vpack.c.bf16 %v3012_v61, %v3012_v61  ;;  %v3022_v23 = vmax.f32 %v2925_v49, %v2986_v1 }
 0x415   : > { %3379 = vst.msk [vmem:[%s5139_s13 + $0x20] sm:$0xf] %vm3075_vm2, %v3048_v34  ;;  %v3058_v31 = vpack.c.bf16 %v3022_v23, %v3022_v23 }
 0x417   : > { %3389 = vst.msk [vmem:[%s5139_s13 + $0x44] sm:$0xf] %vm3075_vm2, %v3058_v31 }
 0x418 PF: > { %s13_s12 = sadd.s32 1, %s3462_s12  }
 0x419   : > { %p10_p5 = scmp.ge.s32.totalorder %s13_s12, 4  }
 0x41b   :  { %12 = sbr.rel (!%p10_p5) target bundleno = 1 (0x1), region = 69 }

</bundles_post_ra>
